<compile_context>
chip_gen: v7x
topology: tpu7x:2x2x1
jax: 0.10.0
libtpu: 0.0.40
codegen_flags: <defaults>
</compile_context>

<pallas_src>
import functools

import jax
import jax.numpy as jnp
from jax import lax
from jax.experimental import pallas as pl
from jax.experimental.pallas import tpu as pltpu

_EPS = 1e-5
_VMEM_LIMIT = 32 * 1024 * 1024   # explicit scoped-VMEM budget; safe on v5e/v6e/v7x


# ----------------------------- Pallas kernel -----------------------------

def _decoder_layer_kernel(tgt_ref, qpos_ref, mem_ref, pos_ref,
                          sa_wqkv_ref, sa_bqkv_ref, sa_wo_ref, sa_bo_ref, ln1_g_ref, ln1_b_ref,
                          ca_wqkv_ref, ca_bqkv_ref, ca_wo_ref, ca_bo_ref, ln2_g_ref, ln2_b_ref,
                          w1_ref, b1_ref, w2_ref, b2_ref, ln3_g_ref, ln3_b_ref,
                          o_ref, *, nhead, scale):
    """One batch element of the full DETR decoder layer (forward_post, eval mode)."""
    tgt = tgt_ref[0]           # [T, D]  target queries
    qpos = qpos_ref[0]         # [T, D]  query positional embedding
    mem = mem_ref[0]           # [S, D]  encoder memory
    pos = pos_ref[0]           # [S, D]  memory positional embedding

    def mha(q_src, k_src, v_src, wqkv_ref, bqkv_ref, wo_ref, bo_ref):
        # Input projections: lane-dense [*, D] MXU matmuls with f32 accumulation.
        q = jnp.dot(q_src, wqkv_ref[0], preferred_element_type=jnp.float32) + bqkv_ref[0]
        k = jnp.dot(k_src, wqkv_ref[1], preferred_element_type=jnp.float32) + bqkv_ref[1]
        v = jnp.dot(v_src, wqkv_ref[2], preferred_element_type=jnp.float32) + bqkv_ref[2]
        q = q * scale

        d_model = q.shape[-1]
        dh = d_model // nhead

        # Per-head attention (unrolled; nhead is small).  The output projection is accumulated
        # per head from sublane-sliced rows of W_o, so no dh-wide tile is ever stored to VMEM.
        proj = None
        for h in range(nhead):
            lo = h * dh
            qh = q[:, lo:lo + dh]              # [Lq, dh]
            kh = k[:, lo:lo + dh]              # [Lk, dh]
            vh = v[:, lo:lo + dh]              # [Lk, dh]
            # scores: contract the last dims directly (no explicit K transpose / XLU copy).
            s = lax.dot_general(qh, kh, dimension_numbers=(((1,), (1,)), ((), ())),
                                preferred_element_type=jnp.float32)        # [Lq, Lk]
            m = jnp.max(s, axis=-1, keepdims=True)
            p = jnp.exp(s - m)
            p = p * pl.reciprocal(jnp.sum(p, axis=-1, keepdims=True), approx=True)
            oh = jnp.dot(p, vh, preferred_element_type=jnp.float32)        # [Lq, dh]
            contrib = jnp.dot(oh, wo_ref[lo:lo + dh, :],
                              preferred_element_type=jnp.float32)          # [Lq, D]
            proj = contrib if proj is None else proj + contrib
        return proj + bo_ref[...]

    def layer_norm(x, g, b):
        mean = jnp.mean(x, axis=-1, keepdims=True)
        var = jnp.mean((x - mean) ** 2, axis=-1, keepdims=True)
        return (x - mean) * lax.rsqrt(var + _EPS) * g + b

    # ---- self attention + residual + norm1 ----
    q_in = tgt + qpos
    sa = mha(q_in, q_in, tgt, sa_wqkv_ref, sa_bqkv_ref, sa_wo_ref, sa_bo_ref)
    x = layer_norm(tgt + sa, ln1_g_ref[...], ln1_b_ref[...])

    # ---- cross attention + residual + norm2 ----
    ca = mha(x + qpos, mem + pos, mem, ca_wqkv_ref, ca_bqkv_ref, ca_wo_ref, ca_bo_ref)
    x = layer_norm(x + ca, ln2_g_ref[...], ln2_b_ref[...])

    # ---- feed-forward (relu) + residual + norm3 ----
    h1 = jnp.dot(x, w1_ref[...], preferred_element_type=jnp.float32) + b1_ref[...]
    h1 = jnp.maximum(h1, 0.0)
    ff = jnp.dot(h1, w2_ref[...], preferred_element_type=jnp.float32) + b2_ref[...]
    o_ref[0] = layer_norm(x + ff, ln3_g_ref[...], ln3_b_ref[...])


# ----------------------------- layer assembly -----------------------------

def transformer_decoder_layer_post(tgt, memory, params, nhead,
                                   pos=None, query_pos=None):
    """forward_post semantics; masks are None, dropout is identity (eval).

    tgt: [T, B, D], memory: [S, B, D], pos: [S, B, D], query_pos: [T, B, D].
    """
    T, B, D = tgt.shape
    S = memory.shape[0]
    F = params["w1"].shape[1]
    dh = D // nhead
    scale = 1.0 / (dh ** 0.5)

    def bm(x):  # [L, B, D] -> [B, L, D]  (one-time layout change for lane-dense tiles)
        return jnp.transpose(x, (1, 0, 2))

    tgt_b = bm(tgt)
    mem_b = bm(memory)
    qpos_b = bm(query_pos) if query_pos is not None else jnp.zeros((B, T, D), jnp.float32)
    pos_b = bm(pos) if pos is not None else jnp.zeros((B, S, D), jnp.float32)

    def resident(shape):
        n = len(shape)
        return pl.BlockSpec(shape, lambda b, _n=n: (0,) * _n)

    sa_p, ca_p = params["self_attn"], params["cross_attn"]
    kern = functools.partial(_decoder_layer_kernel, nhead=nhead, scale=scale)

    out = pl.pallas_call(
        kern,
        out_shape=jax.ShapeDtypeStruct((B, T, D), jnp.float32),
        grid=(B,),
        in_specs=[
            pl.BlockSpec((1, T, D), lambda b: (b, 0, 0)),    # tgt
            pl.BlockSpec((1, T, D), lambda b: (b, 0, 0)),    # query_pos
            pl.BlockSpec((1, S, D), lambda b: (b, 0, 0)),    # memory
            pl.BlockSpec((1, S, D), lambda b: (b, 0, 0)),    # pos
            resident((3, D, D)),                             # self-attn packed Wq/Wk/Wv
            resident((3, 1, D)),                             # self-attn packed bq/bk/bv
            resident((D, D)),                                 # self-attn Wo
            resident((1, D)),                                 # self-attn bo
            resident((1, D)), resident((1, D)),               # LN1 gamma / beta
            resident((3, D, D)),                             # cross-attn packed Wq/Wk/Wv
            resident((3, 1, D)),                             # cross-attn packed bq/bk/bv
            resident((D, D)),                                 # cross-attn Wo
            resident((1, D)),                                 # cross-attn bo
            resident((1, D)), resident((1, D)),               # LN2 gamma / beta
            resident((D, F)), resident((1, F)),               # FFN W1 / b1
            resident((F, D)), resident((1, D)),               # FFN W2 / b2
            resident((1, D)), resident((1, D)),               # LN3 gamma / beta
        ],
        out_specs=pl.BlockSpec((1, T, D), lambda b: (b, 0, 0)),
        compiler_params=pltpu.CompilerParams(
            dimension_semantics=("parallel",),
            vmem_limit_bytes=_VMEM_LIMIT),
    )(tgt_b, qpos_b, mem_b, pos_b,
      sa_p["w_qkv"], sa_p["b_qkv"], sa_p["wo"], sa_p["bo"], params["ln1_g"], params["ln1_b"],
      ca_p["w_qkv"], ca_p["b_qkv"], ca_p["wo"], ca_p["bo"], params["ln2_g"], params["ln2_b"],
      params["w1"], params["b1"], params["w2"], params["b2"], params["ln3_g"], params["ln3_b"])

    return jnp.transpose(out, (1, 0, 2))                     # back to [T, B, D]


# ----------------------------- pure-JAX reference -----------------------------

def _ref_mha(q_in, k_in, v_in, p, nhead):
    Lq, B, D = q_in.shape
    Lk = k_in.shape[0]
    dh = D // nhead
    scale = 1.0 / (dh ** 0.5)
    q = q_in.reshape(Lq * B, D) @ p["w_qkv"][0] + p["b_qkv"][0]
    k = k_in.reshape(Lk * B, D) @ p["w_qkv"][1] + p["b_qkv"][1]
    v = v_in.reshape(Lk * B, D) @ p["w_qkv"][2] + p["b_qkv"][2]
    q = q.reshape(Lq, B, nhead, dh).transpose(1, 2, 0, 3) * scale   # [B,H,Lq,dh]
    k = k.reshape(Lk, B, nhead, dh).transpose(1, 2, 0, 3)
    v = v.reshape(Lk, B, nhead, dh).transpose(1, 2, 0, 3)
    s = jnp.einsum("bhtd,bhsd->bhts", q, k)
    a = jax.nn.softmax(s, axis=-1)
    o = jnp.einsum("bhts,bhsd->bhtd", a, v)
    o = o.transpose(2, 0, 1, 3).reshape(Lq, B, D)
    return (o.reshape(Lq * B, D) @ p["wo"] + p["bo"]).reshape(Lq, B, D)


def _ref_ln(x, g, b, eps=_EPS):
    m = jnp.mean(x, axis=-1, keepdims=True)
    v = jnp.mean((x - m) ** 2, axis=-1, keepdims=True)
    return (x - m) * lax.rsqrt(v + eps) * g + b


def reference_layer(tgt, memory, params, nhead, pos, query_pos):
    q = k = tgt + query_pos
    sa = _ref_mha(q, k, tgt, params["self_attn"], nhead)
    out = _ref_ln(tgt + sa, params["ln1_g"], params["ln1_b"])
    ca = _ref_mha(out + query_pos, memory + pos, memory, params["cross_attn"], nhead)
    out = _ref_ln(out + ca, params["ln2_g"], params["ln2_b"])
    T, B, D = out.shape
    h = jnp.maximum(out.reshape(T * B, D) @ params["w1"] + params["b1"], 0.0)
    ff = (h @ params["w2"] + params["b2"]).reshape(T, B, D)
    return _ref_ln(out + ff, params["ln3_g"], params["ln3_b"])


# ----------------------------- parameter init -----------------------------

def init_params(key, d_model, nhead, dim_feedforward):
    def nrm(k, shape, s=0.05):
        return (s * jax.random.normal(k, shape)).astype(jnp.float32)

    D, F = d_model, dim_feedforward
    keys = jax.random.split(key, 12)

    def attn_params(kw, kb, kwo, kbo):
        return {
            "w_qkv": nrm(kw, (3, D, D)),            # packed Wq / Wk / Wv
            "b_qkv": nrm(kb, (3, 1, D)),            # packed bq / bk / bv
            "wo": nrm(kwo, (D, D)),
            "bo": nrm(kbo, (1, D)),
        }

    return {
        "self_attn": attn_params(keys[0], keys[1], keys[2], keys[3]),
        "cross_attn": attn_params(keys[4], keys[5], keys[6], keys[7]),
        "w1": nrm(keys[8], (D, F)), "b1": nrm(keys[9], (1, F)),
        "w2": nrm(keys[10], (F, D)), "b2": nrm(keys[11], (1, D)),
        "ln1_g": jnp.ones((1, D), jnp.float32), "ln1_b": jnp.zeros((1, D), jnp.float32),
        "ln2_g": jnp.ones((1, D), jnp.float32), "ln2_b": jnp.zeros((1, D), jnp.float32),
        "ln3_g": jnp.ones((1, D), jnp.float32), "ln3_b": jnp.zeros((1, D), jnp.float32),
    }


# ----------------------------- main -----------------------------

if __name__ == "__main__":
    # Small but lane-dense shapes (D = 128 so last dims are full 128-lane tiles).
    d_model, nhead, dim_ff = 128, 4, 256
    T, S, B = 16, 32, 2          # num queries, h*w, batch

    key = jax.random.PRNGKey(0)
    k_tgt, k_mem, k_pos, k_qpos, k_par = jax.random.split(key, 5)

    tgt = jax.random.normal(k_tgt, (T, B, d_model), jnp.float32)
    memory = jax.random.normal(k_mem, (S, B, d_model), jnp.float32)
    pos = jax.random.normal(k_pos, (S, B, d_model), jnp.float32)
    query_pos = jax.random.normal(k_qpos, (T, B, d_model), jnp.float32)

    params = init_params(k_par, d_model, nhead, dim_ff)

    layer = jax.jit(functools.partial(transformer_decoder_layer_post, nhead=nhead))
    out = layer(tgt, memory, params, pos=pos, query_pos=query_pos)
    out = jax.block_until_ready(out)

    with jax.default_matmul_precision("highest"):
        ref = reference_layer(tgt, memory, params, nhead, pos, query_pos)

    assert out.shape == (T, B, d_model)
    err = float(jnp.max(jnp.abs(out - ref)))
    # Tolerance accounts for the EUP approximate reciprocal in softmax + accumulation-order
    # differences; genuine bugs produce O(0.1 - 1) errors.
    assert err < 5e-3, f"mismatch vs JAX reference: max abs err = {err}"

    print("KERNEL_OK")
</pallas_src>

<mosaic_0001>
module attributes {stable_mosaic.version = 11 : i64} {
  func.func @_decoder_layer_kernel(%arg0: i32, %arg1: memref<1x16x128xf32, #tpu.memory_space<vmem>>, %arg2: memref<1x16x128xf32, #tpu.memory_space<vmem>>, %arg3: memref<1x32x128xf32, #tpu.memory_space<vmem>>, %arg4: memref<1x32x128xf32, #tpu.memory_space<vmem>>, %arg5: memref<3x128x128xf32, #tpu.memory_space<vmem>>, %arg6: memref<3x1x128xf32, #tpu.memory_space<vmem>>, %arg7: memref<128x128xf32, #tpu.memory_space<vmem>>, %arg8: memref<1x128xf32, #tpu.memory_space<vmem>>, %arg9: memref<1x128xf32, #tpu.memory_space<vmem>>, %arg10: memref<1x128xf32, #tpu.memory_space<vmem>>, %arg11: memref<3x128x128xf32, #tpu.memory_space<vmem>>, %arg12: memref<3x1x128xf32, #tpu.memory_space<vmem>>, %arg13: memref<128x128xf32, #tpu.memory_space<vmem>>, %arg14: memref<1x128xf32, #tpu.memory_space<vmem>>, %arg15: memref<1x128xf32, #tpu.memory_space<vmem>>, %arg16: memref<1x128xf32, #tpu.memory_space<vmem>>, %arg17: memref<128x256xf32, #tpu.memory_space<vmem>>, %arg18: memref<1x256xf32, #tpu.memory_space<vmem>>, %arg19: memref<256x128xf32, #tpu.memory_space<vmem>>, %arg20: memref<1x128xf32, #tpu.memory_space<vmem>>, %arg21: memref<1x128xf32, #tpu.memory_space<vmem>>, %arg22: memref<1x128xf32, #tpu.memory_space<vmem>>, %arg23: memref<1x16x128xf32, #tpu.memory_space<vmem>>) attributes {dimension_semantics = [#tpu.dimension_semantics<parallel>], iteration_bounds = array<i64: 2>, scalar_prefetch = 0 : i64, scratch_operands = 0 : i64, tpu.core_type = #tpu.core_type<tc>, window_params = [{transform_indices = @transform_0, window_bounds = array<i64: 1, 16, 128>}, {transform_indices = @transform_1, window_bounds = array<i64: 1, 16, 128>}, {transform_indices = @transform_2, window_bounds = array<i64: 1, 32, 128>}, {transform_indices = @transform_3, window_bounds = array<i64: 1, 32, 128>}, {pipeline_mode = #tpu.pipeline_mode<synchronous>, transform_indices = @transform_4, window_bounds = array<i64: 3, 128, 128>}, {pipeline_mode = #tpu.pipeline_mode<synchronous>, transform_indices = @transform_5, window_bounds = array<i64: 3, 1, 128>}, {pipeline_mode = #tpu.pipeline_mode<synchronous>, transform_indices = @transform_6, window_bounds = array<i64: 128, 128>}, {pipeline_mode = #tpu.pipeline_mode<synchronous>, transform_indices = @transform_7, window_bounds = array<i64: 1, 128>}, {pipeline_mode = #tpu.pipeline_mode<synchronous>, transform_indices = @transform_8, window_bounds = array<i64: 1, 128>}, {pipeline_mode = #tpu.pipeline_mode<synchronous>, transform_indices = @transform_9, window_bounds = array<i64: 1, 128>}, {pipeline_mode = #tpu.pipeline_mode<synchronous>, transform_indices = @transform_10, window_bounds = array<i64: 3, 128, 128>}, {pipeline_mode = #tpu.pipeline_mode<synchronous>, transform_indices = @transform_11, window_bounds = array<i64: 3, 1, 128>}, {pipeline_mode = #tpu.pipeline_mode<synchronous>, transform_indices = @transform_12, window_bounds = array<i64: 128, 128>}, {pipeline_mode = #tpu.pipeline_mode<synchronous>, transform_indices = @transform_13, window_bounds = array<i64: 1, 128>}, {pipeline_mode = #tpu.pipeline_mode<synchronous>, transform_indices = @transform_14, window_bounds = array<i64: 1, 128>}, {pipeline_mode = #tpu.pipeline_mode<synchronous>, transform_indices = @transform_15, window_bounds = array<i64: 1, 128>}, {pipeline_mode = #tpu.pipeline_mode<synchronous>, transform_indices = @transform_16, window_bounds = array<i64: 128, 256>}, {pipeline_mode = #tpu.pipeline_mode<synchronous>, transform_indices = @transform_17, window_bounds = array<i64: 1, 256>}, {pipeline_mode = #tpu.pipeline_mode<synchronous>, transform_indices = @transform_18, window_bounds = array<i64: 256, 128>}, {pipeline_mode = #tpu.pipeline_mode<synchronous>, transform_indices = @transform_19, window_bounds = array<i64: 1, 128>}, {pipeline_mode = #tpu.pipeline_mode<synchronous>, transform_indices = @transform_20, window_bounds = array<i64: 1, 128>}, {pipeline_mode = #tpu.pipeline_mode<synchronous>, transform_indices = @transform_21, window_bounds = array<i64: 1, 128>}, {transform_indices = @transform_22, window_bounds = array<i64: 1, 16, 128>}]} {
    %c0 = arith.constant 0 : index
    %c0_0 = arith.constant 0 : index
    %c0_1 = arith.constant 0 : index
    %0 = vector.load %arg1[%c0, %c0_0, %c0_1] : memref<1x16x128xf32, #tpu.memory_space<vmem>>, vector<1x16x128xf32>
    %1 = vector.shape_cast %0 : vector<1x16x128xf32> to vector<16x128xf32>
    %c0_2 = arith.constant 0 : index
    %c0_3 = arith.constant 0 : index
    %c0_4 = arith.constant 0 : index
    %2 = vector.load %arg2[%c0_2, %c0_3, %c0_4] : memref<1x16x128xf32, #tpu.memory_space<vmem>>, vector<1x16x128xf32>
    %3 = vector.shape_cast %2 : vector<1x16x128xf32> to vector<16x128xf32>
    %c0_5 = arith.constant 0 : index
    %c0_6 = arith.constant 0 : index
    %c0_7 = arith.constant 0 : index
    %4 = vector.load %arg3[%c0_5, %c0_6, %c0_7] : memref<1x32x128xf32, #tpu.memory_space<vmem>>, vector<1x32x128xf32>
    %5 = vector.shape_cast %4 : vector<1x32x128xf32> to vector<32x128xf32>
    %c0_8 = arith.constant 0 : index
    %c0_9 = arith.constant 0 : index
    %c0_10 = arith.constant 0 : index
    %6 = vector.load %arg4[%c0_8, %c0_9, %c0_10] : memref<1x32x128xf32, #tpu.memory_space<vmem>>, vector<1x32x128xf32>
    %7 = vector.shape_cast %6 : vector<1x32x128xf32> to vector<32x128xf32>
    %8 = arith.addf %1, %3 : vector<16x128xf32>
    %c0_11 = arith.constant 0 : index
    %c0_12 = arith.constant 0 : index
    %c0_13 = arith.constant 0 : index
    %9 = vector.load %arg5[%c0_11, %c0_12, %c0_13] : memref<3x128x128xf32, #tpu.memory_space<vmem>>, vector<1x128x128xf32>
    %10 = vector.shape_cast %9 : vector<1x128x128xf32> to vector<128x128xf32>
    %cst = arith.constant dense<0.000000e+00> : vector<16x128xf32>
    %11 = tpu.matmul %8, %10, %cst {dimension_numbers = #tpu.dot_dimension_numbers<[1], [0], [0], [1], [0, 0, 1, 1], [], []>} : vector<16x128xf32>, vector<128x128xf32>, vector<16x128xf32> -> vector<16x128xf32>
    %c0_14 = arith.constant 0 : index
    %c0_15 = arith.constant 0 : index
    %c0_16 = arith.constant 0 : index
    %12 = vector.load %arg6[%c0_14, %c0_15, %c0_16] : memref<3x1x128xf32, #tpu.memory_space<vmem>>, vector<1x1x128xf32>
    %13 = vector.shape_cast %12 : vector<1x1x128xf32> to vector<1x128xf32>
    %14 = vector.broadcast %13 : vector<1x128xf32> to vector<16x128xf32>
    %15 = arith.addf %11, %14 : vector<16x128xf32>
    %c1 = arith.constant 1 : index
    %c0_17 = arith.constant 0 : index
    %c0_18 = arith.constant 0 : index
    %16 = vector.load %arg5[%c1, %c0_17, %c0_18] : memref<3x128x128xf32, #tpu.memory_space<vmem>>, vector<1x128x128xf32>
    %17 = vector.shape_cast %16 : vector<1x128x128xf32> to vector<128x128xf32>
    %cst_19 = arith.constant dense<0.000000e+00> : vector<16x128xf32>
    %18 = tpu.matmul %8, %17, %cst_19 {dimension_numbers = #tpu.dot_dimension_numbers<[1], [0], [0], [1], [0, 0, 1, 1], [], []>} : vector<16x128xf32>, vector<128x128xf32>, vector<16x128xf32> -> vector<16x128xf32>
    %c1_20 = arith.constant 1 : index
    %c0_21 = arith.constant 0 : index
    %c0_22 = arith.constant 0 : index
    %19 = vector.load %arg6[%c1_20, %c0_21, %c0_22] : memref<3x1x128xf32, #tpu.memory_space<vmem>>, vector<1x1x128xf32>
    %20 = vector.shape_cast %19 : vector<1x1x128xf32> to vector<1x128xf32>
    %21 = vector.broadcast %20 : vector<1x128xf32> to vector<16x128xf32>
    %22 = arith.addf %18, %21 : vector<16x128xf32>
    %c2 = arith.constant 2 : index
    %c0_23 = arith.constant 0 : index
    %c0_24 = arith.constant 0 : index
    %23 = vector.load %arg5[%c2, %c0_23, %c0_24] : memref<3x128x128xf32, #tpu.memory_space<vmem>>, vector<1x128x128xf32>
    %24 = vector.shape_cast %23 : vector<1x128x128xf32> to vector<128x128xf32>
    %cst_25 = arith.constant dense<0.000000e+00> : vector<16x128xf32>
    %25 = tpu.matmul %1, %24, %cst_25 {dimension_numbers = #tpu.dot_dimension_numbers<[1], [0], [0], [1], [0, 0, 1, 1], [], []>} : vector<16x128xf32>, vector<128x128xf32>, vector<16x128xf32> -> vector<16x128xf32>
    %c2_26 = arith.constant 2 : index
    %c0_27 = arith.constant 0 : index
    %c0_28 = arith.constant 0 : index
    %26 = vector.load %arg6[%c2_26, %c0_27, %c0_28] : memref<3x1x128xf32, #tpu.memory_space<vmem>>, vector<1x1x128xf32>
    %27 = vector.shape_cast %26 : vector<1x1x128xf32> to vector<1x128xf32>
    %28 = vector.broadcast %27 : vector<1x128xf32> to vector<16x128xf32>
    %29 = arith.addf %25, %28 : vector<16x128xf32>
    %cst_29 = arith.constant 0.176776692 : f32
    %30 = vector.broadcast %cst_29 : f32 to vector<16x128xf32>
    %31 = arith.mulf %15, %30 : vector<16x128xf32>
    %32 = vector.extract_strided_slice %31 {offsets = [0, 0], sizes = [16, 32], strides = [1, 1]} : vector<16x128xf32> to vector<16x32xf32>
    %33 = vector.extract_strided_slice %22 {offsets = [0, 0], sizes = [16, 32], strides = [1, 1]} : vector<16x128xf32> to vector<16x32xf32>
    %34 = vector.extract_strided_slice %29 {offsets = [0, 0], sizes = [16, 32], strides = [1, 1]} : vector<16x128xf32> to vector<16x32xf32>
    %cst_30 = arith.constant dense<0.000000e+00> : vector<16x16xf32>
    %35 = tpu.matmul %32, %33, %cst_30 {dimension_numbers = #tpu.dot_dimension_numbers<[1], [1], [0], [0], [0, 0, 1, 0], [], []>} : vector<16x32xf32>, vector<16x32xf32>, vector<16x16xf32> -> vector<16x16xf32>
    %cst_31 = arith.constant dense<0xFF800000> : vector<16xf32>
    %36 = vector.multi_reduction <maximumf>, %35, %cst_31 [1] : vector<16x16xf32> to vector<16xf32>
    %37 = vector.shape_cast %36 : vector<16xf32> to vector<16x1xf32>
    %38 = vector.broadcast %37 : vector<16x1xf32> to vector<16x16xf32>
    %39 = arith.subf %35, %38 : vector<16x16xf32>
    %40 = math.exp %39 : vector<16x16xf32>
    %cst_32 = arith.constant dense<0.000000e+00> : vector<16xf32>
    %41 = vector.multi_reduction <add>, %40, %cst_32 [1] : vector<16x16xf32> to vector<16xf32>
    %42 = vector.shape_cast %41 : vector<16xf32> to vector<16x1xf32>
    %43 = tpu.reciprocal %42 {approx = true} : vector<16x1xf32> -> vector<16x1xf32>
    %44 = vector.broadcast %43 : vector<16x1xf32> to vector<16x16xf32>
    %45 = arith.mulf %40, %44 : vector<16x16xf32>
    %cst_33 = arith.constant dense<0.000000e+00> : vector<16x32xf32>
    %46 = tpu.matmul %45, %34, %cst_33 {dimension_numbers = #tpu.dot_dimension_numbers<[1], [0], [0], [1], [0, 0, 1, 1], [], []>} : vector<16x16xf32>, vector<16x32xf32>, vector<16x32xf32> -> vector<16x32xf32>
    %c0_34 = arith.constant 0 : index
    %c0_35 = arith.constant 0 : index
    %47 = vector.load %arg7[%c0_34, %c0_35] : memref<128x128xf32, #tpu.memory_space<vmem>>, vector<32x128xf32>
    %cst_36 = arith.constant dense<0.000000e+00> : vector<16x128xf32>
    %48 = tpu.matmul %46, %47, %cst_36 {dimension_numbers = #tpu.dot_dimension_numbers<[1], [0], [0], [1], [0, 0, 1, 1], [], []>} : vector<16x32xf32>, vector<32x128xf32>, vector<16x128xf32> -> vector<16x128xf32>
    %49 = vector.extract_strided_slice %31 {offsets = [0, 32], sizes = [16, 32], strides = [1, 1]} : vector<16x128xf32> to vector<16x32xf32>
    %50 = vector.extract_strided_slice %22 {offsets = [0, 32], sizes = [16, 32], strides = [1, 1]} : vector<16x128xf32> to vector<16x32xf32>
    %51 = vector.extract_strided_slice %29 {offsets = [0, 32], sizes = [16, 32], strides = [1, 1]} : vector<16x128xf32> to vector<16x32xf32>
    %cst_37 = arith.constant dense<0.000000e+00> : vector<16x16xf32>
    %52 = tpu.matmul %49, %50, %cst_37 {dimension_numbers = #tpu.dot_dimension_numbers<[1], [1], [0], [0], [0, 0, 1, 0], [], []>} : vector<16x32xf32>, vector<16x32xf32>, vector<16x16xf32> -> vector<16x16xf32>
    %cst_38 = arith.constant dense<0xFF800000> : vector<16xf32>
    %53 = vector.multi_reduction <maximumf>, %52, %cst_38 [1] : vector<16x16xf32> to vector<16xf32>
    %54 = vector.shape_cast %53 : vector<16xf32> to vector<16x1xf32>
    %55 = vector.broadcast %54 : vector<16x1xf32> to vector<16x16xf32>
    %56 = arith.subf %52, %55 : vector<16x16xf32>
    %57 = math.exp %56 : vector<16x16xf32>
    %cst_39 = arith.constant dense<0.000000e+00> : vector<16xf32>
    %58 = vector.multi_reduction <add>, %57, %cst_39 [1] : vector<16x16xf32> to vector<16xf32>
    %59 = vector.shape_cast %58 : vector<16xf32> to vector<16x1xf32>
    %60 = tpu.reciprocal %59 {approx = true} : vector<16x1xf32> -> vector<16x1xf32>
    %61 = vector.broadcast %60 : vector<16x1xf32> to vector<16x16xf32>
    %62 = arith.mulf %57, %61 : vector<16x16xf32>
    %cst_40 = arith.constant dense<0.000000e+00> : vector<16x32xf32>
    %63 = tpu.matmul %62, %51, %cst_40 {dimension_numbers = #tpu.dot_dimension_numbers<[1], [0], [0], [1], [0, 0, 1, 1], [], []>} : vector<16x16xf32>, vector<16x32xf32>, vector<16x32xf32> -> vector<16x32xf32>
    %c32 = arith.constant 32 : index
    %c0_41 = arith.constant 0 : index
    %64 = vector.load %arg7[%c32, %c0_41] : memref<128x128xf32, #tpu.memory_space<vmem>>, vector<32x128xf32>
    %cst_42 = arith.constant dense<0.000000e+00> : vector<16x128xf32>
    %65 = tpu.matmul %63, %64, %cst_42 {dimension_numbers = #tpu.dot_dimension_numbers<[1], [0], [0], [1], [0, 0, 1, 1], [], []>} : vector<16x32xf32>, vector<32x128xf32>, vector<16x128xf32> -> vector<16x128xf32>
    %66 = arith.addf %48, %65 : vector<16x128xf32>
    %67 = vector.extract_strided_slice %31 {offsets = [0, 64], sizes = [16, 32], strides = [1, 1]} : vector<16x128xf32> to vector<16x32xf32>
    %68 = vector.extract_strided_slice %22 {offsets = [0, 64], sizes = [16, 32], strides = [1, 1]} : vector<16x128xf32> to vector<16x32xf32>
    %69 = vector.extract_strided_slice %29 {offsets = [0, 64], sizes = [16, 32], strides = [1, 1]} : vector<16x128xf32> to vector<16x32xf32>
    %cst_43 = arith.constant dense<0.000000e+00> : vector<16x16xf32>
    %70 = tpu.matmul %67, %68, %cst_43 {dimension_numbers = #tpu.dot_dimension_numbers<[1], [1], [0], [0], [0, 0, 1, 0], [], []>} : vector<16x32xf32>, vector<16x32xf32>, vector<16x16xf32> -> vector<16x16xf32>
    %cst_44 = arith.constant dense<0xFF800000> : vector<16xf32>
    %71 = vector.multi_reduction <maximumf>, %70, %cst_44 [1] : vector<16x16xf32> to vector<16xf32>
    %72 = vector.shape_cast %71 : vector<16xf32> to vector<16x1xf32>
    %73 = vector.broadcast %72 : vector<16x1xf32> to vector<16x16xf32>
    %74 = arith.subf %70, %73 : vector<16x16xf32>
    %75 = math.exp %74 : vector<16x16xf32>
    %cst_45 = arith.constant dense<0.000000e+00> : vector<16xf32>
    %76 = vector.multi_reduction <add>, %75, %cst_45 [1] : vector<16x16xf32> to vector<16xf32>
    %77 = vector.shape_cast %76 : vector<16xf32> to vector<16x1xf32>
    %78 = tpu.reciprocal %77 {approx = true} : vector<16x1xf32> -> vector<16x1xf32>
    %79 = vector.broadcast %78 : vector<16x1xf32> to vector<16x16xf32>
    %80 = arith.mulf %75, %79 : vector<16x16xf32>
    %cst_46 = arith.constant dense<0.000000e+00> : vector<16x32xf32>
    %81 = tpu.matmul %80, %69, %cst_46 {dimension_numbers = #tpu.dot_dimension_numbers<[1], [0], [0], [1], [0, 0, 1, 1], [], []>} : vector<16x16xf32>, vector<16x32xf32>, vector<16x32xf32> -> vector<16x32xf32>
    %c64 = arith.constant 64 : index
    %c0_47 = arith.constant 0 : index
    %82 = vector.load %arg7[%c64, %c0_47] : memref<128x128xf32, #tpu.memory_space<vmem>>, vector<32x128xf32>
    %cst_48 = arith.constant dense<0.000000e+00> : vector<16x128xf32>
    %83 = tpu.matmul %81, %82, %cst_48 {dimension_numbers = #tpu.dot_dimension_numbers<[1], [0], [0], [1], [0, 0, 1, 1], [], []>} : vector<16x32xf32>, vector<32x128xf32>, vector<16x128xf32> -> vector<16x128xf32>
    %84 = arith.addf %66, %83 : vector<16x128xf32>
    %85 = vector.extract_strided_slice %31 {offsets = [0, 96], sizes = [16, 32], strides = [1, 1]} : vector<16x128xf32> to vector<16x32xf32>
    %86 = vector.extract_strided_slice %22 {offsets = [0, 96], sizes = [16, 32], strides = [1, 1]} : vector<16x128xf32> to vector<16x32xf32>
    %87 = vector.extract_strided_slice %29 {offsets = [0, 96], sizes = [16, 32], strides = [1, 1]} : vector<16x128xf32> to vector<16x32xf32>
    %cst_49 = arith.constant dense<0.000000e+00> : vector<16x16xf32>
    %88 = tpu.matmul %85, %86, %cst_49 {dimension_numbers = #tpu.dot_dimension_numbers<[1], [1], [0], [0], [0, 0, 1, 0], [], []>} : vector<16x32xf32>, vector<16x32xf32>, vector<16x16xf32> -> vector<16x16xf32>
    %cst_50 = arith.constant dense<0xFF800000> : vector<16xf32>
    %89 = vector.multi_reduction <maximumf>, %88, %cst_50 [1] : vector<16x16xf32> to vector<16xf32>
    %90 = vector.shape_cast %89 : vector<16xf32> to vector<16x1xf32>
    %91 = vector.broadcast %90 : vector<16x1xf32> to vector<16x16xf32>
    %92 = arith.subf %88, %91 : vector<16x16xf32>
    %93 = math.exp %92 : vector<16x16xf32>
    %cst_51 = arith.constant dense<0.000000e+00> : vector<16xf32>
    %94 = vector.multi_reduction <add>, %93, %cst_51 [1] : vector<16x16xf32> to vector<16xf32>
    %95 = vector.shape_cast %94 : vector<16xf32> to vector<16x1xf32>
    %96 = tpu.reciprocal %95 {approx = true} : vector<16x1xf32> -> vector<16x1xf32>
    %97 = vector.broadcast %96 : vector<16x1xf32> to vector<16x16xf32>
    %98 = arith.mulf %93, %97 : vector<16x16xf32>
    %cst_52 = arith.constant dense<0.000000e+00> : vector<16x32xf32>
    %99 = tpu.matmul %98, %87, %cst_52 {dimension_numbers = #tpu.dot_dimension_numbers<[1], [0], [0], [1], [0, 0, 1, 1], [], []>} : vector<16x16xf32>, vector<16x32xf32>, vector<16x32xf32> -> vector<16x32xf32>
    %c96 = arith.constant 96 : index
    %c0_53 = arith.constant 0 : index
    %100 = vector.load %arg7[%c96, %c0_53] : memref<128x128xf32, #tpu.memory_space<vmem>>, vector<32x128xf32>
    %cst_54 = arith.constant dense<0.000000e+00> : vector<16x128xf32>
    %101 = tpu.matmul %99, %100, %cst_54 {dimension_numbers = #tpu.dot_dimension_numbers<[1], [0], [0], [1], [0, 0, 1, 1], [], []>} : vector<16x32xf32>, vector<32x128xf32>, vector<16x128xf32> -> vector<16x128xf32>
    %102 = arith.addf %84, %101 : vector<16x128xf32>
    %c0_55 = arith.constant 0 : index
    %c0_56 = arith.constant 0 : index
    %103 = vector.load %arg8[%c0_55, %c0_56] : memref<1x128xf32, #tpu.memory_space<vmem>>, vector<1x128xf32>
    %104 = vector.broadcast %103 : vector<1x128xf32> to vector<16x128xf32>
    %105 = arith.addf %102, %104 : vector<16x128xf32>
    %106 = arith.addf %1, %105 : vector<16x128xf32>
    %c0_57 = arith.constant 0 : index
    %c0_58 = arith.constant 0 : index
    %107 = vector.load %arg9[%c0_57, %c0_58] : memref<1x128xf32, #tpu.memory_space<vmem>>, vector<1x128xf32>
    %c0_59 = arith.constant 0 : index
    %c0_60 = arith.constant 0 : index
    %108 = vector.load %arg10[%c0_59, %c0_60] : memref<1x128xf32, #tpu.memory_space<vmem>>, vector<1x128xf32>
    %cst_61 = arith.constant dense<0.000000e+00> : vector<16xf32>
    %109 = vector.multi_reduction <add>, %106, %cst_61 [1] : vector<16x128xf32> to vector<16xf32>
    %110 = vector.shape_cast %109 : vector<16xf32> to vector<16x1xf32>
    %cst_62 = arith.constant 1.280000e+02 : f32
    %111 = vector.broadcast %cst_62 : f32 to vector<16x1xf32>
    %112 = arith.divf %110, %111 : vector<16x1xf32>
    %113 = vector.broadcast %112 : vector<16x1xf32> to vector<16x128xf32>
    %114 = arith.subf %106, %113 : vector<16x128xf32>
    %115 = arith.mulf %114, %114 : vector<16x128xf32>
    %cst_63 = arith.constant dense<0.000000e+00> : vector<16xf32>
    %116 = vector.multi_reduction <add>, %115, %cst_63 [1] : vector<16x128xf32> to vector<16xf32>
    %117 = vector.shape_cast %116 : vector<16xf32> to vector<16x1xf32>
    %cst_64 = arith.constant 1.280000e+02 : f32
    %118 = vector.broadcast %cst_64 : f32 to vector<16x1xf32>
    %119 = arith.divf %117, %118 : vector<16x1xf32>
    %120 = vector.broadcast %112 : vector<16x1xf32> to vector<16x128xf32>
    %121 = arith.subf %106, %120 : vector<16x128xf32>
    %cst_65 = arith.constant 9.99999974E-6 : f32
    %122 = vector.broadcast %cst_65 : f32 to vector<16x1xf32>
    %123 = arith.addf %119, %122 : vector<16x1xf32>
    %124 = math.rsqrt %123 : vector<16x1xf32>
    %125 = vector.broadcast %124 : vector<16x1xf32> to vector<16x128xf32>
    %126 = arith.mulf %121, %125 : vector<16x128xf32>
    %127 = vector.broadcast %107 : vector<1x128xf32> to vector<16x128xf32>
    %128 = arith.mulf %126, %127 : vector<16x128xf32>
    %129 = vector.broadcast %108 : vector<1x128xf32> to vector<16x128xf32>
    %130 = arith.addf %128, %129 : vector<16x128xf32>
    %131 = arith.addf %130, %3 : vector<16x128xf32>
    %132 = arith.addf %5, %7 : vector<32x128xf32>
    %c0_66 = arith.constant 0 : index
    %c0_67 = arith.constant 0 : index
    %c0_68 = arith.constant 0 : index
    %133 = vector.load %arg11[%c0_66, %c0_67, %c0_68] : memref<3x128x128xf32, #tpu.memory_space<vmem>>, vector<1x128x128xf32>
    %134 = vector.shape_cast %133 : vector<1x128x128xf32> to vector<128x128xf32>
    %cst_69 = arith.constant dense<0.000000e+00> : vector<16x128xf32>
    %135 = tpu.matmul %131, %134, %cst_69 {dimension_numbers = #tpu.dot_dimension_numbers<[1], [0], [0], [1], [0, 0, 1, 1], [], []>} : vector<16x128xf32>, vector<128x128xf32>, vector<16x128xf32> -> vector<16x128xf32>
    %c0_70 = arith.constant 0 : index
    %c0_71 = arith.constant 0 : index
    %c0_72 = arith.constant 0 : index
    %136 = vector.load %arg12[%c0_70, %c0_71, %c0_72] : memref<3x1x128xf32, #tpu.memory_space<vmem>>, vector<1x1x128xf32>
    %137 = vector.shape_cast %136 : vector<1x1x128xf32> to vector<1x128xf32>
    %138 = vector.broadcast %137 : vector<1x128xf32> to vector<16x128xf32>
    %139 = arith.addf %135, %138 : vector<16x128xf32>
    %c1_73 = arith.constant 1 : index
    %c0_74 = arith.constant 0 : index
    %c0_75 = arith.constant 0 : index
    %140 = vector.load %arg11[%c1_73, %c0_74, %c0_75] : memref<3x128x128xf32, #tpu.memory_space<vmem>>, vector<1x128x128xf32>
    %141 = vector.shape_cast %140 : vector<1x128x128xf32> to vector<128x128xf32>
    %cst_76 = arith.constant dense<0.000000e+00> : vector<32x128xf32>
    %142 = tpu.matmul %132, %141, %cst_76 {dimension_numbers = #tpu.dot_dimension_numbers<[1], [0], [0], [1], [0, 0, 1, 1], [], []>} : vector<32x128xf32>, vector<128x128xf32>, vector<32x128xf32> -> vector<32x128xf32>
    %c1_77 = arith.constant 1 : index
    %c0_78 = arith.constant 0 : index
    %c0_79 = arith.constant 0 : index
    %143 = vector.load %arg12[%c1_77, %c0_78, %c0_79] : memref<3x1x128xf32, #tpu.memory_space<vmem>>, vector<1x1x128xf32>
    %144 = vector.shape_cast %143 : vector<1x1x128xf32> to vector<1x128xf32>
    %145 = vector.broadcast %144 : vector<1x128xf32> to vector<32x128xf32>
    %146 = arith.addf %142, %145 : vector<32x128xf32>
    %c2_80 = arith.constant 2 : index
    %c0_81 = arith.constant 0 : index
    %c0_82 = arith.constant 0 : index
    %147 = vector.load %arg11[%c2_80, %c0_81, %c0_82] : memref<3x128x128xf32, #tpu.memory_space<vmem>>, vector<1x128x128xf32>
    %148 = vector.shape_cast %147 : vector<1x128x128xf32> to vector<128x128xf32>
    %cst_83 = arith.constant dense<0.000000e+00> : vector<32x128xf32>
    %149 = tpu.matmul %5, %148, %cst_83 {dimension_numbers = #tpu.dot_dimension_numbers<[1], [0], [0], [1], [0, 0, 1, 1], [], []>} : vector<32x128xf32>, vector<128x128xf32>, vector<32x128xf32> -> vector<32x128xf32>
    %c2_84 = arith.constant 2 : index
    %c0_85 = arith.constant 0 : index
    %c0_86 = arith.constant 0 : index
    %150 = vector.load %arg12[%c2_84, %c0_85, %c0_86] : memref<3x1x128xf32, #tpu.memory_space<vmem>>, vector<1x1x128xf32>
    %151 = vector.shape_cast %150 : vector<1x1x128xf32> to vector<1x128xf32>
    %152 = vector.broadcast %151 : vector<1x128xf32> to vector<32x128xf32>
    %153 = arith.addf %149, %152 : vector<32x128xf32>
    %cst_87 = arith.constant 0.176776692 : f32
    %154 = vector.broadcast %cst_87 : f32 to vector<16x128xf32>
    %155 = arith.mulf %139, %154 : vector<16x128xf32>
    %156 = vector.extract_strided_slice %155 {offsets = [0, 0], sizes = [16, 32], strides = [1, 1]} : vector<16x128xf32> to vector<16x32xf32>
    %157 = vector.extract_strided_slice %146 {offsets = [0, 0], sizes = [32, 32], strides = [1, 1]} : vector<32x128xf32> to vector<32x32xf32>
    %158 = vector.extract_strided_slice %153 {offsets = [0, 0], sizes = [32, 32], strides = [1, 1]} : vector<32x128xf32> to vector<32x32xf32>
    %cst_88 = arith.constant dense<0.000000e+00> : vector<16x32xf32>
    %159 = tpu.matmul %156, %157, %cst_88 {dimension_numbers = #tpu.dot_dimension_numbers<[1], [1], [0], [0], [0, 0, 1, 0], [], []>} : vector<16x32xf32>, vector<32x32xf32>, vector<16x32xf32> -> vector<16x32xf32>
    %cst_89 = arith.constant dense<0xFF800000> : vector<16xf32>
    %160 = vector.multi_reduction <maximumf>, %159, %cst_89 [1] : vector<16x32xf32> to vector<16xf32>
    %161 = vector.shape_cast %160 : vector<16xf32> to vector<16x1xf32>
    %162 = vector.broadcast %161 : vector<16x1xf32> to vector<16x32xf32>
    %163 = arith.subf %159, %162 : vector<16x32xf32>
    %164 = math.exp %163 : vector<16x32xf32>
    %cst_90 = arith.constant dense<0.000000e+00> : vector<16xf32>
    %165 = vector.multi_reduction <add>, %164, %cst_90 [1] : vector<16x32xf32> to vector<16xf32>
    %166 = vector.shape_cast %165 : vector<16xf32> to vector<16x1xf32>
    %167 = tpu.reciprocal %166 {approx = true} : vector<16x1xf32> -> vector<16x1xf32>
    %168 = vector.broadcast %167 : vector<16x1xf32> to vector<16x32xf32>
    %169 = arith.mulf %164, %168 : vector<16x32xf32>
    %cst_91 = arith.constant dense<0.000000e+00> : vector<16x32xf32>
    %170 = tpu.matmul %169, %158, %cst_91 {dimension_numbers = #tpu.dot_dimension_numbers<[1], [0], [0], [1], [0, 0, 1, 1], [], []>} : vector<16x32xf32>, vector<32x32xf32>, vector<16x32xf32> -> vector<16x32xf32>
    %c0_92 = arith.constant 0 : index
    %c0_93 = arith.constant 0 : index
    %171 = vector.load %arg13[%c0_92, %c0_93] : memref<128x128xf32, #tpu.memory_space<vmem>>, vector<32x128xf32>
    %cst_94 = arith.constant dense<0.000000e+00> : vector<16x128xf32>
    %172 = tpu.matmul %170, %171, %cst_94 {dimension_numbers = #tpu.dot_dimension_numbers<[1], [0], [0], [1], [0, 0, 1, 1], [], []>} : vector<16x32xf32>, vector<32x128xf32>, vector<16x128xf32> -> vector<16x128xf32>
    %173 = vector.extract_strided_slice %155 {offsets = [0, 32], sizes = [16, 32], strides = [1, 1]} : vector<16x128xf32> to vector<16x32xf32>
    %174 = vector.extract_strided_slice %146 {offsets = [0, 32], sizes = [32, 32], strides = [1, 1]} : vector<32x128xf32> to vector<32x32xf32>
    %175 = vector.extract_strided_slice %153 {offsets = [0, 32], sizes = [32, 32], strides = [1, 1]} : vector<32x128xf32> to vector<32x32xf32>
    %cst_95 = arith.constant dense<0.000000e+00> : vector<16x32xf32>
    %176 = tpu.matmul %173, %174, %cst_95 {dimension_numbers = #tpu.dot_dimension_numbers<[1], [1], [0], [0], [0, 0, 1, 0], [], []>} : vector<16x32xf32>, vector<32x32xf32>, vector<16x32xf32> -> vector<16x32xf32>
    %cst_96 = arith.constant dense<0xFF800000> : vector<16xf32>
    %177 = vector.multi_reduction <maximumf>, %176, %cst_96 [1] : vector<16x32xf32> to vector<16xf32>
    %178 = vector.shape_cast %177 : vector<16xf32> to vector<16x1xf32>
    %179 = vector.broadcast %178 : vector<16x1xf32> to vector<16x32xf32>
    %180 = arith.subf %176, %179 : vector<16x32xf32>
    %181 = math.exp %180 : vector<16x32xf32>
    %cst_97 = arith.constant dense<0.000000e+00> : vector<16xf32>
    %182 = vector.multi_reduction <add>, %181, %cst_97 [1] : vector<16x32xf32> to vector<16xf32>
    %183 = vector.shape_cast %182 : vector<16xf32> to vector<16x1xf32>
    %184 = tpu.reciprocal %183 {approx = true} : vector<16x1xf32> -> vector<16x1xf32>
    %185 = vector.broadcast %184 : vector<16x1xf32> to vector<16x32xf32>
    %186 = arith.mulf %181, %185 : vector<16x32xf32>
    %cst_98 = arith.constant dense<0.000000e+00> : vector<16x32xf32>
    %187 = tpu.matmul %186, %175, %cst_98 {dimension_numbers = #tpu.dot_dimension_numbers<[1], [0], [0], [1], [0, 0, 1, 1], [], []>} : vector<16x32xf32>, vector<32x32xf32>, vector<16x32xf32> -> vector<16x32xf32>
    %c32_99 = arith.constant 32 : index
    %c0_100 = arith.constant 0 : index
    %188 = vector.load %arg13[%c32_99, %c0_100] : memref<128x128xf32, #tpu.memory_space<vmem>>, vector<32x128xf32>
    %cst_101 = arith.constant dense<0.000000e+00> : vector<16x128xf32>
    %189 = tpu.matmul %187, %188, %cst_101 {dimension_numbers = #tpu.dot_dimension_numbers<[1], [0], [0], [1], [0, 0, 1, 1], [], []>} : vector<16x32xf32>, vector<32x128xf32>, vector<16x128xf32> -> vector<16x128xf32>
    %190 = arith.addf %172, %189 : vector<16x128xf32>
    %191 = vector.extract_strided_slice %155 {offsets = [0, 64], sizes = [16, 32], strides = [1, 1]} : vector<16x128xf32> to vector<16x32xf32>
    %192 = vector.extract_strided_slice %146 {offsets = [0, 64], sizes = [32, 32], strides = [1, 1]} : vector<32x128xf32> to vector<32x32xf32>
    %193 = vector.extract_strided_slice %153 {offsets = [0, 64], sizes = [32, 32], strides = [1, 1]} : vector<32x128xf32> to vector<32x32xf32>
    %cst_102 = arith.constant dense<0.000000e+00> : vector<16x32xf32>
    %194 = tpu.matmul %191, %192, %cst_102 {dimension_numbers = #tpu.dot_dimension_numbers<[1], [1], [0], [0], [0, 0, 1, 0], [], []>} : vector<16x32xf32>, vector<32x32xf32>, vector<16x32xf32> -> vector<16x32xf32>
    %cst_103 = arith.constant dense<0xFF800000> : vector<16xf32>
    %195 = vector.multi_reduction <maximumf>, %194, %cst_103 [1] : vector<16x32xf32> to vector<16xf32>
    %196 = vector.shape_cast %195 : vector<16xf32> to vector<16x1xf32>
    %197 = vector.broadcast %196 : vector<16x1xf32> to vector<16x32xf32>
    %198 = arith.subf %194, %197 : vector<16x32xf32>
    %199 = math.exp %198 : vector<16x32xf32>
    %cst_104 = arith.constant dense<0.000000e+00> : vector<16xf32>
    %200 = vector.multi_reduction <add>, %199, %cst_104 [1] : vector<16x32xf32> to vector<16xf32>
    %201 = vector.shape_cast %200 : vector<16xf32> to vector<16x1xf32>
    %202 = tpu.reciprocal %201 {approx = true} : vector<16x1xf32> -> vector<16x1xf32>
    %203 = vector.broadcast %202 : vector<16x1xf32> to vector<16x32xf32>
    %204 = arith.mulf %199, %203 : vector<16x32xf32>
    %cst_105 = arith.constant dense<0.000000e+00> : vector<16x32xf32>
    %205 = tpu.matmul %204, %193, %cst_105 {dimension_numbers = #tpu.dot_dimension_numbers<[1], [0], [0], [1], [0, 0, 1, 1], [], []>} : vector<16x32xf32>, vector<32x32xf32>, vector<16x32xf32> -> vector<16x32xf32>
    %c64_106 = arith.constant 64 : index
    %c0_107 = arith.constant 0 : index
    %206 = vector.load %arg13[%c64_106, %c0_107] : memref<128x128xf32, #tpu.memory_space<vmem>>, vector<32x128xf32>
    %cst_108 = arith.constant dense<0.000000e+00> : vector<16x128xf32>
    %207 = tpu.matmul %205, %206, %cst_108 {dimension_numbers = #tpu.dot_dimension_numbers<[1], [0], [0], [1], [0, 0, 1, 1], [], []>} : vector<16x32xf32>, vector<32x128xf32>, vector<16x128xf32> -> vector<16x128xf32>
    %208 = arith.addf %190, %207 : vector<16x128xf32>
    %209 = vector.extract_strided_slice %155 {offsets = [0, 96], sizes = [16, 32], strides = [1, 1]} : vector<16x128xf32> to vector<16x32xf32>
    %210 = vector.extract_strided_slice %146 {offsets = [0, 96], sizes = [32, 32], strides = [1, 1]} : vector<32x128xf32> to vector<32x32xf32>
    %211 = vector.extract_strided_slice %153 {offsets = [0, 96], sizes = [32, 32], strides = [1, 1]} : vector<32x128xf32> to vector<32x32xf32>
    %cst_109 = arith.constant dense<0.000000e+00> : vector<16x32xf32>
    %212 = tpu.matmul %209, %210, %cst_109 {dimension_numbers = #tpu.dot_dimension_numbers<[1], [1], [0], [0], [0, 0, 1, 0], [], []>} : vector<16x32xf32>, vector<32x32xf32>, vector<16x32xf32> -> vector<16x32xf32>
    %cst_110 = arith.constant dense<0xFF800000> : vector<16xf32>
    %213 = vector.multi_reduction <maximumf>, %212, %cst_110 [1] : vector<16x32xf32> to vector<16xf32>
    %214 = vector.shape_cast %213 : vector<16xf32> to vector<16x1xf32>
    %215 = vector.broadcast %214 : vector<16x1xf32> to vector<16x32xf32>
    %216 = arith.subf %212, %215 : vector<16x32xf32>
    %217 = math.exp %216 : vector<16x32xf32>
    %cst_111 = arith.constant dense<0.000000e+00> : vector<16xf32>
    %218 = vector.multi_reduction <add>, %217, %cst_111 [1] : vector<16x32xf32> to vector<16xf32>
    %219 = vector.shape_cast %218 : vector<16xf32> to vector<16x1xf32>
    %220 = tpu.reciprocal %219 {approx = true} : vector<16x1xf32> -> vector<16x1xf32>
    %221 = vector.broadcast %220 : vector<16x1xf32> to vector<16x32xf32>
    %222 = arith.mulf %217, %221 : vector<16x32xf32>
    %cst_112 = arith.constant dense<0.000000e+00> : vector<16x32xf32>
    %223 = tpu.matmul %222, %211, %cst_112 {dimension_numbers = #tpu.dot_dimension_numbers<[1], [0], [0], [1], [0, 0, 1, 1], [], []>} : vector<16x32xf32>, vector<32x32xf32>, vector<16x32xf32> -> vector<16x32xf32>
    %c96_113 = arith.constant 96 : index
    %c0_114 = arith.constant 0 : index
    %224 = vector.load %arg13[%c96_113, %c0_114] : memref<128x128xf32, #tpu.memory_space<vmem>>, vector<32x128xf32>
    %cst_115 = arith.constant dense<0.000000e+00> : vector<16x128xf32>
    %225 = tpu.matmul %223, %224, %cst_115 {dimension_numbers = #tpu.dot_dimension_numbers<[1], [0], [0], [1], [0, 0, 1, 1], [], []>} : vector<16x32xf32>, vector<32x128xf32>, vector<16x128xf32> -> vector<16x128xf32>
    %226 = arith.addf %208, %225 : vector<16x128xf32>
    %c0_116 = arith.constant 0 : index
    %c0_117 = arith.constant 0 : index
    %227 = vector.load %arg14[%c0_116, %c0_117] : memref<1x128xf32, #tpu.memory_space<vmem>>, vector<1x128xf32>
    %228 = vector.broadcast %227 : vector<1x128xf32> to vector<16x128xf32>
    %229 = arith.addf %226, %228 : vector<16x128xf32>
    %230 = arith.addf %130, %229 : vector<16x128xf32>
    %c0_118 = arith.constant 0 : index
    %c0_119 = arith.constant 0 : index
    %231 = vector.load %arg15[%c0_118, %c0_119] : memref<1x128xf32, #tpu.memory_space<vmem>>, vector<1x128xf32>
    %c0_120 = arith.constant 0 : index
    %c0_121 = arith.constant 0 : index
    %232 = vector.load %arg16[%c0_120, %c0_121] : memref<1x128xf32, #tpu.memory_space<vmem>>, vector<1x128xf32>
    %cst_122 = arith.constant dense<0.000000e+00> : vector<16xf32>
    %233 = vector.multi_reduction <add>, %230, %cst_122 [1] : vector<16x128xf32> to vector<16xf32>
    %234 = vector.shape_cast %233 : vector<16xf32> to vector<16x1xf32>
    %cst_123 = arith.constant 1.280000e+02 : f32
    %235 = vector.broadcast %cst_123 : f32 to vector<16x1xf32>
    %236 = arith.divf %234, %235 : vector<16x1xf32>
    %237 = vector.broadcast %236 : vector<16x1xf32> to vector<16x128xf32>
    %238 = arith.subf %230, %237 : vector<16x128xf32>
    %239 = arith.mulf %238, %238 : vector<16x128xf32>
    %cst_124 = arith.constant dense<0.000000e+00> : vector<16xf32>
    %240 = vector.multi_reduction <add>, %239, %cst_124 [1] : vector<16x128xf32> to vector<16xf32>
    %241 = vector.shape_cast %240 : vector<16xf32> to vector<16x1xf32>
    %cst_125 = arith.constant 1.280000e+02 : f32
    %242 = vector.broadcast %cst_125 : f32 to vector<16x1xf32>
    %243 = arith.divf %241, %242 : vector<16x1xf32>
    %244 = vector.broadcast %236 : vector<16x1xf32> to vector<16x128xf32>
    %245 = arith.subf %230, %244 : vector<16x128xf32>
    %cst_126 = arith.constant 9.99999974E-6 : f32
    %246 = vector.broadcast %cst_126 : f32 to vector<16x1xf32>
    %247 = arith.addf %243, %246 : vector<16x1xf32>
    %248 = math.rsqrt %247 : vector<16x1xf32>
    %249 = vector.broadcast %248 : vector<16x1xf32> to vector<16x128xf32>
    %250 = arith.mulf %245, %249 : vector<16x128xf32>
    %251 = vector.broadcast %231 : vector<1x128xf32> to vector<16x128xf32>
    %252 = arith.mulf %250, %251 : vector<16x128xf32>
    %253 = vector.broadcast %232 : vector<1x128xf32> to vector<16x128xf32>
    %254 = arith.addf %252, %253 : vector<16x128xf32>
    %c0_127 = arith.constant 0 : index
    %c0_128 = arith.constant 0 : index
    %255 = vector.load %arg17[%c0_127, %c0_128] : memref<128x256xf32, #tpu.memory_space<vmem>>, vector<128x256xf32>
    %cst_129 = arith.constant dense<0.000000e+00> : vector<16x256xf32>
    %256 = tpu.matmul %254, %255, %cst_129 {dimension_numbers = #tpu.dot_dimension_numbers<[1], [0], [0], [1], [0, 0, 1, 1], [], []>} : vector<16x128xf32>, vector<128x256xf32>, vector<16x256xf32> -> vector<16x256xf32>
    %c0_130 = arith.constant 0 : index
    %c0_131 = arith.constant 0 : index
    %257 = vector.load %arg18[%c0_130, %c0_131] : memref<1x256xf32, #tpu.memory_space<vmem>>, vector<1x256xf32>
    %258 = vector.broadcast %257 : vector<1x256xf32> to vector<16x256xf32>
    %259 = arith.addf %256, %258 : vector<16x256xf32>
    %cst_132 = arith.constant 0.000000e+00 : f32
    %260 = vector.broadcast %cst_132 : f32 to vector<16x256xf32>
    %261 = arith.maximumf %259, %260 : vector<16x256xf32>
    %c0_133 = arith.constant 0 : index
    %c0_134 = arith.constant 0 : index
    %262 = vector.load %arg19[%c0_133, %c0_134] : memref<256x128xf32, #tpu.memory_space<vmem>>, vector<256x128xf32>
    %cst_135 = arith.constant dense<0.000000e+00> : vector<16x128xf32>
    %263 = tpu.matmul %261, %262, %cst_135 {dimension_numbers = #tpu.dot_dimension_numbers<[1], [0], [0], [1], [0, 0, 1, 1], [], []>} : vector<16x256xf32>, vector<256x128xf32>, vector<16x128xf32> -> vector<16x128xf32>
    %c0_136 = arith.constant 0 : index
    %c0_137 = arith.constant 0 : index
    %264 = vector.load %arg20[%c0_136, %c0_137] : memref<1x128xf32, #tpu.memory_space<vmem>>, vector<1x128xf32>
    %265 = vector.broadcast %264 : vector<1x128xf32> to vector<16x128xf32>
    %266 = arith.addf %263, %265 : vector<16x128xf32>
    %267 = arith.addf %254, %266 : vector<16x128xf32>
    %c0_138 = arith.constant 0 : index
    %c0_139 = arith.constant 0 : index
    %268 = vector.load %arg21[%c0_138, %c0_139] : memref<1x128xf32, #tpu.memory_space<vmem>>, vector<1x128xf32>
    %c0_140 = arith.constant 0 : index
    %c0_141 = arith.constant 0 : index
    %269 = vector.load %arg22[%c0_140, %c0_141] : memref<1x128xf32, #tpu.memory_space<vmem>>, vector<1x128xf32>
    %cst_142 = arith.constant dense<0.000000e+00> : vector<16xf32>
    %270 = vector.multi_reduction <add>, %267, %cst_142 [1] : vector<16x128xf32> to vector<16xf32>
    %271 = vector.shape_cast %270 : vector<16xf32> to vector<16x1xf32>
    %cst_143 = arith.constant 1.280000e+02 : f32
    %272 = vector.broadcast %cst_143 : f32 to vector<16x1xf32>
    %273 = arith.divf %271, %272 : vector<16x1xf32>
    %274 = vector.broadcast %273 : vector<16x1xf32> to vector<16x128xf32>
    %275 = arith.subf %267, %274 : vector<16x128xf32>
    %276 = arith.mulf %275, %275 : vector<16x128xf32>
    %cst_144 = arith.constant dense<0.000000e+00> : vector<16xf32>
    %277 = vector.multi_reduction <add>, %276, %cst_144 [1] : vector<16x128xf32> to vector<16xf32>
    %278 = vector.shape_cast %277 : vector<16xf32> to vector<16x1xf32>
    %cst_145 = arith.constant 1.280000e+02 : f32
    %279 = vector.broadcast %cst_145 : f32 to vector<16x1xf32>
    %280 = arith.divf %278, %279 : vector<16x1xf32>
    %281 = vector.broadcast %273 : vector<16x1xf32> to vector<16x128xf32>
    %282 = arith.subf %267, %281 : vector<16x128xf32>
    %cst_146 = arith.constant 9.99999974E-6 : f32
    %283 = vector.broadcast %cst_146 : f32 to vector<16x1xf32>
    %284 = arith.addf %280, %283 : vector<16x1xf32>
    %285 = math.rsqrt %284 : vector<16x1xf32>
    %286 = vector.broadcast %285 : vector<16x1xf32> to vector<16x128xf32>
    %287 = arith.mulf %282, %286 : vector<16x128xf32>
    %288 = vector.broadcast %268 : vector<1x128xf32> to vector<16x128xf32>
    %289 = arith.mulf %287, %288 : vector<16x128xf32>
    %290 = vector.broadcast %269 : vector<1x128xf32> to vector<16x128xf32>
    %291 = arith.addf %289, %290 : vector<16x128xf32>
    %c0_147 = arith.constant 0 : index
    %c0_148 = arith.constant 0 : index
    %c0_149 = arith.constant 0 : index
    %292 = vector.load %arg23[%c0_147, %c0_148, %c0_149] : memref<1x16x128xf32, #tpu.memory_space<vmem>>, vector<1x16x128xf32>
    %293 = vector.shape_cast %292 : vector<1x16x128xf32> to vector<16x128xf32>
    %294 = vector.shape_cast %291 : vector<16x128xf32> to vector<1x16x128xf32>
    tpu.vector_store %arg23[%c0_147, %c0_148, %c0_149], %294 {strides = array<i32>} : memref<1x16x128xf32, #tpu.memory_space<vmem>>, vector<1x16x128xf32>,
    return
  }
  func.func @transform_0(%arg0: i32) -> (i32, i32, i32) {
    %c0_i32 = arith.constant 0 : i32
    %c0_i32_0 = arith.constant 0 : i32
    %c0_i32_1 = arith.constant 0 : i32
    return %arg0, %c0_i32, %c0_i32_0 : i32, i32, i32
  }
  func.func @transform_1(%arg0: i32) -> (i32, i32, i32) {
    %c0_i32 = arith.constant 0 : i32
    %c0_i32_0 = arith.constant 0 : i32
    %c0_i32_1 = arith.constant 0 : i32
    return %arg0, %c0_i32, %c0_i32_0 : i32, i32, i32
  }
  func.func @transform_2(%arg0: i32) -> (i32, i32, i32) {
    %c0_i32 = arith.constant 0 : i32
    %c0_i32_0 = arith.constant 0 : i32
    %c0_i32_1 = arith.constant 0 : i32
    return %arg0, %c0_i32, %c0_i32_0 : i32, i32, i32
  }
  func.func @transform_3(%arg0: i32) -> (i32, i32, i32) {
    %c0_i32 = arith.constant 0 : i32
    %c0_i32_0 = arith.constant 0 : i32
    %c0_i32_1 = arith.constant 0 : i32
    return %arg0, %c0_i32, %c0_i32_0 : i32, i32, i32
  }
  func.func @transform_4(%arg0: i32) -> (i32, i32, i32) {
    %c0_i32 = arith.constant 0 : i32
    %c0_i32_0 = arith.constant 0 : i32
    %c0_i32_1 = arith.constant 0 : i32
    %c0_i32_2 = arith.constant 0 : i32
    return %c0_i32, %c0_i32_0, %c0_i32_1 : i32, i32, i32
  }
  func.func @transform_5(%arg0: i32) -> (i32, i32, i32) {
    %c0_i32 = arith.constant 0 : i32
    %c0_i32_0 = arith.constant 0 : i32
    %c0_i32_1 = arith.constant 0 : i32
    %c0_i32_2 = arith.constant 0 : i32
    return %c0_i32, %c0_i32_0, %c0_i32_1 : i32, i32, i32
  }
  func.func @transform_6(%arg0: i32) -> (i32, i32) {
    %c0_i32 = arith.constant 0 : i32
    %c0_i32_0 = arith.constant 0 : i32
    %c0_i32_1 = arith.constant 0 : i32
    return %c0_i32, %c0_i32_0 : i32, i32
  }
  func.func @transform_7(%arg0: i32) -> (i32, i32) {
    %c0_i32 = arith.constant 0 : i32
    %c0_i32_0 = arith.constant 0 : i32
    %c0_i32_1 = arith.constant 0 : i32
    return %c0_i32, %c0_i32_0 : i32, i32
  }
  func.func @transform_8(%arg0: i32) -> (i32, i32) {
    %c0_i32 = arith.constant 0 : i32
    %c0_i32_0 = arith.constant 0 : i32
    %c0_i32_1 = arith.constant 0 : i32
    return %c0_i32, %c0_i32_0 : i32, i32
  }
  func.func @transform_9(%arg0: i32) -> (i32, i32) {
    %c0_i32 = arith.constant 0 : i32
    %c0_i32_0 = arith.constant 0 : i32
    %c0_i32_1 = arith.constant 0 : i32
    return %c0_i32, %c0_i32_0 : i32, i32
  }
  func.func @transform_10(%arg0: i32) -> (i32, i32, i32) {
    %c0_i32 = arith.constant 0 : i32
    %c0_i32_0 = arith.constant 0 : i32
    %c0_i32_1 = arith.constant 0 : i32
    %c0_i32_2 = arith.constant 0 : i32
    return %c0_i32, %c0_i32_0, %c0_i32_1 : i32, i32, i32
  }
  func.func @transform_11(%arg0: i32) -> (i32, i32, i32) {
    %c0_i32 = arith.constant 0 : i32
    %c0_i32_0 = arith.constant 0 : i32
    %c0_i32_1 = arith.constant 0 : i32
    %c0_i32_2 = arith.constant 0 : i32
    return %c0_i32, %c0_i32_0, %c0_i32_1 : i32, i32, i32
  }
  func.func @transform_12(%arg0: i32) -> (i32, i32) {
    %c0_i32 = arith.constant 0 : i32
    %c0_i32_0 = arith.constant 0 : i32
    %c0_i32_1 = arith.constant 0 : i32
    return %c0_i32, %c0_i32_0 : i32, i32
  }
  func.func @transform_13(%arg0: i32) -> (i32, i32) {
    %c0_i32 = arith.constant 0 : i32
    %c0_i32_0 = arith.constant 0 : i32
    %c0_i32_1 = arith.constant 0 : i32
    return %c0_i32, %c0_i32_0 : i32, i32
  }
  func.func @transform_14(%arg0: i32) -> (i32, i32) {
    %c0_i32 = arith.constant 0 : i32
    %c0_i32_0 = arith.constant 0 : i32
    %c0_i32_1 = arith.constant 0 : i32
    return %c0_i32, %c0_i32_0 : i32, i32
  }
  func.func @transform_15(%arg0: i32) -> (i32, i32) {
    %c0_i32 = arith.constant 0 : i32
    %c0_i32_0 = arith.constant 0 : i32
    %c0_i32_1 = arith.constant 0 : i32
    return %c0_i32, %c0_i32_0 : i32, i32
  }
  func.func @transform_16(%arg0: i32) -> (i32, i32) {
    %c0_i32 = arith.constant 0 : i32
    %c0_i32_0 = arith.constant 0 : i32
    %c0_i32_1 = arith.constant 0 : i32
    return %c0_i32, %c0_i32_0 : i32, i32
  }
  func.func @transform_17(%arg0: i32) -> (i32, i32) {
    %c0_i32 = arith.constant 0 : i32
    %c0_i32_0 = arith.constant 0 : i32
    %c0_i32_1 = arith.constant 0 : i32
    return %c0_i32, %c0_i32_0 : i32, i32
  }
  func.func @transform_18(%arg0: i32) -> (i32, i32) {
    %c0_i32 = arith.constant 0 : i32
    %c0_i32_0 = arith.constant 0 : i32
    %c0_i32_1 = arith.constant 0 : i32
    return %c0_i32, %c0_i32_0 : i32, i32
  }
  func.func @transform_19(%arg0: i32) -> (i32, i32) {
    %c0_i32 = arith.constant 0 : i32
    %c0_i32_0 = arith.constant 0 : i32
    %c0_i32_1 = arith.constant 0 : i32
    return %c0_i32, %c0_i32_0 : i32, i32
  }
  func.func @transform_20(%arg0: i32) -> (i32, i32) {
    %c0_i32 = arith.constant 0 : i32
    %c0_i32_0 = arith.constant 0 : i32
    %c0_i32_1 = arith.constant 0 : i32
    return %c0_i32, %c0_i32_0 : i32, i32
  }
  func.func @transform_21(%arg0: i32) -> (i32, i32) {
    %c0_i32 = arith.constant 0 : i32
    %c0_i32_0 = arith.constant 0 : i32
    %c0_i32_1 = arith.constant 0 : i32
    return %c0_i32, %c0_i32_0 : i32, i32
  }
  func.func @transform_22(%arg0: i32) -> (i32, i32, i32) {
    %c0_i32 = arith.constant 0 : i32
    %c0_i32_0 = arith.constant 0 : i32
    %c0_i32_1 = arith.constant 0 : i32
    return %arg0, %c0_i32, %c0_i32_0 : i32, i32, i32
  }
}

</mosaic_0001>

<bundles_post_ra>
// kernel: transformer_decoder_layer_post.1
= control target key start
LH: loop header
LB: loop body
LE: loop exit
PB: predicated region body
PF: predicated region fallthrough
CT: control target
= control target key end

     0   :  { %s7021_s0 = inlined_call_operand.vmem [shape: f32[2,16,128], index: 0, kind: input, shape index: {}]   ;;  %s7022_s1 = inlined_call_operand.vmem [shape: f32[2,16,128], index: 1, kind: input, shape index: {}]   ;;  %s7023_s2 = inlined_call_operand.vmem [shape: f32[2,32,128], index: 2, kind: input, shape index: {}]   ;;  %s7024_s3 = inlined_call_operand.vmem [shape: f32[2,32,128], index: 3, kind: input, shape index: {}]   ;;  %s7025_s4 = inlined_call_operand.vmem [shape: f32[3,128,128], index: 4, kind: input, shape index: {}]   ;;  %s7026_s5 = inlined_call_operand.vmem [shape: f32[3,1,128], index: 5, kind: input, shape index: {}]   ;;  %s7027_s6 = inlined_call_operand.hbm [shape: f32[128,128], index: 6, kind: input, shape index: {}]   ;;  %s7028_s7 = inlined_call_operand.vmem [shape: f32[1,128], index: 7, kind: input, shape index: {}]   ;;  %s7029_s8 = inlined_call_operand.vmem [shape: f32[1,128], index: 8, kind: input, shape index: {}]   ;;  %s7030_s9 = inlined_call_operand.vmem [shape: f32[1,128], index: 9, kind: input, shape index: {}]   ;;  %s7031_s10 = inlined_call_operand.hbm [shape: f32[3,128,128], index: 10, kind: input, shape index: {}]   ;;  %s7032_s11 = inlined_call_operand.vmem [shape: f32[3,1,128], index: 11, kind: input, shape index: {}]   ;;  %s7033_s12 = inlined_call_operand.hbm [shape: f32[128,128], index: 12, kind: input, shape index: {}]   ;;  %s7034_s13 = inlined_call_operand.vmem [shape: f32[1,128], index: 13, kind: input, shape index: {}]   ;;  %s7035_s14 = inlined_call_operand.vmem [shape: f32[1,128], index: 14, kind: input, shape index: {}]   ;;  %s7036_s15 = inlined_call_operand.vmem [shape: f32[1,128], index: 15, kind: input, shape index: {}]   ;;  %s7037_s16 = inlined_call_operand.hbm [shape: f32[128,256], index: 16, kind: input, shape index: {}]   ;;  %s7038_s17 = inlined_call_operand.vmem [shape: f32[1,256], index: 17, kind: input, shape index: {}]   ;;  %s7039_s18 = inlined_call_operand.hbm [shape: f32[256,128], index: 18, kind: input, shape index: {}]   ;;  %s7040_s19 = inlined_call_operand.vmem [shape: f32[1,128], index: 19, kind: input, shape index: {}]   ;;  %s7041_s20 = inlined_call_operand.hbm [shape: f32[1,128], index: 20, kind: input, shape index: {}]   ;;  %s7042_s21 = inlined_call_operand.hbm [shape: f32[1,128], index: 21, kind: input, shape index: {}]   ;;  %s7043_s22 = inlined_call_operand.vmem [shape: f32[2,16,128], index: 22, kind: output, shape index: {}]  }
   0x1   :  { %7054 = sst [smem:[#allocation18_spill]] %s7021_s0 }
   0x2   :  { %7055 = sst [smem:[#allocation19_spill]] %s7022_s1 }
   0x3   :  { %7056 = sst [smem:[#allocation20_spill]] %s7023_s2 }
   0x4   :  { %7057 = sst [smem:[#allocation21_spill]] %s7024_s3 }
   0x5   :  { %7058 = sst [smem:[#allocation22_spill]] %s7025_s4 }
   0x6   :  { %7059 = sst [smem:[#allocation23_spill]] %s7026_s5 }
   0x7   :  { %7060 = sst [smem:[#allocation24_spill]] %s7027_s6 }
   0x8   :  { %7061 = sst [smem:[#allocation25_spill]] %s7031_s10 }
   0x9   :  { %7062 = sst [smem:[#allocation26_spill]] %s7037_s16 }
   0xa   :  { %7063 = sst [smem:[#allocation27_spill]] %s7038_s17 }
   0xb   :  { %7064 = sst [smem:[#allocation28_spill]] %s7040_s19 }
   0xc   :  { %7065 = sst [smem:[#allocation29_spill]] %s7043_s22 }
   0xd   :  { %27 = vsyncpa [#allocation3], 0 }
   0xe   :  { %28 = vsyncpa [#allocation5], 0 }
   0xf   :  { %29 = vsyncpa [#allocation8], 0 }
  0x10   :  { %30 = vsyncpa [#allocation11], 0  ;;  %s6292_s3 = smov 0  }
  0x11 LB: > { %7066 = sst [smem:[#allocation17_spill]] %s6160_s3  ;;  %s6298_s28 = sadd.s32 4294967295, %s6160_s3   ;;  %s6160_s3 = sphi %s6292_s3, %s36_s3  }
  0x12   : > { %p4354_p0 = scmp.ge.s32.totalorder %s6160_s3, 1  ;;  %p549_p1 = scmp.lt.s32.totalorder %s6160_s3, 3 }
  0x13   : > { %p7052_p2 = scmp.eq.s32.totalorder %s6298_s28, 0  ;;  %s6162_s30 = smov [#allocation4]  }
  0x14   : > { %p6303_p3 = pnand %p4354_p0, %p549_p1  ;;  %s589_s4 = sshll.u32 %s6162_s30, 4  ;;  %s6307_s4 = int_to_ptr.vmem [resolvable:$true] %s589_s4 }
  0x15   : > { %s6163_s0 = smov [#allocation7]   ;;  %s6164_s5 = smov [#allocation10]  }
  0x16   : > { %s7067_s29 = scalar_select %p6303_p3, 1, 0 }
  0x17   : > { %p5717_p4 = pneg %p6303_p3  ;;  %s627_s23 = sshll.u32 %s6163_s0, 4  ;;  %s6311_s23 = int_to_ptr.vmem [resolvable:$true] %s627_s23 }
  0x18   : > { %s6319_s24 = sshll.u32 %s6164_s5, 4  ;;  %s7069_s10 = sld [smem:[#allocation25_spill]]  ;;  %s661_s24 = int_to_ptr.vmem [resolvable:$true] %s6319_s24 }
  0x19   : > { %p6315_p5 = pnand %p7052_p2, %p5717_p4 }
  0x1b   : > { %p6329_p7 = pneg %p6315_p5 }
  0x1e   : > { %s5942_s26 = scalar_lea.hbm %s7069_s10, 6144 }
  0x1f   : > { %p5943_p6 = scmp.ne.s32.totalorder %s7069_s10, %s5942_s26  ;;  %p5949_p10 = scmp.lt.u32.totalorder %s5942_s26, %s7069_s10 }
  0x21   : > { %p5945_p8 = pnand %p6329_p7, %p5943_p6 }
  0x23   : > { %p5946_p9 = pneg %p5945_p8 }
  0x25   : > { %p5951_p11 = pnand %p5949_p10, %p5946_p9 }
  0x27   : > { %5954 = shalt.err (!%p5951_p11)
}
  0x28   : > { %s5955_s6 = scalar_lea.vmem %s6307_s4, 6144  ;;  %p5963_p1 = scmp.lt.s32.totalorder %s6307_s4, %s6307_s4 }
  0x29   : > { %p5956_p12 = scmp.ne.s32.totalorder %s6307_s4, %s5955_s6  ;;  %p5964_p4 = scmp.lt.s32.totalorder %s5955_s6, %s5955_s6 }
  0x2b   : > { %p5958_p13 = pnand %p5956_p12, %p6329_p7  ;;  %p5965_p6 = por %p5964_p4, %p5963_p1 }
  0x2d   : > { %p5959_p0 = pneg %p5958_p13 }
  0x2f   : > { %p5966_p8 = pnand %p5965_p6, %p5959_p0 }
  0x31   : > { %5969 = shalt.err (!%p5966_p8)
}
  0x32   : > { %s7048_s25 = smov 128   ;;  %s7050_s26 = smov 8  }
  0x33   : > { %5723 = dma.hbm_to_vmem [thread:$0]  (!%p6315_p5), %s7069_s10, 6144, %s6307_s4, [#allocation5], %s7048_s25, %s7048_s25, %s7050_s26  }
  0x34   : > { %s7071_s16 = sld [smem:[#allocation26_spill]] }
  0x3a   : > { %s5970_s6 = scalar_lea.hbm %s7071_s16, 4096 }
  0x3b   : > { %p5971_p9 = scmp.ne.s32.totalorder %s7071_s16, %s5970_s6  ;;  %p5977_p12 = scmp.lt.u32.totalorder %s5970_s6, %s7071_s16 }
  0x3d   : > { %p5973_p10 = pnand %p5971_p9, %p6329_p7 }
  0x3f   : > { %p5974_p11 = pneg %p5973_p10 }
  0x41   : > { %p5979_p13 = pnand %p5977_p12, %p5974_p11 }
  0x43   : > { %5982 = shalt.err (!%p5979_p13)
}
  0x44   : > { %s5983_s4 = scalar_lea.vmem %s6311_s23, 4096  ;;  %p5991_p6 = scmp.lt.s32.totalorder %s6311_s23, %s6311_s23 }
  0x45   : > { %p5984_p0 = scmp.ne.s32.totalorder %s6311_s23, %s5983_s4  ;;  %p5992_p8 = scmp.lt.s32.totalorder %s5983_s4, %s5983_s4 }
  0x47   : > { %p5986_p1 = pnand %p5984_p0, %p6329_p7  ;;  %p5993_p9 = por %p5992_p8, %p5991_p6 }
  0x49   : > { %p5987_p4 = pneg %p5986_p1 }
  0x4b   : > { %p5994_p10 = pnand %p5993_p9, %p5987_p4 }
  0x4d   : > { %5997 = shalt.err (!%p5994_p10)
}
  0x4e   : > { %s6167_s22 = smov 256   ;;  %s6168_s17 = smov 16  }
  0x4f   : > { %5729 = dma.hbm_to_vmem [thread:$0]  (!%p6315_p5), %s7071_s16, 4096, %s6311_s23, [#allocation8], %s6167_s22, %s6167_s22, %s6168_s17  }
  0x50   : > { %s6169_s2 = smov [#allocation2]   ;;  %s5998_s6 = scalar_lea.hbm %s7041_s20, 16 }
  0x51   : > { %s567_s27 = sshll.u32 %s6169_s2, 4  ;;  %p5999_p11 = scmp.ne.s32.totalorder %s7041_s20, %s5998_s6  ;;  %s568_s27 = int_to_ptr.vmem [resolvable:$true] %s567_s27 }
  0x52   : > { %p6005_p0 = scmp.lt.u32.totalorder %s5998_s6, %s7041_s20 }
  0x53   : > { %p6001_p12 = pnand %p5999_p11, %p6329_p7 }
  0x55   : > { %p6002_p13 = pneg %p6001_p12 }
  0x57   : > { %p6007_p1 = pnand %p6005_p0, %p6002_p13 }
  0x59   : > { %6010 = shalt.err (!%p6007_p1)
}
  0x5a   : > { %s6011_s23 = scalar_lea.vmem %s661_s24, 16  ;;  %s6018_s22 = scalar_lea.vmem %s661_s24, 32 }
  0x5b   : > { %p6012_p4 = scmp.ne.s32.totalorder %s661_s24, %s6011_s23  ;;  %p6019_p9 = scmp.lt.s32.totalorder %s661_s24, %s661_s24 }
  0x5c   : > { %p6020_p10 = scmp.lt.s32.totalorder %s6018_s22, %s6011_s23 }
  0x5d   : > { %p6014_p6 = pnand %p6012_p4, %p6329_p7 }
  0x5e   : > { %p6021_p2 = por %p6020_p10, %p6019_p9 }
  0x5f   : > { %p6015_p8 = pneg %p6014_p6 }
  0x61   : > { %p6022_p3 = pnand %p6021_p2, %p6015_p8 }
  0x63   : > { %6025 = shalt.err (!%p6022_p3)
}
  0x64   : > { %5735 = dma.hbm_to_vmem [thread:$0]  (!%p6315_p5), %s7041_s20, 16, %s661_s24, [#allocation11]  }
  0x65   : > { %s7072_s19 = sld [smem:[#allocation24_spill]] }
  0x6b   : > { %s6026_s3 = scalar_lea.hbm %s7072_s19, 2048 }
  0x6c   : > { %p6027_p11 = scmp.ne.s32.totalorder %s7072_s19, %s6026_s3  ;;  %p6033_p3 = scmp.lt.u32.totalorder %s6026_s3, %s7072_s19 }
  0x6e   : > { %p6029_p12 = pnand %p6027_p11, %p6329_p7 }
  0x70   : > { %p6030_p2 = pneg %p6029_p12 }
  0x72   : > { %p6035_p13 = pnand %p6033_p3, %p6030_p2 }
  0x74   : > { %6038 = shalt.err (!%p6035_p13)
}
  0x75   : > { %s6039_s4 = scalar_lea.vmem %s568_s27, 2048  ;;  %p6047_p6 = scmp.lt.s32.totalorder %s568_s27, %s568_s27 }
  0x76   : > { %p6040_p0 = scmp.ne.s32.totalorder %s568_s27, %s6039_s4  ;;  %p6048_p8 = scmp.lt.s32.totalorder %s6039_s4, %s6039_s4 }
  0x78   : > { %p6042_p1 = pnand %p6040_p0, %p6329_p7  ;;  %p6049_p9 = por %p6048_p8, %p6047_p6 }
  0x7a   : > { %p6043_p4 = pneg %p6042_p1 }
  0x7c   : > { %p6050_p10 = pnand %p6049_p9, %p6043_p4 }
  0x7e   : > { %6053 = shalt.err (!%p6050_p10)
}
  0x7f   : > { %s7073_s24 = smov 8   ;;  %s7074_s23 = smov 128  }
  0x80   : > { %5720 = dma.hbm_to_vmem [thread:$0]  (!%p6315_p5), %s7072_s19, 2048, %s568_s27, [#allocation3], %s7074_s23, %s7074_s23, %s7073_s24  }
  0x81   : > { %s6170_s17 = smov [#allocation6]   ;;  %s6171_s26 = smov [#allocation9]  }
  0x82   : > { %s605_s10 = sshll.u32 %s6170_s17, 4  ;;  %s643_s3 = sshll.u32 %s6171_s26, 4  ;;  %s606_s10 = int_to_ptr.vmem [resolvable:$true] %s605_s10  ;;  %s644_s3 = int_to_ptr.vmem [resolvable:$true] %s643_s3 }
  0x83   : > { %s6054_s5 = scalar_lea.hbm %s7033_s12, 2048 }
  0x84   : > { %p6055_p11 = scmp.ne.s32.totalorder %s7033_s12, %s6054_s5  ;;  %p6061_p3 = scmp.lt.u32.totalorder %s6054_s5, %s7033_s12 }
  0x86   : > { %p6057_p12 = pnand %p6055_p11, %p6329_p7 }
  0x88   : > { %p6058_p2 = pneg %p6057_p12 }
  0x8a   : > { %p6063_p13 = pnand %p6061_p3, %p6058_p2 }
  0x8c   : > { %6066 = shalt.err (!%p6063_p13)
}
  0x8d   : > { %s6067_s27 = scalar_lea.vmem %s606_s10, 2048  ;;  %p6075_p6 = scmp.lt.s32.totalorder %s606_s10, %s606_s10 }
  0x8e   : > { %p6068_p0 = scmp.ne.s32.totalorder %s606_s10, %s6067_s27  ;;  %p6076_p8 = scmp.lt.s32.totalorder %s6067_s27, %s6067_s27 }
  0x90   : > { %p6070_p1 = pnand %p6068_p0, %p6329_p7  ;;  %p6077_p9 = por %p6076_p8, %p6075_p6 }
  0x92   : > { %p6071_p4 = pneg %p6070_p1 }
  0x94   : > { %p6078_p10 = pnand %p6077_p9, %p6071_p4 }
  0x96   : > { %6081 = shalt.err (!%p6078_p10)
}
  0x97   : > { %5726 = dma.hbm_to_vmem [thread:$0]  (!%p6315_p5), %s7033_s12, 2048, %s606_s10, [#allocation5], %s7074_s23, %s7074_s23, %s7073_s24  }
  0x98   : > { %s6082_s2 = scalar_lea.hbm %s7039_s18, 4096 }
  0x99   : > { %p6083_p11 = scmp.ne.s32.totalorder %s7039_s18, %s6082_s2  ;;  %p6089_p3 = scmp.lt.u32.totalorder %s6082_s2, %s7039_s18 }
  0x9b   : > { %p6085_p12 = pnand %p6083_p11, %p6329_p7 }
  0x9d   : > { %p6086_p2 = pneg %p6085_p12 }
  0x9f   : > { %p6091_p13 = pnand %p6089_p3, %p6086_p2 }
  0xa1   : > { %6094 = shalt.err (!%p6091_p13)
}
  0xa2   : > { %s6095_s22 = scalar_lea.vmem %s644_s3, 4096  ;;  %p6103_p6 = scmp.lt.s32.totalorder %s644_s3, %s644_s3 }
  0xa3   : > { %p6096_p0 = scmp.ne.s32.totalorder %s644_s3, %s6095_s22  ;;  %p6104_p8 = scmp.lt.s32.totalorder %s6095_s22, %s6095_s22 }
  0xa5   : > { %p6098_p1 = pnand %p6096_p0, %p6329_p7  ;;  %p6105_p9 = por %p6104_p8, %p6103_p6 }
  0xa7   : > { %p6099_p4 = pneg %p6098_p1 }
  0xa9   : > { %p6106_p10 = pnand %p6105_p9, %p6099_p4 }
  0xab   : > { %6109 = shalt.err (!%p6106_p10)
}
  0xac   : > { %5732 = dma.hbm_to_vmem [thread:$0]  (!%p6315_p5), %s7039_s18, 4096, %s644_s3, [#allocation8], %s7074_s23, %s7074_s23, %s7073_s24  }
  0xad   : > { %s6172_s16 = smov [#allocation12]   ;;  %s6110_s2 = scalar_lea.hbm %s7042_s21, 16 }
  0xae   : > { %s671_s25 = sshll.u32 %s6172_s16, 4  ;;  %p6111_p11 = scmp.ne.s32.totalorder %s7042_s21, %s6110_s2  ;;  %s672_s25 = int_to_ptr.vmem [resolvable:$true] %s671_s25 }
  0xaf   : > { %p6117_p3 = scmp.lt.u32.totalorder %s6110_s2, %s7042_s21 }
  0xb0   : > { %p6113_p12 = pnand %p6111_p11, %p6329_p7 }
  0xb2   : > { %p6114_p2 = pneg %p6113_p12 }
  0xb4   : > { %p6119_p13 = pnand %p6117_p3, %p6114_p2 }
  0xb6   : > { %6122 = shalt.err (!%p6119_p13)
}
  0xb7   : > { %s6123_s24 = scalar_lea.vmem %s672_s25, 16  ;;  %s6130_s23 = scalar_lea.vmem %s672_s25, 32 }
  0xb8   : > { %p6124_p0 = scmp.ne.s32.totalorder %s672_s25, %s6123_s24  ;;  %p6131_p6 = scmp.lt.s32.totalorder %s672_s25, %s672_s25 }
  0xb9   : > { %p6132_p8 = scmp.lt.s32.totalorder %s6130_s23, %s6123_s24 }
  0xba   : > { %p6126_p1 = pnand %p6124_p0, %p6329_p7 }
  0xbb   : > { %p6133_p9 = por %p6132_p8, %p6131_p6 }
  0xbc   : > { %p6127_p4 = pneg %p6126_p1 }
  0xbe   : > { %p6134_p10 = pnand %p6133_p9, %p6127_p4 }
  0xc0   : > { %6137 = shalt.err (!%p6134_p10)
}
  0xc1   : > { %5738 = dma.hbm_to_vmem [thread:$0]  (!%p6315_p5), %s7042_s21, 16, %s672_s25, [#allocation11]  }
  0xc2   : > { %p7075_p11 = scmp.ne.s32.totalorder %s7067_s29, 0 }
  0xc3   : > { %p7076_p12 = scmp.eq.s32.totalorder (!%p7075_p11), %s6298_s28, 0 }
  0xc4   : > { %716 = sbr.rel (%p7075_p11) target bundleno = 5754 (0x167a), region = 108 }
  0xcb   : > { %6143 = dma.done.wait (%p7076_p12), [#allocation3], 2048   ;;  %p7077_p7 = pmov %p7076_p12 }
  0xcd   : > { %6145 = vsyncadd (%p7077_p7), [#allocation3], 4294965248  ;;  %p7078_p2 = pmov %p7077_p7 }
  0xcf   : > { %6147 = dma.done.wait (%p7078_p2), [#allocation5], 8192   ;;  %p7079_p3 = pmov %p7078_p2 }
  0xd0   : > { %p7080_p13 = pmov %p7078_p2 }
  0xd1   : > { %6149 = vsyncadd (%p7079_p3), [#allocation5], 4294959104 }
  0xd2   : > { %6151 = dma.done.wait (%p7080_p13), [#allocation8], 8192   ;;  %p7081_p5 = pmov %p7078_p2 }
  0xd3   : > { %p7082_p0 = pmov %p7078_p2 }
  0xd4   : > { %6153 = vsyncadd (%p7081_p5), [#allocation8], 4294959104 }
  0xd5   : > { %6155 = dma.done.wait (%p7082_p0), [#allocation11], 32   ;;  %p7083_p1 = pmov %p7082_p0 }
  0xd6   : > { %p817_p4 = scmp.lt.s32.totalorder %s6298_s28, 1  ;;  %s7084_s30 = sld [smem:[#allocation22_spill]]  ;;  %vm1156_vm0 = vcmask 261120   ;;  %vm1244_vm2 = vcmask 130048  }
  0xd7   : > { %6157 = vsyncadd (%p7083_p1), [#allocation11], 4294967264  ;;  %s7085_s1 = sld [smem:[#allocation18_spill]]  ;;  %s7086_s25 = sld [smem:[#allocation19_spill]] }
  0xd8   : > { %s7097_s28 = smov (!%p817_p4, %s6298_s28), 1  ;;  %s7087_s5 = sld [smem:[#allocation23_spill]]  ;;  %vm6658_vm1 = vmpackc.low %vm1156_vm0, %vm1156_vm0 }
  0xd9   : > { %s6535_s26 = sshll.u32 %s7097_s28, 4  ;;  %s6173_s27 = smov 64  }
  0xda   : > { %s6174_s16 = smov 96   ;;  %s4508_s6 = sshll.u32 %s7097_s28, 5 }
  0xdb   : > { %s7091_s22 = sld [smem:[#allocation21_spill]]  ;;  %s7092_s2 = sld [smem:[#allocation27_spill]] }
  0xdc   : > { %v4382_v0 = vld [vmem:[%s7084_s30 + $0x80] sm:$0xff]  ;;  %v4383_v1 = vld [vmem:[%s7084_s30 + $0x88] sm:$0xff]  ;;  %v4384_v2 = vld [vmem:[%s7084_s30 + $0x90] sm:$0xff]  ;;  %s7093_s4 = sld [smem:[#allocation28_spill]] }
  0xdd   : > { %v5269_v3 = vpack.c.bf16 %v4383_v1, %v4382_v0  ;;  %v4385_v4 = vld [vmem:[%s7084_s30 + $0x98] sm:$0xff]  ;;  %v856_v5 = vld [vmem:[%s7084_s30] sm:$0xff]  ;;  %v857_v6 = vld [vmem:[%s7084_s30 + $0x8] sm:$0xff]  ;;  %s6553_s10 = scalar_lea.vmem %s7085_s1, %s6535_s26  ;;  %s6559_s17 = scalar_lea.vmem %s7086_s25, %s6535_s26 }
  0xde   : > { %v5273_v7 = vpack.c.bf16 %v4385_v4, %v4384_v2  ;;  %v5237_v8 = vpack.c.bf16 %v857_v6, %v856_v5  ;;  %v4386_v9 = vld [vmem:[%s7084_s30 + $0xa0] sm:$0xff]  ;;  %v4387_v10 = vld [vmem:[%s7084_s30 + $0xa8] sm:$0xff]  ;;  %v858_v11 = vld [vmem:[%s7084_s30 + $0x10] sm:$0xff]  ;;  %s6175_s25 = smov 32  }
  0xdf   : > { %5270 = vmatprep.subr.bf16.mxu1 %v5269_v3  ;;  %v859_v12 = vld [vmem:[%s7084_s30 + $0x18] sm:$0xff]  ;;  %v860_v14 = vld [vmem:[%s7084_s30 + $0x20] sm:$0xff]  ;;  %v861_v15 = vld [vmem:[%s7084_s30 + $0x28] sm:$0xff]  ;;  %v5277_v16 = vpack.c.bf16 %v4387_v10, %v4386_v9 }
  0xe0   : > { %5272 = vmatpush3.bf16.msra.mxu1 %v5269_v3  ;;  %5238 = vmatprep.subr.bf16.mxu0 %v5237_v8  ;;  %v5241_v13 = vpack.c.bf16 %v859_v12, %v858_v11  ;;  %v4388_v17 = vld [vmem:[%s7084_s30 + $0xb0] sm:$0xff]  ;;  %v4389_v18 = vld [vmem:[%s7084_s30 + $0xb8] sm:$0xff]  ;;  %v5245_v19 = vpack.c.bf16 %v861_v15, %v860_v14  ;;  %v4390_v23 = vld [vmem:[%s7084_s30 + $0xc0] sm:$0xff] }
  0xe1   : > { %5274 = vmatprep.subr.bf16.mxu1 %v5273_v7  ;;  %5240 = vmatpush3.bf16.msra.mxu0 %v5237_v8  ;;  %v862_v20 = vld [vmem:[%s7084_s30 + $0x30] sm:$0xff]  ;;  %v863_v21 = vld [vmem:[%s7084_s30 + $0x38] sm:$0xff]  ;;  %v5281_v22 = vpack.c.bf16 %v4389_v18, %v4388_v17  ;;  %v4391_v24 = vld [vmem:[%s7084_s30 + $0xc8] sm:$0xff]  ;;  %s836_s29 = scalar_lea.vmem %s7091_s22, %s4508_s6 }
  0xe2   : > { %5242 = vmatprep.subr.bf16.mxu0 %v5241_v13  ;;  %v5249_v25 = vpack.c.bf16 %v863_v21, %v862_v20  ;;  %v6568_v26 = vld [vmem:[%s6553_s10] sm:$0xff]  ;;  %v865_v29 = vld [vmem:[%s7084_s30 + $0x48] sm:$0xff]  ;;  %v5285_v31 = vpack.c.bf16 %v4391_v24, %v4390_v23  ;;  %v4392_v32 = vld [vmem:[%s7084_s30 + $0xd0] sm:$0xff] }
  0xe3   : > { %v6571_v27 = vld [vmem:[%s6559_s17] sm:$0xff]  ;;  %v4393_v33 = vld [vmem:[%s7084_s30 + $0xd8] sm:$0xff]  ;;  %v866_v35 = vld [vmem:[%s7084_s30 + $0x50] sm:$0xff] }
  0xe4   : > { %5276 = vmatpush3.bf16.msra.mxu1 %v5273_v7  ;;  %v864_v28 = vld [vmem:[%s7084_s30 + $0x40] sm:$0xff]  ;;  %v854_v30 = vadd.f32 %v6571_v27, %v6568_v26  ;;  %v867_v36 = vld [vmem:[%s7084_s30 + $0x58] sm:$0xff]  ;;  %v5289_v37 = vpack.c.bf16 %v4393_v33, %v4392_v32  ;;  %v4395_v39 = vld [vmem:[%s7084_s30 + $0xe8] sm:$0xff] }
  0xe5   : > { %5278 = vmatprep.subr.bf16.mxu1 %v5277_v16  ;;  %5244 = vmatpush3.bf16.msra.mxu0 %v5241_v13  ;;  %v5253_v34 = vpack.c.bf16 %v865_v29, %v864_v28  ;;  %v4394_v38 = vld [vmem:[%s7084_s30 + $0xe0] sm:$0xff]  ;;  %v5257_v40 = vpack.c.bf16 %v867_v36, %v866_v35  ;;  %v869_v42 = vld [vmem:[%s7084_s30 + $0x68] sm:$0xff]  ;;  %v4396_v44 = vld [vmem:[%s7084_s30 + $0xf0] sm:$0xff] }
  0xe6   : > { %5246 = vmatprep.subr.bf16.mxu0 %v5245_v19  ;;  %4856 = vmatprep.mubr.f32.mxu1 %v854_v30  ;;  %v868_v41 = vld [vmem:[%s7084_s30 + $0x60] sm:$0xff]  ;;  %v5293_v43 = vpack.c.bf16 %v4395_v39, %v4394_v38  ;;  %v4397_v45 = vld [vmem:[%s7084_s30 + $0xf8] sm:$0xff]  ;;  %v870_v47 = vld [vmem:[%s7084_s30 + $0x70] sm:$0xff] }
  0xe7   : > { %4821 = vmatprep.mubr.f32.mxu0 %v854_v30  ;;  %v5261_v46 = vpack.c.bf16 %v869_v42, %v868_v41  ;;  %v871_v48 = vld [vmem:[%s7084_s30 + $0x78] sm:$0xff]  ;;  %v5297_v49 = vpack.c.bf16 %v4397_v45, %v4396_v44  ;;  %v6618_v51 = vld [vmem:[%s6553_s10 + $0x8] sm:$0xff]  ;;  %v4400_v54 = vld [vmem:[%s7084_s30 + $0x100] sm:$0xff]  ;;  %s7090_s10 = sld [smem:[#allocation20_spill]] }
  0xe8   : > { %5280 = vmatpush3.bf16.msra.mxu1 %v5277_v16  ;;  %v5265_v50 = vpack.c.bf16 %v871_v48, %v870_v47  ;;  %v6621_v52 = vld [vmem:[%s6559_s17 + $0x8] sm:$0xff]  ;;  %v4402_v56 = vld [vmem:[%s7084_s30 + $0x110] sm:$0xff]  ;;  %v4403_v58 = vld [vmem:[%s7084_s30 + $0x118] sm:$0xff] }
  0xe9   : > { %5282 = vmatprep.subr.bf16.mxu1 %v5281_v22  ;;  %5248 = vmatpush3.bf16.msra.mxu0 %v5245_v19  ;;  %v855_v53 = vadd.f32 %v6621_v52, %v6618_v51  ;;  %v4401_v55 = vld [vmem:[%s7084_s30 + $0x108] sm:$0xff]  ;;  %v5305_v59 = vpack.c.bf16 %v4403_v58, %v4402_v56  ;;  %v4404_v60 = vld [vmem:[%s7084_s30 + $0x120] sm:$0xff]  ;;  %v4406_v0 = vld [vmem:[%s7084_s30 + $0x130] sm:$0xff] }
  0xea   : > { %5250 = vmatprep.subr.bf16.mxu0 %v5249_v25  ;;  %v5301_v57 = vpack.c.bf16 %v4401_v55, %v4400_v54  ;;  %v4405_v61 = vld [vmem:[%s7084_s30 + $0x128] sm:$0xff]  ;;  %v4399_v62 = vld [vmem:[%s7087_s5 + $0x1] ss:$0 sm:$0xff]  ;;  %v4407_v1 = vld [vmem:[%s7084_s30 + $0x138] sm:$0xff] }
  0xeb   : > { %v5309_v63 = vpack.c.bf16 %v4405_v61, %v4404_v60  ;;  %v4381_v3 = vld [vmem:[%s7087_s5] ss:$0 sm:$0xff]  ;;  %v5313_v9 = vpack.c.bf16 %v4407_v1, %v4406_v0  ;;  %v4409_v13 = vld [vmem:[%s7084_s30 + $0x148] sm:$0xff]  ;;  %v4410_v18 = vld [vmem:[%s7084_s30 + $0x150] sm:$0xff] }
  0xec   : > { %5284 = vmatpush3.bf16.msra.mxu1 %v5281_v22  ;;  %v4408_v12 = vld [vmem:[%s7084_s30 + $0x140] sm:$0xff]  ;;  %v4411_v19 = vld [vmem:[%s7084_s30 + $0x158] sm:$0xff]  ;;  %v4413_v23 = vld [vmem:[%s7084_s30 + $0x168] sm:$0xff] }
  0xed   : > { %5286 = vmatprep.subr.bf16.mxu1 %v5285_v31  ;;  %5252 = vmatpush3.bf16.msra.mxu0 %v5249_v25  ;;  %v5317_v17 = vpack.c.bf16 %v4409_v13, %v4408_v12  ;;  %v5321_v21 = vpack.c.bf16 %v4411_v19, %v4410_v18  ;;  %v4412_v22 = vld [vmem:[%s7084_s30 + $0x160] sm:$0xff]  ;;  %v4414_v28 = vld [vmem:[%s7084_s30 + $0x170] sm:$0xff]  ;;  %v4415_v29 = vld [vmem:[%s7084_s30 + $0x178] sm:$0xff]  ;;  %s831_s23 = scalar_lea.vmem %s7090_s10, %s4508_s6 }
  0xee   : > { %5254 = vmatprep.subr.bf16.mxu0 %v5253_v34  ;;  %v5325_v25 = vpack.c.bf16 %v4413_v23, %v4412_v22  ;;  %v5329_v30 = vpack.c.bf16 %v4415_v29, %v4414_v28  ;;  %v4417_v36 = vld [vmem:[%s7087_s5 + $0x2] ss:$0 sm:$0xff] }
  0xf0   : > { %5288 = vmatpush3.bf16.msra.mxu1 %v5285_v31 }
  0xf1   : > { %5290 = vmatprep.subr.bf16.mxu1 %v5289_v37  ;;  %5256 = vmatpush3.bf16.msra.mxu0 %v5253_v34 }
  0xf2   : > { %5258 = vmatprep.subr.bf16.mxu0 %v5257_v40 }
  0xf4   : > { %5292 = vmatpush3.bf16.msra.mxu1 %v5289_v37 }
  0xf5   : > { %5294 = vmatprep.subr.bf16.mxu1 %v5293_v43  ;;  %5260 = vmatpush3.bf16.msra.mxu0 %v5257_v40 }
  0xf6   : > { %5262 = vmatprep.subr.bf16.mxu0 %v5261_v46 }
  0xf8   : > { %5296 = vmatpush3.bf16.msra.mxu1 %v5293_v43 }
  0xf9   : > { %5298 = vmatprep.subr.bf16.mxu1 %v5297_v49  ;;  %5264 = vmatpush3.bf16.msra.mxu0 %v5261_v46 }
  0xfa   : > { %5266 = vmatprep.subr.bf16.mxu0 %v5265_v50 }
  0xfc   : > { %5300 = vmatpush3.bf16.msra.mxu1 %v5297_v49 }
  0xfd   : > { %5268 = vmatpush3.bf16.msra.mxu0 %v5265_v50 }
  0xfe   : > { %5302 = vmatprep.subr.bf16.mxu0 %v5301_v57 }
  0xff   : > { %4857 = vmatmul.mubr.f32.vlgmr.msra.gmra.mrb[0].mxu1 %v855_v53 }
 0x100   : > { %4822 = vmatmul.mubr.f32.vlgmr.msra.gmra.mrb[0].mxu0 %v855_v53 }
 0x101   : > { %4891 = vmatprep.mubr.f32.mxu0 %v6568_v26  ;;  %5304 = vmatpush3.bf16.msra.mxu0 %v5301_v57 }
 0x102   : > { %5306 = vmatprep.subr.bf16.mxu0 %v5305_v59 }
 0x105   : > { %5308 = vmatpush3.bf16.msra.mxu0 %v5305_v59 }
 0x106   : > { %5310 = vmatprep.subr.bf16.mxu0 %v5309_v63 }
 0x109   : > { %5312 = vmatpush3.bf16.msra.mxu0 %v5309_v63 }
 0x10a   : > { %5314 = vmatprep.subr.bf16.mxu0 %v5313_v9 }
 0x10d   : > { %5316 = vmatpush3.bf16.msra.mxu0 %v5313_v9 }
 0x10e   : > { %5318 = vmatprep.subr.bf16.mxu0 %v5317_v17 }
 0x111   : > { %5320 = vmatpush3.bf16.msra.mxu0 %v5317_v17 }
 0x112   : > { %5322 = vmatprep.subr.bf16.mxu0 %v5321_v21 }
 0x115   : > { %5324 = vmatpush3.bf16.msra.mxu0 %v5321_v21 }
 0x116   : > { %5326 = vmatprep.subr.bf16.mxu0 %v5325_v25 }
 0x119   : > { %5328 = vmatpush3.bf16.msra.mxu0 %v5325_v25 }
 0x11a   : > { %5330 = vmatprep.subr.bf16.mxu0 %v5329_v30 }
 0x11d   : > { %5332 = vmatpush3.bf16.msra.mxu0 %v5329_v30 }
 0x120   : > { %4892 = vmatmul.mubr.f32.vlgmr.msra.gmra.mrb[2].mxu0 %v6618_v51 }
 0x1d2   : > { %v4858_v2 = vpop.f32.mrb[0].mxu1 }
 0x1d3   : > { %v1051_v4 = vadd.f32 %v4858_v2, %v4399_v62  ;;  %v1045_v5 = vpop.f32.mrb[1].mxu1  ;;  %v4823_v6 = vpop.f32.mrb[0].mxu0 }
 0x1d4   : > { %v1046_v7 = vadd.f32 %v4399_v62, %v1045_v5  ;;  %v945_v8 = vpop.f32.mrb[1].mxu0  ;;  %v951_v20 = vadd.f32 %v4823_v6, %v4381_v3 }
 0x1d5   : > { %v946_v11 = vadd.f32 %v4381_v3, %v945_v8 }
 0x1d6   : > { %v5333_v14 = vpack.c.bf16 %v1051_v4, %v1046_v7  ;;  %v6668_v15 = vpack.i.bf16 %v1051_v4, %v1046_v7  ;;  %v6692_v24 = vmul.f32 0.17677669, %v951_v20 }
 0x1d7   : > { %v6670_v16 = vmul.f32 0.17677669, %v946_v11 }
 0x1d8   : > { %5335 = vmatprep.subr.msk.bf16.mxu1 %vm6658_vm1, %v5333_v14 }
 0x1d9   : > { %5338 = vmatpush3.bf16.xpose.msk.msra.mxu1 %vm6658_vm1, %v5333_v14  ;;  %1720 = vrot.lane.b32.xlu1 %v6670_v16, %s6173_s27 }
 0x1da   : > { %4898 = vmatprep.mubr.msk.f32.mxu1 %vm1156_vm0, %v6670_v16 }
 0x1e0   : > { %4899 = vmatmul.mubr.msk.f32.vlgmr.msra.gmra.mrb[2].mxu1 %vm1156_vm0, %v6692_v24 }
 0x1f3   : > { %v4893_v35 = vpop.f32.mrb[2].mxu0 }
 0x1f4   : > { %v1145_v37 = vpop.f32.mrb[3].mxu0  ;;  %v6708_v38 = vadd.f32 %v4893_v35, %v4417_v36 }
 0x1f5   : > { %v6710_v39 = vadd.f32 %v4417_v36, %v1145_v37 }
 0x1f7   : > { %v5339_v40 = vpack.c.bf16 %v6708_v38, %v6710_v39 }
 0x1f9   : > { %5340 = vmatprep.subr.bf16.mxu0 %v5339_v40 }
 0x1fa   : > { %5342 = vmatpush3.bf16.msra.mxu0 %v5339_v40 }
 0x24b   : > { %v1721_v58 = vpop.permute.xlu1 %1720 }
 0x2b3   : > { %v4900_v31 = vpop.f32.mrb[2].mxu1 }
 0x2b4   : > { %v1235_v32 = vpop.f32.mrb[3].mxu1  ;;  %v1248_v34 = vsel %vm1244_vm2, %v4900_v31, -inf }
 0x2b5   : > { %v1245_v33 = vsel %vm1244_vm2, %v1235_v32, -inf }
 0x2b6   : > { %1246 = vmax.xlane.f32.xlu0 %v1245_v33 }
 0x2ba   : > { %1249 = vmax.xlane.f32.xlu0 %v1248_v34 }
 0x2d0   : > { %5777 = vrot.lane.b32.xlu0 %v6668_v15, %s6173_s27 }
 0x2d4   : > { %1352 = vrot.lane.b32.xlu0 %v6670_v16, %s6174_s16 }
 0x343   : > { %v1247_v41 = vpop.xlane.xlu0 %1246 }
 0x344   : > { %v1251_v42 = vsub.f32 %v1235_v32, %v1247_v41 }
 0x346   : > { %v1253_v45 = vmul.f32 1.442695, %v1251_v42 }
 0x347   : > { %v1250_v43 = vpop.xlane.xlu0 %1249 }
 0x348   : > { %v1252_v44 = vsub.f32 %v4900_v31, %v1250_v43 }
 0x34a   : > { %v1255_v46 = vmul.f32 1.442695, %v1252_v44 }
 0x34b   : > { %v5778_v47 = vpop.permute.xlu0 %5777 }
 0x34c   : > { %5866 = vpow2.f32 %v1255_v46  ;;  %v5780_v48 = vunpack.i.h.bf16 %v5778_v47  ;;  %v5779_v49 = vunpack.i.l.bf16 %v5778_v47 }
 0x34d   : > { %5868 = vpow2.f32 %v1253_v45 }
 0x34e   : > { %v5369_v50 = vpack.c.bf16 %v5780_v48, %v5779_v49 }
 0x34f   : > { %v1353_v53 = vpop.permute.xlu0 %1352 }
 0x350   : > { %4912 = vmatprep.mubr.msk.f32.mxu1 %vm1156_vm0, %v1353_v53  ;;  %5371 = vmatprep.subr.msk.bf16.mxu0 %vm6658_vm1, %v5369_v50 }
 0x356   : > { %v5867_v54 = vpop.eup %5866 }
 0x357   : > { %v1260_v55 = vsel %vm1244_vm2, %v5867_v54, 0.0  ;;  %v5869_v56 = vpop.eup %5868 }
 0x358   : > { %1261 = vadd.xlane.f32.xlu1 %v1260_v55  ;;  %v1257_v57 = vsel %vm1244_vm2, %v5869_v56, 0.0 }
 0x35c   : > { %1258 = vadd.xlane.f32.xlu1 %v1257_v57 }
 0x36d   : > { %1722 = vrot.lane.b32.xlu1 %v6692_v24, %s6173_s27 }
 0x371   : > { %5782 = vrot.lane.b32.xlu1 %v6668_v15, %s6174_s16 }
 0x375   : > { %1354 = vrot.lane.b32.xlu1 %v6692_v24, %s6174_s16 }
 0x3e5   : > { %v1262_v59 = vpop.xlane.xlu1 %1261 }
 0x3e6   : > { %5870 = vrcp.f32 %v1262_v59 }
 0x3e9   : > { %v1259_v60 = vpop.xlane.xlu1 %1258 }
 0x3ea   : > { %5872 = vrcp.f32 %v1259_v60 }
 0x3ed   : > { %v1723_v61 = vpop.permute.xlu1 %1722 }
 0x3f0   : > { %v5871_v1 = vpop.eup %5870 }
 0x3f1   : > { %v5783_v62 = vpop.permute.xlu1 %5782  ;;  %v1266_v5 = vmul.f32 %v5871_v1, %v5867_v54 }
 0x3f2   : > { %v5785_v63 = vunpack.i.h.bf16 %v5783_v62  ;;  %v5784_v0 = vunpack.i.l.bf16 %v5783_v62 }
 0x3f4   : > { %v5873_v2 = vpop.eup %5872  ;;  %v5343_v3 = vpack.c.bf16 %v5785_v63, %v5784_v0 }
 0x3f5   : > { %v1265_v4 = vmul.f32 %v5873_v2, %v5869_v56  ;;  %v1355_v6 = vpop.permute.xlu1 %1354 }
 0x3f6   : > { %5345 = vmatprep.subr.msk.bf16.mxu1 %vm6658_vm1, %v5343_v3 }
 0x3f7   : > { %4905 = vmatprep.mubr.msk.f32.mxu0 %vm1244_vm2, %v1265_v4  ;;  %5348 = vmatpush3.bf16.xpose.msk.msra.mxu1 %vm6658_vm1, %v5343_v3 }
 0x3f8   : > { %4906 = vmatmul.mubr.msk.f32.vlgmr.msra.gmra.mrb[4].mxu0 %vm1244_vm2, %v1266_v5 }
 0x3f9   : > { %5374 = vmatpush3.bf16.xpose.msk.msra.mxu0 %vm6658_vm1, %v5369_v50  ;;  %4948 = vmatprep.mubr.msk.f32.mxu0 %vm1156_vm0, %v1721_v58 }
 0x3fe   : > { %4913 = vmatmul.mubr.msk.f32.vlgmr.msra.gmra.mrb[4].mxu1 %vm1156_vm0, %v1355_v6 }
 0x400   : > { %4949 = vmatmul.mubr.msk.f32.vlgmr.msra.gmra.mrb[6].mxu0 %vm1156_vm0, %v1723_v61 }
 0x4cb   : > { %v6740_v7 = vpop.f32.mrb[4].mxu0 }
 0x4cc   : > { %v6742_v8 = vpop.f32.mrb[5].mxu0 }
 0x4d1   : > { %v4914_v9 = vpop.f32.mrb[4].mxu1 }
 0x4d2   : > { %v1434_v11 = vpop.f32.mrb[5].mxu1  ;;  %v1446_v18 = vsel %vm1244_vm2, %v4914_v9, -inf }
 0x4d3   : > { %v4950_v12 = vpop.f32.mrb[6].mxu0  ;;  %v1443_v30 = vsel %vm1244_vm2, %v1434_v11, -inf }
 0x4d4   : > { %v1802_v13 = vpop.f32.mrb[7].mxu0  ;;  %v1814_v14 = vsel %vm1244_vm2, %v4950_v12, -inf }
 0x4d5   : > { %1815 = vmax.xlane.f32.xlu1 %v1814_v14  ;;  %v1811_v17 = vsel %vm1244_vm2, %v1802_v13, -inf  ;;  %v1554_v14 = vld [vmem:[#allocation2 + $0x20] sm:$0xff] }
 0x4d6   : > { %1812 = vmax.xlane.f32.xlu0 %v1811_v17  ;;  %v1555_v17 = vld [vmem:[#allocation2 + $0x28] sm:$0xff] }
 0x4e6   : > { %5792 = vrot.lane.b32.xlu1 %v6668_v15, %s6175_s25 }
 0x4ea   : > { %2007 = vrot.lane.b32.xlu1 %v6670_v16, %s6175_s25 }
 0x4ee   : > { %2009 = vrot.lane.b32.xlu1 %v6692_v24, %s6175_s25  ;;  %v6757_v24 = vpack.i.bf16 %v6708_v38, %v6710_v39 }
 0x512   : > { %1447 = vmax.xlane.f32.xlu1 %v1446_v18  ;;  %v1556_v18 = vld [vmem:[#allocation2 + $0x30] sm:$0xff] }
 0x562   : > { %v1816_v19 = vpop.xlane.xlu1 %1815 }
 0x563   : > { %v1818_v20 = vsub.f32 %v4950_v12, %v1816_v19  ;;  %v1813_v21 = vpop.xlane.xlu0 %1812  ;;  %v5353_v19 = vpack.c.bf16 %v1555_v17, %v1554_v14  ;;  %v2454_v14 = vld [vmem:[#allocation4 + $0x98] sm:$0xff] }
 0x564   : > { %v1817_v22 = vsub.f32 %v1802_v13, %v1813_v21 }
 0x565   : > { %v1821_v23 = vmul.f32 1.442695, %v1818_v20  ;;  %v1557_v20 = vld [vmem:[#allocation2 + $0x38] sm:$0xff] }
 0x566   : > { %v1819_v25 = vmul.f32 1.442695, %v1817_v22  ;;  %v5793_v33 = vpop.permute.xlu1 %5792  ;;  %v5357_v21 = vpack.c.bf16 %v1557_v20, %v1556_v18  ;;  %v1348_v22 = vld [vmem:[#allocation2] sm:$0xff] }
 0x567   : > { %5874 = vpow2.f32 %v1821_v23  ;;  %v5795_v35 = vunpack.i.h.bf16 %v5793_v33  ;;  %v5794_v36 = vunpack.i.l.bf16 %v5793_v33  ;;  %v1349_v23 = vld [vmem:[#allocation2 + $0x8] sm:$0xff]  ;;  %v2455_v18 = vld [vmem:[#allocation4 + $0xa0] sm:$0xff] }
 0x568   : > { %5876 = vpow2.f32 %v1819_v25  ;;  %v5361_v25 = vpack.c.bf16 %v1349_v23, %v1348_v22  ;;  %v2352_v20 = vld [vmem:[#allocation4] sm:$0xff] }
 0x569   : > { %v5387_v42 = vpack.c.bf16 %v5795_v35, %v5794_v36  ;;  %v1350_v36 = vld [vmem:[#allocation2 + $0x10] sm:$0xff] }
 0x56a   : > { %v2008_v45 = vpop.permute.xlu1 %2007 }
 0x56e   : > { %v2010_v46 = vpop.permute.xlu1 %2009 }
 0x571   : > { %v5875_v28 = vpop.eup %5874 }
 0x572   : > { %v1826_v15 = vsel %vm1244_vm2, %v5875_v28, 0.0  ;;  %v5877_v29 = vpop.eup %5876 }
 0x573   : > { %1827 = vadd.xlane.f32.xlu0 %v1826_v15  ;;  %v1823_v16 = vsel %vm1244_vm2, %v5877_v29, 0.0 }
 0x577   : > { %1824 = vadd.xlane.f32.xlu0 %v1823_v16 }
 0x58d   : > { %5787 = vrot.lane.b32.xlu0 %v6757_v24, %s6173_s27 }
 0x59f   : > { %v1448_v47 = vpop.xlane.xlu1 %1447 }
 0x5a0   : > { %v1450_v48 = vsub.f32 %v4914_v9, %v1448_v47 }
 0x5a2   : > { %v1453_v53 = vmul.f32 1.442695, %v1450_v48  ;;  %v2207_v48 = vld [vmem:[#allocation2 + $0x60] sm:$0xff] }
 0x5ac   : > { %1444 = vmax.xlane.f32.xlu0 %v1443_v30 }
 0x600   : > { %v1828_v31 = vpop.xlane.xlu0 %1827 }
 0x601   : > { %5878 = vrcp.f32 %v1828_v31 }
 0x604   : > { %v1825_v32 = vpop.xlane.xlu0 %1824 }
 0x605   : > { %5880 = vrcp.f32 %v1825_v32 }
 0x608   : > { %v5788_v34 = vpop.permute.xlu0 %5787 }
 0x609   : > { %v5790_v37 = vunpack.i.h.bf16 %v5788_v34  ;;  %v5789_v40 = vunpack.i.l.bf16 %v5788_v34 }
 0x60b   : > { %v5375_v41 = vpack.c.bf16 %v5790_v37, %v5789_v40  ;;  %v5879_v38 = vpop.eup %5878  ;;  %v1351_v37 = vld [vmem:[#allocation2 + $0x18] sm:$0xff] }
 0x60c   : > { %v1832_v44 = vmul.f32 %v5879_v38, %v5875_v28  ;;  %v1920_v38 = vld [vmem:[#allocation2 + $0x40] sm:$0xff] }
 0x60d   : > { %5376 = vmatprep.subr.bf16.mxu0 %v5375_v41 }
 0x60e   : > { %5378 = vmatpush3.bf16.msra.mxu0 %v5375_v41 }
 0x60f   : > { %v5881_v39 = vpop.eup %5880  ;;  %5389 = vmatprep.subr.msk.bf16.mxu0 %vm6658_vm1, %v5387_v42 }
 0x610   : > { %v1831_v43 = vmul.f32 %v5881_v39, %v5877_v29  ;;  %v1921_v39 = vld [vmem:[#allocation2 + $0x48] sm:$0xff] }
 0x612   : > { %4955 = vmatprep.mubr.msk.f32.mxu0 %vm1244_vm2, %v1831_v43  ;;  %v5379_v43 = vpack.c.bf16 %v1921_v39, %v1920_v38 }
 0x613   : > { %4956 = vmatmul.mubr.msk.f32.vlgmr.msra.gmra.mrb[8].mxu0 %vm1244_vm2, %v1832_v44  ;;  %v1922_v44 = vld [vmem:[#allocation2 + $0x50] sm:$0xff] }
 0x614   : > { %4973 = vmatprep.mubr.msk.f32.mxu0 %vm1156_vm0, %v2008_v45  ;;  %v1923_v45 = vld [vmem:[#allocation2 + $0x58] sm:$0xff] }
 0x617   : > { %5392 = vmatpush3.bf16.xpose.msk.msra.mxu0 %vm6658_vm1, %v5387_v42  ;;  %v5365_v42 = vpack.c.bf16 %v1351_v37, %v1350_v36  ;;  %v2464_v36 = vld [vmem:[#allocation4 + $0xe8] sm:$0xff] }
 0x61e   : > { %4974 = vmatmul.mubr.msk.f32.vlgmr.msra.gmra.mrb[10].mxu0 %vm1156_vm0, %v2010_v46 }
 0x639   : > { %v1445_v49 = vpop.xlane.xlu0 %1444 }
 0x63a   : > { %v1449_v50 = vsub.f32 %v1434_v11, %v1445_v49  ;;  %v2208_v49 = vld [vmem:[#allocation2 + $0x68] sm:$0xff] }
 0x63c   : > { %v1451_v54 = vmul.f32 1.442695, %v1449_v50 }
 0x63e   : > { %5882 = vpow2.f32 %v1451_v54 }
 0x63f   : > { %5884 = vpow2.f32 %v1453_v53 }
 0x648   : > { %v5883_v55 = vpop.eup %5882 }
 0x649   : > { %v1455_v56 = vsel %vm1244_vm2, %v5883_v55, 0.0  ;;  %v5885_v57 = vpop.eup %5884 }
 0x64a   : > { %1456 = vadd.xlane.f32.xlu0 %v1455_v56  ;;  %v1458_v58 = vsel %vm1244_vm2, %v5885_v57, 0.0  ;;  %v2209_v56 = vld [vmem:[#allocation2 + $0x70] sm:$0xff] }
 0x64e   : > { %1459 = vadd.xlane.f32.xlu0 %v1458_v58 }
 0x664   : > { %5797 = vrot.lane.b32.xlu0 %v6757_v24, %s6174_s16 }
 0x6d7   : > { %v1457_v59 = vpop.xlane.xlu0 %1456 }
 0x6d8   : > { %5886 = vrcp.f32 %v1457_v59 }
 0x6db   : > { %v1460_v60 = vpop.xlane.xlu0 %1459 }
 0x6dc   : > { %5888 = vrcp.f32 %v1460_v60 }
 0x6df   : > { %v5798_v61 = vpop.permute.xlu0 %5797 }
 0x6e0   : > { %v5800_v62 = vunpack.i.h.bf16 %v5798_v61  ;;  %v5799_v63 = vunpack.i.l.bf16 %v5798_v61 }
 0x6e2   : > { %v5887_v0 = vpop.eup %5886  ;;  %v5349_v1 = vpack.c.bf16 %v5800_v62, %v5799_v63 }
 0x6e3   : > { %v1463_v2 = vmul.f32 %v5887_v0, %v5883_v55  ;;  %v5397_v55 = vpack.c.bf16 %v2208_v49, %v2207_v48  ;;  %v4450_v0 = vld [vmem:[%s7028_s7] ss:$0 sm:$0xff]  ;;  %v2357_v48 = vld [vmem:[#allocation4 + $0x28] sm:$0xff] }
 0x6e4   : > { %5350 = vmatprep.subr.bf16.mxu1 %v5349_v1 }
 0x6e5   : > { %5352 = vmatpush3.bf16.msra.mxu1 %v5349_v1  ;;  %4919 = vmatprep.mubr.msk.f32.mxu1 %vm1244_vm2, %v1463_v2 }
 0x6e6   : > { %v5889_v3 = vpop.eup %5888  ;;  %v4957_v4 = vpop.f32.mrb[8].mxu0  ;;  %5354 = vmatprep.subr.bf16.mxu1 %v5353_v19 }
 0x6e7   : > { %v1464_v5 = vmul.f32 %v5889_v3, %v5885_v57  ;;  %v1911_v6 = vpop.f32.mrb[9].mxu0  ;;  %v2210_v57 = vld [vmem:[#allocation2 + $0x78] sm:$0xff] }
 0x6e8   : > { %v5401_v61 = vpack.c.bf16 %v2210_v57, %v2209_v56  ;;  %v2358_v57 = vld [vmem:[#allocation4 + $0x30] sm:$0xff] }
 0x6e9   : > { %4920 = vmatmul.mubr.msk.f32.vlgmr.msra.gmra.mrb[6].mxu1 %vm1244_vm2, %v1464_v5 }
 0x6ea   : > { %5356 = vmatpush3.bf16.msra.mxu1 %v5353_v19  ;;  %v2456_v19 = vld [vmem:[#allocation4 + $0xa8] sm:$0xff] }
 0x6eb   : > { %5358 = vmatprep.subr.bf16.mxu1 %v5357_v21  ;;  %v5445_v22 = vpack.c.bf16 %v2456_v19, %v2455_v18 }
 0x6ee   : > { %5360 = vmatpush3.bf16.msra.mxu1 %v5357_v21  ;;  %v2353_v21 = vld [vmem:[#allocation4 + $0x8] sm:$0xff] }
 0x6ef   : > { %5362 = vmatprep.subr.bf16.mxu1 %v5361_v25  ;;  %v5405_v23 = vpack.c.bf16 %v2353_v21, %v2352_v20 }
 0x6f1   : > { %v4975_v9 = vpop.f32.mrb[10].mxu0  ;;  %5406 = vmatprep.subr.bf16.mxu0 %v5405_v23 }
 0x6f2   : > { %v2089_v11 = vpop.f32.mrb[11].mxu0  ;;  %v2101_v13 = vsel %vm1244_vm2, %v4975_v9, -inf  ;;  %5408 = vmatpush3.bf16.msra.mxu0 %v5405_v23 }
 0x6f3   : > { %v2098_v12 = vsel %vm1244_vm2, %v2089_v11, -inf }
 0x6f4   : > { %2099 = vmax.xlane.f32.xlu1 %v2098_v12  ;;  %v2453_v12 = vld [vmem:[#allocation4 + $0x90] sm:$0xff] }
 0x6f5   : > { %v5441_v17 = vpack.c.bf16 %v2454_v14, %v2453_v12  ;;  %v2365_v12 = vld [vmem:[#allocation4 + $0x68] sm:$0xff]  ;;  %v2366_v14 = vld [vmem:[#allocation4 + $0x70] sm:$0xff] }
 0x6f8   : > { %2102 = vmax.xlane.f32.xlu1 %v2101_v13 }
 0x781   : > { %v2100_v28 = vpop.xlane.xlu1 %2099 }
 0x782   : > { %v2104_v15 = vsub.f32 %v2089_v11, %v2100_v28  ;;  %v2452_v11 = vld [vmem:[#allocation4 + $0x88] sm:$0xff]  ;;  %v2458_v28 = vld [vmem:[#allocation4 + $0xb8] sm:$0xff] }
 0x784   : > { %v2106_v30 = vmul.f32 1.442695, %v2104_v15 }
 0x785   : > { %v2103_v29 = vpop.xlane.xlu1 %2102 }
 0x786   : > { %v2105_v16 = vsub.f32 %v4975_v9, %v2103_v29  ;;  %v2451_v9 = vld [vmem:[#allocation4 + $0x80] sm:$0xff] }
 0x787   : > { %v5437_v13 = vpack.c.bf16 %v2452_v11, %v2451_v9  ;;  %v2364_v9 = vld [vmem:[#allocation4 + $0x60] sm:$0xff] }
 0x788   : > { %v2108_v31 = vmul.f32 1.442695, %v2105_v16  ;;  %v2459_v16 = vld [vmem:[#allocation4 + $0xc0] sm:$0xff] }
 0x78a   : > { %5890 = vpow2.f32 %v2108_v31 }
 0x78b   : > { %5892 = vpow2.f32 %v2106_v30  ;;  %v2460_v30 = vld [vmem:[#allocation4 + $0xc8] sm:$0xff] }
 0x78c   : > { %v5453_v31 = vpack.c.bf16 %v2460_v30, %v2459_v16 }
 0x794   : > { %v5891_v32 = vpop.eup %5890 }
 0x795   : > { %v2113_v33 = vsel %vm1244_vm2, %v5891_v32, 0.0  ;;  %v5893_v34 = vpop.eup %5892 }
 0x796   : > { %2114 = vadd.xlane.f32.xlu1 %v2113_v33  ;;  %v2110_v35 = vsel %vm1244_vm2, %v5893_v34, 0.0  ;;  %v2462_v33 = vld [vmem:[#allocation4 + $0xd8] sm:$0xff] }
 0x79a   : > { %2111 = vadd.xlane.f32.xlu1 %v2110_v35  ;;  %v2463_v35 = vld [vmem:[#allocation4 + $0xe0] sm:$0xff] }
 0x79b   : > { %v5461_v37 = vpack.c.bf16 %v2464_v36, %v2463_v35  ;;  %v4455_v36 = vld [vmem:[%s7032_s11 + $0x1] ss:$0 sm:$0xff] }
 0x7ab   : > { %5802 = vrot.lane.b32.xlu1 %v6757_v24, %s6175_s25  ;;  %v5383_v24 = vpack.c.bf16 %v1923_v45, %v1922_v44 }
 0x7bc   : > { %v4921_v40 = vpop.f32.mrb[6].mxu1 }
 0x7bd   : > { %v1545_v41 = vpop.f32.mrb[7].mxu1 }
 0x7be   : > { %4930 = vmatprep.mubr.msk.f32.mxu1 %vm1156_vm0, %v1545_v41 }
 0x7bf   : > { %4931 = vmatmul.mubr.msk.f32.vlgmr.msra.gmra.mrb[8].mxu1 %vm1156_vm0, %v4921_v40 }
 0x7c0   : > { %5364 = vmatpush3.bf16.msra.mxu1 %v5361_v25  ;;  %4941 = vmatprep.mubr.msk.f32.mxu1 %vm1156_vm0, %v6742_v8  ;;  %v2355_v25 = vld [vmem:[#allocation4 + $0x18] sm:$0xff] }
 0x7c1   : > { %5366 = vmatprep.subr.bf16.mxu1 %v5365_v42 }
 0x7c4   : > { %5368 = vmatpush3.bf16.msra.mxu1 %v5365_v42 }
 0x7c5   : > { %5380 = vmatprep.subr.bf16.mxu1 %v5379_v43 }
 0x7c7   : > { %4942 = vmatmul.mubr.msk.f32.vlgmr.msra.gmra.mrb[8].mxu1 %vm1156_vm0, %v6740_v7 }
 0x7c8   : > { %5382 = vmatpush3.bf16.msra.mxu1 %v5379_v43  ;;  %4966 = vmatprep.mubr.msk.f32.mxu1 %vm1156_vm0, %v1911_v6 }
 0x7c9   : > { %5384 = vmatprep.subr.bf16.mxu1 %v5383_v24 }
 0x7cc   : > { %5386 = vmatpush3.bf16.msra.mxu1 %v5383_v24  ;;  %v2465_v24 = vld [vmem:[#allocation4 + $0xf0] sm:$0xff] }
 0x7cf   : > { %4967 = vmatmul.mubr.msk.f32.vlgmr.msra.gmra.mrb[8].mxu1 %vm1156_vm0, %v4957_v4 }
 0x823   : > { %v2115_v46 = vpop.xlane.xlu1 %2114 }
 0x824   : > { %5894 = vrcp.f32 %v2115_v46  ;;  %v2466_v46 = vld [vmem:[#allocation4 + $0xf8] sm:$0xff] }
 0x827   : > { %v2112_v8 = vpop.xlane.xlu1 %2111 }
 0x828   : > { %5896 = vrcp.f32 %v2112_v8  ;;  %v5465_v8 = vpack.c.bf16 %v2466_v46, %v2465_v24  ;;  %v2561_v46 = vld [vmem:[#allocation4 + $0x100] sm:$0xff] }
 0x82b   : > { %v5803_v47 = vpop.permute.xlu1 %5802 }
 0x82c   : > { %v5805_v50 = vunpack.i.h.bf16 %v5803_v47  ;;  %v5804_v53 = vunpack.i.l.bf16 %v5803_v47  ;;  %v2356_v47 = vld [vmem:[#allocation4 + $0x20] sm:$0xff] }
 0x82d   : > { %v5413_v49 = vpack.c.bf16 %v2357_v48, %v2356_v47  ;;  %v2563_v47 = vld [vmem:[#allocation4 + $0x110] sm:$0xff] }
 0x82e   : > { %v5393_v54 = vpack.c.bf16 %v5805_v50, %v5804_v53  ;;  %v5895_v7 = vpop.eup %5894  ;;  %v6814_v50 = vld [vmem:[%s831_s23] sm:$0xff] }
 0x82f   : > { %v2119_v60 = vmul.f32 %v5895_v7, %v5891_v32  ;;  %v2461_v32 = vld [vmem:[#allocation4 + $0xd0] sm:$0xff]  ;;  %v850_v53 = vld [vmem:[%s836_s29] sm:$0xff]  ;;  %v851_v7 = vld [vmem:[%s836_s29 + $0x8] sm:$0xff] }
 0x830   : > { %5394 = vmatprep.subr.bf16.mxu1 %v5393_v54 }
 0x831   : > { %5396 = vmatpush3.bf16.msra.mxu1 %v5393_v54  ;;  %v2348_v54 = vadd.f32 %v850_v53, %v6814_v50  ;;  %v2565_v53 = vld [vmem:[#allocation4 + $0x120] sm:$0xff] }
 0x832   : > { %v5897_v58 = vpop.eup %5896  ;;  %5398 = vmatprep.subr.bf16.mxu1 %v5397_v55 }
 0x833   : > { %v2118_v59 = vmul.f32 %v5897_v58, %v5893_v34  ;;  %v5457_v34 = vpack.c.bf16 %v2462_v33, %v2461_v32  ;;  %v2359_v58 = vld [vmem:[#allocation4 + $0x38] sm:$0xff] }
 0x835   : > { %4980 = vmatprep.mubr.msk.f32.mxu1 %vm1244_vm2, %v2118_v59  ;;  %v5417_v59 = vpack.c.bf16 %v2359_v58, %v2358_v57  ;;  %v2568_v57 = vld [vmem:[#allocation4 + $0x138] sm:$0xff] }
 0x836   : > { %4981 = vmatmul.mubr.msk.f32.vlgmr.msra.gmra.mrb[10].mxu1 %vm1244_vm2, %v2119_v60  ;;  %v2360_v60 = vld [vmem:[#allocation4 + $0x40] sm:$0xff] }
 0x837   : > { %5400 = vmatpush3.bf16.msra.mxu1 %v5397_v55  ;;  %v6817_v55 = vld [vmem:[%s831_s23 + $0x8] sm:$0xff] }
 0x838   : > { %5402 = vmatprep.subr.bf16.mxu1 %v5401_v61  ;;  %v2349_v56 = vadd.f32 %v851_v7, %v6817_v55 }
 0x83b   : > { %5404 = vmatpush3.bf16.msra.mxu1 %v5401_v61  ;;  %v2361_v61 = vld [vmem:[#allocation4 + $0x48] sm:$0xff] }
 0x83c   : > { %5438 = vmatprep.subr.bf16.mxu1 %v5437_v13 }
 0x909   : > { %v4982_v62 = vpop.f32.mrb[10].mxu1 }
 0x90a   : > { %v2198_v63 = vpop.f32.mrb[11].mxu1 }
 0x90b   : > { %4991 = vmatprep.mubr.msk.f32.mxu1 %vm1156_vm0, %v2198_v63  ;;  %v5421_v63 = vpack.c.bf16 %v2361_v61, %v2360_v60  ;;  %v2570_v60 = vld [vmem:[#allocation4 + $0x148] sm:$0xff] }
 0x90c   : > { %4992 = vmatmul.mubr.msk.f32.vlgmr.msra.gmra.mrb[8].mxu1 %vm1156_vm0, %v4982_v62  ;;  %v6820_v62 = vld [vmem:[%s831_s23 + $0x10] sm:$0xff] }
 0x90d   : > { %5440 = vmatpush3.bf16.msra.mxu1 %v5437_v13  ;;  %5061 = vmatprep.mubr.f32.mxu1 %v2348_v54  ;;  %v5429_v13 = vpack.c.bf16 %v2365_v12, %v2364_v9  ;;  %v2566_v54 = vld [vmem:[#allocation4 + $0x128] sm:$0xff]  ;;  %v2576_v9 = vld [vmem:[#allocation4 + $0x178] sm:$0xff] }
 0x90e   : > { %5442 = vmatprep.subr.bf16.mxu1 %v5441_v17  ;;  %v5477_v7 = vpack.c.bf16 %v2566_v54, %v2565_v53 }
 0x911   : > { %5444 = vmatpush3.bf16.msra.mxu1 %v5441_v17  ;;  %v2367_v17 = vld [vmem:[#allocation4 + $0x78] sm:$0xff] }
 0x912   : > { %5446 = vmatprep.subr.bf16.mxu1 %v5445_v22  ;;  %v5433_v18 = vpack.c.bf16 %v2367_v17, %v2366_v14 }
 0x915   : > { %5448 = vmatpush3.bf16.msra.mxu1 %v5445_v22 }
 0x9df   : > { %v4993_v1 = vpop.f32.mrb[8].mxu1 }
 0x9e0   : > { %v2302_v2 = vadd.f32 %v4993_v1, %v4450_v0  ;;  %v2283_v3 = vpop.f32.mrb[9].mxu1  ;;  %v6822_v1 = vld [vmem:[%s831_s23 + $0x18] sm:$0xff]  ;;  %s7094_s23 = sld [smem:[#allocation29_spill]] }
 0x9e1   : > { %v2301_v4 = vadd.f32 %v4450_v0, %v2283_v3  ;;  %v852_v0 = vld [vmem:[%s836_s29 + $0x10] sm:$0xff] }
 0x9e2   : > { %v2304_v5 = vadd.f32 %v2302_v2, %v6618_v51  ;;  %v2354_v51 = vld [vmem:[#allocation4 + $0x10] sm:$0xff]  ;;  %v853_v2 = vld [vmem:[%s836_s29 + $0x18] sm:$0xff]  ;;  %v2350_v3 = vadd.f32 %v852_v0, %v6820_v62 }
 0x9e3   : > { %v2303_v6 = vadd.f32 %v2301_v4, %v6568_v26  ;;  %v2457_v26 = vld [vmem:[#allocation4 + $0xb0] sm:$0xff]  ;;  %v5409_v15 = vpack.c.bf16 %v2355_v25, %v2354_v51  ;;  %v2351_v4 = vadd.f32 %v853_v2, %v6822_v1  ;;  %v2572_v0 = vld [vmem:[#allocation4 + $0x158] sm:$0xff] }
 0x9e4   : > { %2309 = vadd.xlane.f32.xlu1 %v2304_v5  ;;  %v5449_v29 = vpack.c.bf16 %v2458_v28, %v2457_v26  ;;  %v4451_v26 = vld [vmem:[%s7029_s8] ss:$0 sm:$0xff] }
 0x9e5   : > { %2307 = vadd.xlane.f32.xlu0 %v2303_v6  ;;  %5410 = vmatprep.subr.bf16.mxu0 %v5409_v15 }
 0x9e6   : > { %5412 = vmatpush3.bf16.msra.mxu0 %v5409_v15  ;;  %5450 = vmatprep.subr.bf16.mxu1 %v5449_v29  ;;  %v4452_v15 = vld [vmem:[%s7030_s9] ss:$0 sm:$0xff]  ;;  %s841_s17 = scalar_lea.vmem %s7094_s23, %s6535_s26 }
 0x9e7   : > { %5452 = vmatpush3.bf16.msra.mxu1 %v5449_v29  ;;  %5414 = vmatprep.subr.bf16.mxu0 %v5413_v49 }
 0x9e8   : > { %5454 = vmatprep.subr.bf16.mxu1 %v5453_v31 }
 0x9ea   : > { %5416 = vmatpush3.bf16.msra.mxu0 %v5413_v49  ;;  %v2564_v49 = vld [vmem:[#allocation4 + $0x118] sm:$0xff] }
 0x9eb   : > { %5456 = vmatpush3.bf16.msra.mxu1 %v5453_v31  ;;  %5418 = vmatprep.subr.bf16.mxu0 %v5417_v59 }
 0x9ec   : > { %5458 = vmatprep.subr.bf16.mxu1 %v5457_v34 }
 0x9ee   : > { %5420 = vmatpush3.bf16.msra.mxu0 %v5417_v59  ;;  %v2569_v59 = vld [vmem:[#allocation4 + $0x140] sm:$0xff] }
 0x9ef   : > { %5460 = vmatpush3.bf16.msra.mxu1 %v5457_v34  ;;  %5422 = vmatprep.subr.bf16.mxu0 %v5421_v63  ;;  %v5485_v61 = vpack.c.bf16 %v2570_v60, %v2569_v59 }
 0x9f0   : > { %5462 = vmatprep.subr.bf16.mxu1 %v5461_v37 }
 0x9f2   : > { %5424 = vmatpush3.bf16.msra.mxu0 %v5421_v63  ;;  %v2571_v63 = vld [vmem:[#allocation4 + $0x150] sm:$0xff] }
 0x9f3   : > { %5464 = vmatpush3.bf16.msra.mxu1 %v5461_v37  ;;  %v5489_v2 = vpack.c.bf16 %v2572_v0, %v2571_v63 }
 0x9f4   : > { %5466 = vmatprep.subr.bf16.mxu1 %v5465_v8 }
 0x9f7   : > { %5468 = vmatpush3.bf16.msra.mxu1 %v5465_v8  ;;  %v2562_v8 = vld [vmem:[#allocation4 + $0x108] sm:$0xff] }
 0x9f8   : > { %v5469_v48 = vpack.c.bf16 %v2562_v8, %v2561_v46 }
 0x9fa   : > { %5062 = vmatmul.mubr.f32.vlgmr.msra.gmra.mrb[12].mxu1 %v2349_v56  ;;  %v2567_v56 = vld [vmem:[#allocation4 + $0x130] sm:$0xff] }
 0x9fb   : > { %5064 = vmatprep.mubr.f32.mxu1 %v2350_v3  ;;  %v5481_v58 = vpack.c.bf16 %v2568_v57, %v2567_v56  ;;  %v2573_v3 = vld [vmem:[#allocation4 + $0x160] sm:$0xff] }
 0x9fe   : > { %5065 = vmatmul.mubr.f32.gmra.mrb[14].mxu1 %v2351_v4  ;;  %v2574_v4 = vld [vmem:[#allocation4 + $0x168] sm:$0xff] }
 0xa71   : > { %v2310_v40 = vpop.xlane.xlu1 %2309 }
 0xa72   : > { %v2308_v41 = vpop.xlane.xlu0 %2307  ;;  %v2313_v42 = vmul.f32 0.0078125, %v2310_v40 }
 0xa73   : > { %v2312_v38 = vmul.f32 0.0078125, %v2308_v41 }
 0xa74   : > { %v6801_v43 = vsub.f32 %v2304_v5, %v2313_v42  ;;  %v2362_v5 = vld [vmem:[#allocation4 + $0x50] sm:$0xff] }
 0xa75   : > { %v6799_v39 = vsub.f32 %v2303_v6, %v2312_v38  ;;  %v2363_v6 = vld [vmem:[#allocation4 + $0x58] sm:$0xff] }
 0xa76   : > { %v2317_v45 = vmul.f32 %v6801_v43, %v6801_v43  ;;  %v5425_v11 = vpack.c.bf16 %v2363_v6, %v2362_v5  ;;  %v5493_v5 = vpack.c.bf16 %v2574_v4, %v2573_v3  ;;  %v2575_v6 = vld [vmem:[#allocation4 + $0x170] sm:$0xff] }
 0xa77   : > { %v2316_v44 = vmul.f32 %v6799_v39, %v6799_v39 }
 0xa78   : > { %5426 = vmatprep.subr.bf16.mxu0 %v5425_v11 }
 0xa79   : > { %2318 = vadd.xlane.f32.xlu0 %v2316_v44  ;;  %5428 = vmatpush3.bf16.msra.mxu0 %v5425_v11  ;;  %v5497_v11 = vpack.c.bf16 %v2576_v9, %v2575_v6 }
 0xa7a   : > { %5430 = vmatprep.subr.bf16.mxu0 %v5429_v13 }
 0xa7d   : > { %2320 = vadd.xlane.f32.xlu0 %v2317_v45  ;;  %5432 = vmatpush3.bf16.msra.mxu0 %v5429_v13 }
 0xa7e   : > { %5434 = vmatprep.subr.bf16.mxu0 %v5433_v18 }
 0xa81   : > { %5436 = vmatpush3.bf16.msra.mxu0 %v5433_v18 }
 0xa82   : > { %5470 = vmatprep.subr.bf16.mxu0 %v5469_v48 }
 0xacd   : > { %v5063_v37 = vpop.f32.mrb[12].mxu1 }
 0xace   : > { %v2547_v40 = vadd.f32 %v5063_v37, %v4455_v36  ;;  %v2541_v41 = vpop.f32.mrb[13].mxu1 }
 0xacf   : > { %v2542_v42 = vadd.f32 %v4455_v36, %v2541_v41 }
 0xad1   : > { %v5501_v38 = vpack.c.bf16 %v2547_v40, %v2542_v42 }
 0xad3   : > { %5503 = vmatprep.subr.msk.bf16.mxu1 %vm6658_vm1, %v5501_v38 }
 0xad4   : > { %5506 = vmatpush3.bf16.xpose.msk.msra.mxu1 %vm6658_vm1, %v5501_v38 }
 0xb06   : > { %v2319_v19 = vpop.xlane.xlu0 %2318 }
 0xb07   : > { %v2322_v20 = vmul.f32 0.0078125, %v2319_v19 }
 0xb09   : > { %v2324_v21 = vadd.f32 1e-05, %v2322_v20 }
 0xb0a   : > { %v2321_v22 = vpop.xlane.xlu0 %2320 }
 0xb0b   : > { %5898 = vrsqrt.f32 %v2324_v21  ;;  %v2323_v23 = vmul.f32 0.0078125, %v2321_v22 }
 0xb0d   : > { %v2325_v51 = vadd.f32 1e-05, %v2323_v23 }
 0xb0f   : > { %5900 = vrsqrt.f32 %v2325_v51 }
 0xb15   : > { %v5899_v25 = vpop.eup %5898 }
 0xb16   : > { %v2328_v28 = vmul.f32 %v5899_v25, %v6799_v39  ;;  %v6846_v39 = vpack.i.bf16 %v2547_v40, %v2542_v42  ;;  %v4457_v40 = vld [vmem:[%s7032_s11 + $0x2] ss:$0 sm:$0xff] }
 0xb18   : > { %v2336_v29 = vmul.f32 %v4451_v26, %v2328_v28  ;;  %5807 = vrot.lane.b32.xlu0 %v6846_v39, %s6174_s16 }
 0xb19   : > { %v5901_v16 = vpop.eup %5900 }
 0xb1a   : > { %v2329_v30 = vmul.f32 %v5901_v16, %v6801_v43  ;;  %v6834_v31 = vadd.f32 %v4452_v15, %v2336_v29 }
 0xb1c   : > { %v2337_v32 = vmul.f32 %v4451_v26, %v2329_v30  ;;  %v2346_v33 = vadd.f32 %v6834_v31, %v6571_v27  ;;  %v5066_v27 = vpop.f32.mrb[14].mxu1 }
 0xb1d   : > { %v2551_v43 = vpop.f32.mrb[15].mxu1 }
 0xb1e   : > { %v6838_v34 = vadd.f32 %v4452_v15, %v2337_v32  ;;  %5026 = vmatprep.mubr.f32.mxu0 %v2346_v33  ;;  %v2552_v44 = vadd.f32 %v4455_v36, %v2551_v43 }
 0xb20   : > { %v2347_v35 = vadd.f32 %v6838_v34, %v6621_v52  ;;  %v2557_v52 = vadd.f32 %v5066_v27, %v4455_v36 }
 0xb22   : > { %5027 = vmatmul.mubr.f32.vlgmr.msra.gmra.mrb[12].mxu0 %v2347_v35  ;;  %v6854_v45 = vpack.i.bf16 %v2557_v52, %v2552_v44  ;;  %v5507_v24 = vpack.c.bf16 %v2557_v52, %v2552_v44 }
 0xb23   : > { %5099 = vmatprep.mubr.f32.mxu0 %v6814_v50  ;;  %v5473_v50 = vpack.c.bf16 %v2564_v49, %v2563_v47  ;;  %5472 = vmatpush3.bf16.msra.mxu0 %v5469_v48 }
 0xb24   : > { %5812 = vrot.lane.b32.xlu1 %v6854_v45, %s6174_s16  ;;  %5509 = vmatprep.subr.msk.bf16.mxu1 %vm6658_vm1, %v5507_v24 }
 0xb25   : > { %5512 = vmatpush3.bf16.xpose.msk.msra.mxu1 %vm6658_vm1, %v5507_v24  ;;  %5474 = vmatprep.subr.bf16.mxu0 %v5473_v50 }
 0xb27   : > { %5476 = vmatpush3.bf16.msra.mxu0 %v5473_v50 }
 0xb28   : > { %5478 = vmatprep.subr.bf16.mxu0 %v5477_v7 }
 0xb2b   : > { %5480 = vmatpush3.bf16.msra.mxu0 %v5477_v7 }
 0xb2c   : > { %5482 = vmatprep.subr.bf16.mxu0 %v5481_v58 }
 0xb2f   : > { %5484 = vmatpush3.bf16.msra.mxu0 %v5481_v58 }
 0xb30   : > { %5486 = vmatprep.subr.bf16.mxu0 %v5485_v61 }
 0xb33   : > { %5488 = vmatpush3.bf16.msra.mxu0 %v5485_v61 }
 0xb34   : > { %5490 = vmatprep.subr.bf16.mxu0 %v5489_v2 }
 0xb37   : > { %5492 = vmatpush3.bf16.msra.mxu0 %v5489_v2 }
 0xb38   : > { %5494 = vmatprep.subr.bf16.mxu0 %v5493_v5 }
 0xb3b   : > { %5496 = vmatpush3.bf16.msra.mxu0 %v5493_v5 }
 0xb3c   : > { %5498 = vmatprep.subr.bf16.mxu0 %v5497_v11 }
 0xb3f   : > { %5500 = vmatpush3.bf16.msra.mxu0 %v5497_v11 }
 0xb42   : > { %5100 = vmatmul.mubr.f32.vlgmr.msra.gmra.mrb[14].mxu0 %v6817_v55  ;;  %v4453_v55 = vld [vmem:[%s7032_s11] ss:$0 sm:$0xff] }
 0xb43   : > { %5102 = vmatprep.mubr.f32.mxu0 %v6820_v62 }
 0xb46   : > { %5103 = vmatmul.mubr.f32.gmra.mrb[16].mxu0 %v6822_v1 }
 0xb8a   : > { %v5808_v12 = vpop.permute.xlu0 %5807 }
 0xb8b   : > { %v5810_v13 = vunpack.i.h.bf16 %v5808_v12  ;;  %v5809_v14 = vunpack.i.l.bf16 %v5808_v12 }
 0xb8d   : > { %v5521_v17 = vpack.c.bf16 %v5810_v13, %v5809_v14 }
 0xb8f   : > { %5523 = vmatprep.subr.msk.bf16.mxu0 %vm6658_vm1, %v5521_v17 }
 0xb90   : > { %5526 = vmatpush3.bf16.xpose.msk.msra.mxu0 %vm6658_vm1, %v5521_v17 }
 0xb96   : > { %v5813_v18 = vpop.permute.xlu1 %5812 }
 0xb97   : > { %v5815_v19 = vunpack.i.h.bf16 %v5813_v18  ;;  %v5814_v20 = vunpack.i.l.bf16 %v5813_v18 }
 0xb99   : > { %v5527_v21 = vpack.c.bf16 %v5815_v19, %v5814_v20 }
 0xb9b   : > { %5529 = vmatprep.subr.msk.bf16.mxu0 %vm6658_vm1, %v5527_v21 }
 0xb9c   : > { %5532 = vmatpush3.bf16.xpose.msk.msra.mxu0 %vm6658_vm1, %v5527_v21 }
 0xbf5   : > { %v5028_v62 = vpop.f32.mrb[12].mxu0 }
 0xbf6   : > { %v2447_v1 = vadd.f32 %v5028_v62, %v4453_v55  ;;  %v2441_v22 = vpop.f32.mrb[13].mxu0 }
 0xbf7   : > { %v2442_v23 = vadd.f32 %v4453_v55, %v2441_v22 }
 0xbf8   : > { %v6876_v51 = vmul.f32 0.17677669, %v2447_v1 }
 0xbf9   : > { %v6878_v25 = vmul.f32 0.17677669, %v2442_v23 }
 0xbfa   : > { %2874 = vrot.lane.b32.xlu1 %v6876_v51, %s6174_s16 }
 0xbfb   : > { %2872 = vrot.lane.b32.xlu0 %v6878_v25, %s6174_s16  ;;  %5113 = vmatprep.mubr.msk.f32.mxu1 %vm1156_vm0, %v6878_v25 }
 0xbfc   : > { %5114 = vmatmul.mubr.msk.f32.vlgmr.msra.gmra.mrb[16].mxu1 %vm1156_vm0, %v6876_v51 }
 0xbfe   : > { %5822 = vrot.lane.b32.xlu1 %v6854_v45, %s6173_s27 }
 0xbff   : > { %5817 = vrot.lane.b32.xlu0 %v6846_v39, %s6173_s27 }
 0xc02   : > { %3258 = vrot.lane.b32.xlu1 %v6876_v51, %s6173_s27 }
 0xc03   : > { %3256 = vrot.lane.b32.xlu0 %v6878_v25, %s6173_s27 }
 0xc15   : > { %v5101_v41 = vpop.f32.mrb[14].mxu0 }
 0xc16   : > { %v2657_v42 = vadd.f32 %v5101_v41, %v4457_v40  ;;  %v2651_v38 = vpop.f32.mrb[15].mxu0 }
 0xc17   : > { %v2652_v27 = vadd.f32 %v4457_v40, %v2651_v38 }
 0xc19   : > { %v5513_v52 = vpack.c.bf16 %v2657_v42, %v2652_v27  ;;  %v5104_v43 = vpop.f32.mrb[16].mxu0  ;;  %v6911_v48 = vpack.i.bf16 %v2657_v42, %v2652_v27 }
 0xc1a   : > { %v2667_v44 = vadd.f32 %v5104_v43, %v4457_v40  ;;  %v2661_v24 = vpop.f32.mrb[17].mxu0 }
 0xc1b   : > { %5514 = vmatprep.subr.bf16.mxu1 %v5513_v52  ;;  %v2662_v46 = vadd.f32 %v4457_v40, %v2661_v24  ;;  %v3091_v40 = vld [vmem:[#allocation6 + $0x28] sm:$0xff] }
 0xc1c   : > { %5516 = vmatpush3.bf16.msra.mxu1 %v5513_v52 }
 0xc1d   : > { %v5517_v8 = vpack.c.bf16 %v2667_v44, %v2662_v46  ;;  %v6913_v49 = vpack.i.bf16 %v2667_v44, %v2662_v46 }
 0xc1f   : > { %5518 = vmatprep.subr.bf16.mxu1 %v5517_v8 }
 0xc20   : > { %5520 = vmatpush3.bf16.msra.mxu1 %v5517_v8 }
 0xc6c   : > { %v2875_v26 = vpop.permute.xlu1 %2874 }
 0xc6d   : > { %v2873_v28 = vpop.permute.xlu0 %2872 }
 0xc6e   : > { %5135 = vmatprep.mubr.msk.f32.mxu0 %vm1156_vm0, %v2873_v28 }
 0xc6f   : > { %5136 = vmatmul.mubr.msk.f32.vlgmr.msra.gmra.mrb[18].mxu0 %vm1156_vm0, %v2875_v26 }
 0xc70   : > { %v5823_v15 = vpop.permute.xlu1 %5822 }
 0xc71   : > { %v5818_v29 = vpop.permute.xlu0 %5817  ;;  %v5825_v16 = vunpack.i.h.bf16 %v5823_v15  ;;  %v5824_v30 = vunpack.i.l.bf16 %v5823_v15 }
 0xc72   : > { %v5820_v32 = vunpack.i.h.bf16 %v5818_v29  ;;  %v5819_v33 = vunpack.i.l.bf16 %v5818_v29 }
 0xc73   : > { %v5563_v37 = vpack.c.bf16 %v5825_v16, %v5824_v30 }
 0xc74   : > { %v5557_v35 = vpack.c.bf16 %v5820_v32, %v5819_v33  ;;  %v3259_v47 = vpop.permute.xlu1 %3258 }
 0xc75   : > { %v3257_v36 = vpop.permute.xlu0 %3256 }
 0xc76   : > { %5559 = vmatprep.subr.msk.bf16.mxu0 %vm6658_vm1, %v5557_v35  ;;  %5179 = vmatprep.mubr.msk.f32.mxu0 %vm1156_vm0, %v3257_v36 }
 0xc77   : > { %5562 = vmatpush3.bf16.xpose.msk.msra.mxu0 %vm6658_vm1, %v5557_v35 }
 0xc78   : > { %5565 = vmatprep.subr.msk.bf16.mxu0 %vm6658_vm1, %v5563_v37 }
 0xc7f   : > { %5568 = vmatpush3.bf16.xpose.msk.msra.mxu0 %vm6658_vm1, %v5563_v37  ;;  %v3090_v37 = vld [vmem:[#allocation6 + $0x20] sm:$0xff] }
 0xc80   : > { %v5541_v52 = vpack.c.bf16 %v3091_v40, %v3090_v37  ;;  %v3470_v37 = vld [vmem:[#allocation6 + $0x40] sm:$0xff]  ;;  %v3471_v40 = vld [vmem:[#allocation6 + $0x48] sm:$0xff] }
 0xc86   : > { %5180 = vmatmul.mubr.msk.f32.vlgmr.msra.gmra.mrb[20].mxu0 %vm1156_vm0, %v3259_v47 }
 0xccf   : > { %v5115_v50 = vpop.f32.mrb[16].mxu1 }
 0xcd0   : > { %v2756_v53 = vpop.f32.mrb[17].mxu1  ;;  %v2768_v54 = vsel %vm1156_vm0, %v5115_v50, -inf }
 0xcd1   : > { %2769 = vmax.xlane.f32.xlu1 %v2768_v54  ;;  %v2765_v7 = vsel %vm1156_vm0, %v2756_v53, -inf }
 0xcd2   : > { %2766 = vmax.xlane.f32.xlu0 %v2765_v7 }
 0xd42   : > { %v5137_v56 = vpop.f32.mrb[18].mxu0 }
 0xd43   : > { %v2962_v57 = vpop.f32.mrb[19].mxu0  ;;  %v2974_v59 = vsel %vm1156_vm0, %v5137_v56, -inf }
 0xd44   : > { %v2971_v58 = vsel %vm1156_vm0, %v2962_v57, -inf }
 0xd45   : > { %2972 = vmax.xlane.f32.xlu0 %v2971_v58 }
 0xd49   : > { %2975 = vmax.xlane.f32.xlu0 %v2974_v59 }
 0xd59   : > { %v6919_v60 = vpop.f32.mrb[20].mxu0 }
 0xd5a   : > { %v6921_v61 = vpop.f32.mrb[21].mxu0 }
 0xd5e   : > { %v2770_v63 = vpop.xlane.xlu1 %2769 }
 0xd5f   : > { %v2772_v0 = vsub.f32 %v5115_v50, %v2770_v63  ;;  %v2767_v2 = vpop.xlane.xlu0 %2766 }
 0xd60   : > { %v2771_v3 = vsub.f32 %v2756_v53, %v2767_v2 }
 0xd61   : > { %v2775_v4 = vmul.f32 1.442695, %v2772_v0 }
 0xd62   : > { %v2773_v5 = vmul.f32 1.442695, %v2771_v3 }
 0xd63   : > { %5902 = vpow2.f32 %v2775_v4 }
 0xd64   : > { %5904 = vpow2.f32 %v2773_v5 }
 0xd6d   : > { %v5903_v6 = vpop.eup %5902 }
 0xd6e   : > { %v5905_v9 = vpop.eup %5904  ;;  %v2780_v11 = vsel %vm1156_vm0, %v5903_v6, 0.0 }
 0xd6f   : > { %2781 = vadd.xlane.f32.xlu1 %v2780_v11  ;;  %v2777_v12 = vsel %vm1156_vm0, %v5905_v9, 0.0  ;;  %v3093_v11 = vld [vmem:[#allocation6 + $0x38] sm:$0xff] }
 0xd70   : > { %2778 = vadd.xlane.f32.xlu0 %v2777_v12 }
 0xdd2   : > { %v2973_v13 = vpop.xlane.xlu0 %2972 }
 0xdd3   : > { %v2977_v14 = vsub.f32 %v2962_v57, %v2973_v13  ;;  %v2869_v13 = vld [vmem:[#allocation6 + $0x8] sm:$0xff] }
 0xdd5   : > { %v2979_v17 = vmul.f32 1.442695, %v2977_v14 }
 0xdd6   : > { %v2976_v18 = vpop.xlane.xlu0 %2975 }
 0xdd7   : > { %5906 = vpow2.f32 %v2979_v17  ;;  %v2978_v19 = vsub.f32 %v5137_v56, %v2976_v18 }
 0xdd9   : > { %v2981_v20 = vmul.f32 1.442695, %v2978_v19  ;;  %v2870_v19 = vld [vmem:[#allocation6 + $0x10] sm:$0xff] }
 0xddb   : > { %5908 = vpow2.f32 %v2981_v20  ;;  %v2871_v20 = vld [vmem:[#allocation6 + $0x18] sm:$0xff] }
 0xde1   : > { %v5907_v21 = vpop.eup %5906 }
 0xde2   : > { %v2983_v55 = vsel %vm1156_vm0, %v5907_v21, 0.0 }
 0xde3   : > { %2984 = vadd.xlane.f32.xlu0 %v2983_v55 }
 0xde5   : > { %v5909_v62 = vpop.eup %5908 }
 0xde6   : > { %v2986_v1 = vsel %vm1156_vm0, %v5909_v62, 0.0 }
 0xde7   : > { %2987 = vadd.xlane.f32.xlu1 %v2986_v1 }
 0xdf8   : > { %5832 = vrot.lane.b32.xlu1 %v6913_v49, %s6174_s16 }
 0xdf9   : > { %5827 = vrot.lane.b32.xlu0 %v6911_v48, %s6174_s16 }
 0xdfc   : > { %v2782_v22 = vpop.xlane.xlu1 %2781  ;;  %5837 = vrot.lane.b32.xlu1 %v6846_v39, %s6175_s25  ;;  %v3355_v39 = vsel %vm1156_vm0, %v6921_v61, -inf }
 0xdfd   : > { %5910 = vrcp.f32 %v2782_v22  ;;  %3557 = vrot.lane.b32.xlu0 %v6878_v25, %s6175_s25  ;;  %v2779_v23 = vpop.xlane.xlu0 %2778  ;;  %v3358_v25 = vsel %vm1156_vm0, %v6919_v60, -inf }
 0xdfe   : > { %5912 = vrcp.f32 %v2779_v23 }
 0xe00   : > { %5842 = vrot.lane.b32.xlu1 %v6854_v45, %s6175_s25 }
 0xe04   : > { %3559 = vrot.lane.b32.xlu1 %v6876_v51, %s6175_s25 }
 0xe07   : > { %v5911_v26 = vpop.eup %5910 }
 0xe08   : > { %v5913_v28 = vpop.eup %5912  ;;  %v2786_v29 = vmul.f32 %v5911_v26, %v5903_v6 }
 0xe09   : > { %v2785_v15 = vmul.f32 %v5913_v28, %v5905_v9  ;;  %v3092_v9 = vld [vmem:[#allocation6 + $0x30] sm:$0xff] }
 0xe0a   : > { %v5545_v12 = vpack.c.bf16 %v3093_v11, %v3092_v9 }
 0xe0b   : > { %5124 = vmatprep.mubr.msk.f32.mxu1 %vm1156_vm0, %v2785_v15 }
 0xe0c   : > { %5125 = vmatmul.mubr.msk.f32.vlgmr.msra.gmra.mrb[18].mxu1 %vm1156_vm0, %v2786_v29 }
 0xe1c   : > { %3356 = vmax.xlane.f32.xlu0 %v3355_v39 }
 0xe28   : > { %3359 = vmax.xlane.f32.xlu1 %v3358_v25 }
 0xe39   : > { %5852 = vrot.lane.b32.xlu1 %v6913_v49, %s6173_s27 }
 0xe70   : > { %v2985_v45 = vpop.xlane.xlu0 %2984 }
 0xe71   : > { %5914 = vrcp.f32 %v2985_v45 }
 0xe74   : > { %v2988_v51 = vpop.xlane.xlu1 %2987  ;;  %v5828_v16 = vpop.permute.xlu0 %5827 }
 0xe75   : > { %5916 = vrcp.f32 %v2988_v51  ;;  %v5830_v30 = vunpack.i.h.bf16 %v5828_v16  ;;  %v5829_v32 = vunpack.i.l.bf16 %v5828_v16 }
 0xe77   : > { %v5533_v33 = vpack.c.bf16 %v5830_v30, %v5829_v32 }
 0xe78   : > { %v5833_v35 = vpop.permute.xlu1 %5832  ;;  %v3558_v36 = vpop.permute.xlu0 %3557 }
 0xe79   : > { %v5835_v41 = vunpack.i.h.bf16 %v5833_v35  ;;  %v5834_v42 = vunpack.i.l.bf16 %v5833_v35  ;;  %5534 = vmatprep.subr.bf16.mxu1 %v5533_v33  ;;  %5212 = vmatprep.mubr.msk.f32.mxu0 %vm1156_vm0, %v3558_v36 }
 0xe7a   : > { %5536 = vmatpush3.bf16.msra.mxu1 %v5533_v33 }
 0xe7b   : > { %v5915_v38 = vpop.eup %5914  ;;  %v5537_v27 = vpack.c.bf16 %v5835_v41, %v5834_v42  ;;  %v3472_v41 = vld [vmem:[#allocation6 + $0x50] sm:$0xff]  ;;  %v5577_v42 = vpack.c.bf16 %v3471_v40, %v3470_v37 }
 0xe7c   : > { %v5838_v43 = vpop.permute.xlu1 %5837  ;;  %v2991_v44 = vmul.f32 %v5915_v38, %v5907_v21  ;;  %v3473_v38 = vld [vmem:[#allocation6 + $0x58] sm:$0xff] }
 0xe7d   : > { %v5840_v24 = vunpack.i.h.bf16 %v5838_v43  ;;  %v5839_v46 = vunpack.i.l.bf16 %v5838_v43  ;;  %5538 = vmatprep.subr.bf16.mxu1 %v5537_v27 }
 0xe7e   : > { %5540 = vmatpush3.bf16.msra.mxu1 %v5537_v27  ;;  %5146 = vmatprep.mubr.msk.f32.mxu1 %vm1156_vm0, %v2991_v44  ;;  %v5581_v27 = vpack.c.bf16 %v3473_v38, %v3472_v41 }
 0xe7f   : > { %v5917_v8 = vpop.eup %5916  ;;  %v5585_v47 = vpack.c.bf16 %v5840_v24, %v5839_v46  ;;  %5542 = vmatprep.subr.bf16.mxu1 %v5541_v52 }
 0xe80   : > { %v2992_v50 = vmul.f32 %v5917_v8, %v5909_v62  ;;  %v5843_v53 = vpop.permute.xlu1 %5842  ;;  %v5553_v62 = vpack.c.bf16 %v2871_v20, %v2870_v19  ;;  %v4498_v19 = vld [vmem:[%s7034_s13] ss:$0 sm:$0xff] }
 0xe81   : > { %v5845_v54 = vunpack.i.h.bf16 %v5843_v53  ;;  %v5844_v7 = vunpack.i.l.bf16 %v5843_v53  ;;  %5587 = vmatprep.subr.msk.bf16.mxu0 %vm6658_vm1, %v5585_v47 }
 0xe82   : > { %5147 = vmatmul.mubr.msk.f32.vlgmr.msra.gmra.mrb[20].mxu1 %vm1156_vm0, %v2992_v50  ;;  %5590 = vmatpush3.bf16.xpose.msk.msra.mxu0 %vm6658_vm1, %v5585_v47 }
 0xe83   : > { %v5591_v56 = vpack.c.bf16 %v5845_v54, %v5844_v7  ;;  %5544 = vmatpush3.bf16.msra.mxu1 %v5541_v52 }
 0xe84   : > { %v3560_v57 = vpop.permute.xlu1 %3559  ;;  %5546 = vmatprep.subr.bf16.mxu1 %v5545_v12 }
 0xe85   : > { %5593 = vmatprep.subr.msk.bf16.mxu0 %vm6658_vm1, %v5591_v56 }
 0xe87   : > { %5548 = vmatpush3.bf16.msra.mxu1 %v5545_v12 }
 0xe8a   : > { %5596 = vmatpush3.bf16.xpose.msk.msra.mxu0 %vm6658_vm1, %v5591_v56 }
 0xe91   : > { %5213 = vmatmul.mubr.msk.f32.vlgmr.msra.gmra.mrb[22].mxu0 %vm1156_vm0, %v3560_v57 }
 0xea9   : > { %v3357_v58 = vpop.xlane.xlu0 %3356 }
 0xeaa   : > { %v3361_v59 = vsub.f32 %v6921_v61, %v3357_v58  ;;  %v2868_v61 = vld [vmem:[#allocation6] sm:$0xff] }
 0xeac   : > { %v3363_v2 = vmul.f32 1.442695, %v3361_v59 }
 0xeb5   : > { %v3360_v63 = vpop.xlane.xlu1 %3359 }
 0xeb6   : > { %v3362_v0 = vsub.f32 %v6919_v60, %v3360_v63  ;;  %v5549_v60 = vpack.c.bf16 %v2869_v13, %v2868_v61  ;;  %v3773_v61 = vld [vmem:[#allocation6 + $0x70] sm:$0xff]  ;;  %v3774_v13 = vld [vmem:[#allocation6 + $0x78] sm:$0xff] }
 0xeb8   : > { %v3365_v3 = vmul.f32 1.442695, %v3362_v0  ;;  %5550 = vmatprep.subr.bf16.mxu1 %v5549_v60 }
 0xeb9   : > { %v5853_v22 = vpop.permute.xlu1 %5852 }
 0xeba   : > { %5918 = vpow2.f32 %v3365_v3  ;;  %v5855_v26 = vunpack.i.h.bf16 %v5853_v22  ;;  %v5854_v28 = vunpack.i.l.bf16 %v5853_v22 }
 0xebb   : > { %5920 = vpow2.f32 %v3363_v2 }
 0xebc   : > { %v5573_v25 = vpack.c.bf16 %v5855_v26, %v5854_v28  ;;  %v3912_v26 = vld [vmem:[#allocation7 + $0x18] sm:$0xff]  ;;  %v3909_v28 = vld [vmem:[#allocation7] sm:$0xff] }
 0xec4   : > { %v5919_v4 = vpop.eup %5918 }
 0xec5   : > { %v3370_v5 = vsel %vm1156_vm0, %v5919_v4, 0.0  ;;  %v5921_v6 = vpop.eup %5920 }
 0xec6   : > { %3371 = vadd.xlane.f32.xlu0 %v3370_v5  ;;  %v3367_v10 = vsel %vm1156_vm0, %v5921_v6, 0.0  ;;  %v3771_v5 = vld [vmem:[#allocation6 + $0x60] sm:$0xff] }
 0xeca   : > { %3368 = vadd.xlane.f32.xlu0 %v3367_v10 }
 0xedf   : > { %v5126_v14 = vpop.f32.mrb[18].mxu1 }
 0xee0   : > { %v2859_v17 = vpop.f32.mrb[19].mxu1  ;;  %5847 = vrot.lane.b32.xlu0 %v6911_v48, %s6173_s27 }
 0xf53   : > { %v3372_v18 = vpop.xlane.xlu0 %3371 }
 0xf55   : > { %v5148_v21 = vpop.f32.mrb[20].mxu1 }
 0xf56   : > { %v3081_v55 = vpop.f32.mrb[21].mxu1 }
 0xf57   : > { %v3369_v1 = vpop.xlane.xlu0 %3368  ;;  %5157 = vmatprep.mubr.msk.f32.mxu1 %vm1156_vm0, %v3081_v55 }
 0xf58   : > { %5922 = vrcp.f32 %v3369_v1  ;;  %5158 = vmatmul.mubr.msk.f32.vlgmr.msra.gmra.mrb[22].mxu1 %vm1156_vm0, %v5148_v21 }
 0xf59   : > { %5924 = vrcp.f32 %v3372_v18  ;;  %5552 = vmatpush3.bf16.msra.mxu1 %v5549_v60  ;;  %5168 = vmatprep.mubr.msk.f32.mxu1 %vm1156_vm0, %v2859_v17 }
 0xf5a   : > { %5554 = vmatprep.subr.bf16.mxu1 %v5553_v62 }
 0xf5b   : > { %v5848_v23 = vpop.permute.xlu0 %5847 }
 0xf5c   : > { %v5850_v15 = vunpack.i.h.bf16 %v5848_v23  ;;  %v5849_v29 = vunpack.i.l.bf16 %v5848_v23  ;;  %v3910_v23 = vld [vmem:[#allocation7 + $0x8] sm:$0xff] }
 0xf5d   : > { %5556 = vmatpush3.bf16.msra.mxu1 %v5553_v62 }
 0xf5e   : > { %v5569_v39 = vpack.c.bf16 %v5850_v15, %v5849_v29  ;;  %v5613_v15 = vpack.c.bf16 %v3912_v26, %v3910_v23  ;;  %v3911_v29 = vld [vmem:[#allocation7 + $0x10] sm:$0xff] }
 0xf60   : > { %5169 = vmatmul.mubr.msk.f32.vlgmr.msra.gmra.mrb[22].mxu1 %vm1156_vm0, %v5126_v14  ;;  %5570 = vmatprep.subr.bf16.mxu1 %v5569_v39  ;;  %v5609_v14 = vpack.c.bf16 %v3774_v13, %v3773_v61  ;;  %v3940_v61 = vld [vmem:[#allocation7 + $0xf8] sm:$0xff] }
 0xf61   : > { %5572 = vmatpush3.bf16.msra.mxu1 %v5569_v39  ;;  %v3914_v39 = vld [vmem:[#allocation7 + $0x28] sm:$0xff]  ;;  %5614 = vmatprep.subr.bf16.mxu0 %v5613_v15  ;;  %v4037_v15 = vld [vmem:[#allocation9 + $0x18] sm:$0xff] }
 0xf62   : > { %v5923_v45 = vpop.eup %5922  ;;  %5574 = vmatprep.subr.bf16.mxu1 %v5573_v25 }
 0xf63   : > { %v5925_v51 = vpop.eup %5924  ;;  %v3375_v16 = vmul.f32 %v5923_v45, %v5921_v6  ;;  %v3772_v6 = vld [vmem:[#allocation6 + $0x68] sm:$0xff]  ;;  %v5615_v45 = vpack.c.bf16 %v3911_v29, %v3909_v28  ;;  %v4036_v28 = vld [vmem:[#allocation9 + $0x10] sm:$0xff]  ;;  %v4054_v29 = vld [vmem:[#allocation9 + $0xa0] sm:$0xff] }
 0xf64   : > { %v5214_v30 = vpop.f32.mrb[22].mxu0  ;;  %v3376_v35 = vmul.f32 %v5925_v51, %v5919_v4  ;;  %v5605_v9 = vpack.c.bf16 %v3772_v6, %v3771_v5  ;;  %v3936_v5 = vld [vmem:[#allocation7 + $0xd8] sm:$0xff]  ;;  %v6176_v6 = vmov 0.0  }
 0xf65   : > { %5576 = vmatpush3.bf16.msra.mxu1 %v5573_v25  ;;  %5190 = vmatprep.mubr.msk.f32.mxu1 %vm1156_vm0, %v3375_v16  ;;  %v3647_v32 = vpop.f32.mrb[23].mxu0  ;;  %v3659_v33 = vsel %vm1156_vm0, %v5214_v30, -inf  ;;  %v3916_v25 = vld [vmem:[#allocation7 + $0x38] sm:$0xff]  ;;  %v3913_v16 = vld [vmem:[#allocation7 + $0x20] sm:$0xff] }
 0xf66   : > { %3660 = vmax.xlane.f32.xlu0 %v3659_v33  ;;  %v3656_v36 = vsel %vm1156_vm0, %v3647_v32, -inf  ;;  %5578 = vmatprep.subr.bf16.mxu1 %v5577_v42  ;;  %v5617_v51 = vpack.c.bf16 %v3916_v25, %v3914_v39  ;;  %v3920_v33 = vld [vmem:[#allocation7 + $0x58] sm:$0xff]  ;;  %v4055_v39 = vld [vmem:[#allocation9 + $0xa8] sm:$0xff]  ;;  %v5651_v25 = vpack.c.bf16 %v4037_v15, %v4036_v28 }
 0xf67   : > { %3657 = vmax.xlane.f32.xlu1 %v3656_v36  ;;  %5616 = vmatpush1.bf16.msra.mxu0 %v5615_v45  ;;  %v3919_v36 = vld [vmem:[#allocation7 + $0x50] sm:$0xff]  ;;  %v5653_v45 = vpack.c.bf16 %v4055_v39, %v4054_v29 }
 0xf68   : > { %5191 = vmatmul.mubr.msk.f32.vlgmr.msra.gmra.mrb[24].mxu1 %vm1156_vm0, %v3376_v35  ;;  %5618 = vmatprep.subr.bf16.mxu0 %v5617_v51  ;;  %v3917_v35 = vld [vmem:[#allocation7 + $0x40] sm:$0xff] }
 0xf69   : > { %5580 = vmatpush3.bf16.msra.mxu1 %v5577_v42  ;;  %v5623_v37 = vpack.c.bf16 %v3919_v36, %v3917_v35  ;;  %4017 = vmatprep.mubr.f32.mxu0 %v6176_v6  ;;  %v4038_v51 = vld [vmem:[#allocation9 + $0x20] sm:$0xff]  ;;  %v4041_v35 = vld [vmem:[#allocation9 + $0x38] sm:$0xff] }
 0xf6a   : > { %5582 = vmatprep.subr.bf16.mxu1 %v5581_v27  ;;  %v4058_v36 = vld [vmem:[#allocation9 + $0xc0] sm:$0xff] }
 0xf6d   : > { %5584 = vmatpush3.bf16.msra.mxu1 %v5581_v27 }
 0xff3   : > { %v3661_v52 = vpop.xlane.xlu0 %3660 }
 0xff4   : > { %v3663_v43 = vsub.f32 %v5214_v30, %v3661_v52  ;;  %v3658_v44 = vpop.xlane.xlu1 %3657  ;;  %v3915_v30 = vld [vmem:[#allocation7 + $0x30] sm:$0xff] }
 0xff5   : > { %v3662_v24 = vsub.f32 %v3647_v32, %v3658_v44  ;;  %v3918_v32 = vld [vmem:[#allocation7 + $0x48] sm:$0xff] }
 0xff6   : > { %v3666_v46 = vmul.f32 1.442695, %v3663_v43 }
 0xff7   : > { %v3664_v8 = vmul.f32 1.442695, %v3662_v24  ;;  %v3922_v24 = vld [vmem:[#allocation7 + $0x68] sm:$0xff] }
 0xff8   : > { %5926 = vpow2.f32 %v3666_v46  ;;  %v3924_v46 = vld [vmem:[#allocation7 + $0x78] sm:$0xff] }
 0xff9   : > { %5928 = vpow2.f32 %v3664_v8  ;;  %v5625_v8 = vpack.c.bf16 %v3924_v46, %v3922_v24 }
0x1002   : > { %v5927_v47 = vpop.eup %5926 }
0x1003   : > { %v5929_v50 = vpop.eup %5928  ;;  %v3671_v53 = vsel %vm1156_vm0, %v5927_v47, 0.0 }
0x1004   : > { %3672 = vadd.xlane.f32.xlu1 %v3671_v53  ;;  %v3668_v54 = vsel %vm1156_vm0, %v5929_v50, 0.0 }
0x1005   : > { %3669 = vadd.xlane.f32.xlu0 %v3668_v54  ;;  %v3926_v54 = vld [vmem:[#allocation7 + $0x88] sm:$0xff] }
0x1015   : > { %5862 = vrot.lane.b32.xlu1 %v6913_v49, %s6175_s25 }
0x101b   : > { %5857 = vrot.lane.b32.xlu0 %v6911_v48, %s6175_s25 }
0x103b   : > { %v5192_v7 = vpop.f32.mrb[24].mxu1 }
0x103c   : > { %v3461_v56 = vpop.f32.mrb[25].mxu1 }
0x103d   : > { %5201 = vmatprep.mubr.msk.f32.mxu1 %vm1156_vm0, %v3461_v56 }
0x103e   : > { %5202 = vmatmul.mubr.msk.f32.vlgmr.msra.gmra.mrb[22].mxu1 %vm1156_vm0, %v5192_v7  ;;  %v3928_v7 = vld [vmem:[#allocation7 + $0x98] sm:$0xff] }
0x103f   : > { %v5629_v56 = vpack.c.bf16 %v3928_v7, %v3926_v54 }
0x1091   : > { %v3673_v57 = vpop.xlane.xlu1 %3672 }
0x1092   : > { %v3670_v58 = vpop.xlane.xlu0 %3669 }
0x1093   : > { %5930 = vrcp.f32 %v3670_v58  ;;  %v3927_v58 = vld [vmem:[#allocation7 + $0x90] sm:$0xff] }
0x1094   : > { %5932 = vrcp.f32 %v3673_v57  ;;  %v3925_v57 = vld [vmem:[#allocation7 + $0x80] sm:$0xff] }
0x1095   : > { %v5863_v59 = vpop.permute.xlu1 %5862 }
0x1096   : > { %v5858_v63 = vpop.permute.xlu0 %5857  ;;  %v5865_v0 = vunpack.i.h.bf16 %v5863_v59  ;;  %v5864_v2 = vunpack.i.l.bf16 %v5863_v59  ;;  %v5631_v59 = vpack.c.bf16 %v3927_v58, %v3925_v57 }
0x1097   : > { %v5860_v3 = vunpack.i.h.bf16 %v5858_v63  ;;  %v5859_v4 = vunpack.i.l.bf16 %v5858_v63  ;;  %v3930_v63 = vld [vmem:[#allocation7 + $0xa8] sm:$0xff] }
0x1098   : > { %v5601_v48 = vpack.c.bf16 %v5865_v0, %v5864_v2  ;;  %v3932_v0 = vld [vmem:[#allocation7 + $0xb8] sm:$0xff]  ;;  %v3929_v2 = vld [vmem:[#allocation7 + $0xa0] sm:$0xff] }
0x1099   : > { %v5597_v49 = vpack.c.bf16 %v5860_v3, %v5859_v4  ;;  %v5633_v3 = vpack.c.bf16 %v3932_v0, %v3930_v63  ;;  %v3931_v4 = vld [vmem:[#allocation7 + $0xb0] sm:$0xff] }
0x109b   : > { %5598 = vmatprep.subr.bf16.mxu1 %v5597_v49 }
0x109c   : > { %5600 = vmatpush3.bf16.msra.mxu1 %v5597_v49  ;;  %v3934_v49 = vld [vmem:[#allocation7 + $0xc8] sm:$0xff] }
0x109d   : > { %v5931_v10 = vpop.eup %5930  ;;  %5602 = vmatprep.subr.bf16.mxu1 %v5601_v48 }
0x109e   : > { %v5933_v11 = vpop.eup %5932  ;;  %v3676_v12 = vmul.f32 %v5931_v10, %v5929_v50  ;;  %v3923_v50 = vld [vmem:[#allocation7 + $0x70] sm:$0xff]  ;;  %v5637_v10 = vpack.c.bf16 %v3936_v5, %v3934_v49 }
0x109f   : > { %v3677_v60 = vmul.f32 %v5933_v11, %v5927_v47  ;;  %v3921_v47 = vld [vmem:[#allocation7 + $0x60] sm:$0xff]  ;;  %v3935_v11 = vld [vmem:[#allocation7 + $0xd0] sm:$0xff] }
0x10a0   : > { %5604 = vmatpush3.bf16.msra.mxu1 %v5601_v48  ;;  %5223 = vmatprep.mubr.msk.f32.mxu1 %vm1156_vm0, %v3676_v12  ;;  %v5627_v53 = vpack.c.bf16 %v3923_v50, %v3921_v47  ;;  %v5635_v48 = vpack.c.bf16 %v3931_v4, %v3929_v2  ;;  %v3938_v12 = vld [vmem:[#allocation7 + $0xe8] sm:$0xff]  ;;  %v4045_v47 = vld [vmem:[#allocation9 + $0x58] sm:$0xff]  ;;  %v4062_v50 = vld [vmem:[#allocation9 + $0xe0] sm:$0xff] }
0x10a1   : > { %5606 = vmatprep.subr.bf16.mxu1 %v5605_v9  ;;  %v4499_v4 = vld [vmem:[%s7035_s14] ss:$0 sm:$0xff] }
0x10a3   : > { %5224 = vmatmul.mubr.msk.f32.vlgmr.msra.gmra.mrb[26].mxu1 %vm1156_vm0, %v3677_v60  ;;  %v5641_v60 = vpack.c.bf16 %v3940_v61, %v3938_v12  ;;  %v4046_v61 = vld [vmem:[#allocation9 + $0x60] sm:$0xff] }
0x10a4   : > { %5608 = vmatpush3.bf16.msra.mxu1 %v5605_v9  ;;  %v3933_v9 = vld [vmem:[#allocation7 + $0xc0] sm:$0xff] }
0x10a5   : > { %5610 = vmatprep.subr.bf16.mxu1 %v5609_v14  ;;  %v5639_v13 = vpack.c.bf16 %v3935_v11, %v3933_v9 }
0x10a8   : > { %5612 = vmatpush3.bf16.msra.mxu1 %v5609_v14  ;;  %v3937_v14 = vld [vmem:[#allocation7 + $0xe0] sm:$0xff] }
0x1176   : > { %v5225_v17 = vpop.f32.mrb[26].mxu1 }
0x1177   : > { %v3762_v18 = vpop.f32.mrb[27].mxu1 }
0x1178   : > { %5234 = vmatprep.mubr.msk.f32.mxu1 %vm1156_vm0, %v3762_v18 }
0x1179   : > { %5235 = vmatmul.mubr.msk.f32.vlgmr.msra.gmra.mrb[22].mxu1 %vm1156_vm0, %v5225_v17  ;;  %v3939_v17 = vld [vmem:[#allocation7 + $0xf0] sm:$0xff] }
0x117a   : > { %v5643_v18 = vpack.c.bf16 %v3939_v17, %v3937_v14  ;;  %v4064_v14 = vld [vmem:[#allocation9 + $0xf0] sm:$0xff] }
0x124c   : > { %v5236_v20 = vpop.f32.mrb[22].mxu1 }
0x124d   : > { %v3866_v21 = vadd.f32 %v5236_v20, %v4498_v19  ;;  %v3847_v55 = vpop.f32.mrb[23].mxu1  ;;  %v4051_v20 = vld [vmem:[#allocation9 + $0x88] sm:$0xff] }
0x124e   : > { %v3865_v62 = vadd.f32 %v4498_v19, %v3847_v55  ;;  %v4050_v19 = vld [vmem:[#allocation9 + $0x80] sm:$0xff] }
0x124f   : > { %v3868_v1 = vadd.f32 %v3866_v21, %v6838_v34  ;;  %v5619_v34 = vpack.c.bf16 %v3915_v30, %v3913_v16  ;;  %v4034_v21 = vld [vmem:[#allocation9] sm:$0xff]  ;;  %v5645_v55 = vpack.c.bf16 %v4051_v20, %v4050_v19  ;;  %v4039_v16 = vld [vmem:[#allocation9 + $0x28] sm:$0xff]  ;;  %v4056_v30 = vld [vmem:[#allocation9 + $0xb0] sm:$0xff]  ;;  %v3943_v20 = vlaneseq }
0x1250   : > { %v3867_v22 = vadd.f32 %v3865_v62, %v6834_v31  ;;  %v5621_v31 = vpack.c.bf16 %v3920_v33, %v3918_v32  ;;  %v4035_v62 = vld [vmem:[#allocation9 + $0x8] sm:$0xff]  ;;  %v4057_v32 = vld [vmem:[#allocation9 + $0xb8] sm:$0xff]  ;;  %v5655_v33 = vpack.c.bf16 %v4039_v16, %v4038_v51 }
0x1251   : > { %3873 = vadd.xlane.f32.xlu0 %v3868_v1  ;;  %5620 = vmatpush1.bf16.msra.mxu0 %v5619_v34  ;;  %v5647_v23 = vpack.c.bf16 %v4035_v62, %v4034_v21  ;;  %v5657_v34 = vpack.c.bf16 %v4057_v32, %v4056_v30  ;;  %v3944_v21 = vshrl.u32 %v3943_v20, 7 }
0x1252   : > { %3871 = vadd.xlane.f32.xlu1 %v3867_v22  ;;  %5622 = vmatprep.subr.bf16.mxu0 %v5621_v31  ;;  %v4040_v31 = vld [vmem:[#allocation9 + $0x30] sm:$0xff] }
0x1253   : > { %5646 = vmatprep.subr.bf16.mxu1 %v5645_v55  ;;  %v3945_v55 = vsub.s32 0, %v3944_v21  ;;  %v3949_v62 = vsub.s32 1, %v3944_v21 }
0x1254   : > { %5648 = vmatpush3.bf16.msra.mxu1 %v5647_v23 }
0x1255   : > { %5624 = vmatpush1.bf16.msra.mxu0 %v5623_v37  ;;  %v4059_v37 = vld [vmem:[#allocation9 + $0xc8] sm:$0xff] }
0x1256   : > { %5626 = vmatprep.subr.bf16.mxu0 %v5625_v8  ;;  %v4044_v8 = vld [vmem:[#allocation9 + $0x50] sm:$0xff] }
0x1257   : > { %v5667_v54 = vpack.c.bf16 %v4045_v47, %v4044_v8 }
0x1259   : > { %5628 = vmatpush1.bf16.msra.mxu0 %v5627_v53  ;;  %v4063_v53 = vld [vmem:[#allocation9 + $0xe8] sm:$0xff] }
0x125a   : > { %5630 = vmatprep.subr.bf16.mxu0 %v5629_v56  ;;  %v5669_v7 = vpack.c.bf16 %v4063_v53, %v4062_v50 }
0x125d   : > { %5632 = vmatpush1.bf16.msra.mxu0 %v5631_v59 }
0x125e   : > { %5634 = vmatprep.subr.bf16.mxu0 %v5633_v3 }
0x1261   : > { %5636 = vmatpush1.bf16.msra.mxu0 %v5635_v48  ;;  %v4500_v48 = vld [vmem:[%s7036_s15] ss:$0 sm:$0xff] }
0x1262   : > { %5638 = vmatprep.subr.bf16.mxu0 %v5637_v10 }
0x1265   : > { %5640 = vmatpush1.bf16.msra.mxu0 %v5639_v13  ;;  %v4047_v13 = vld [vmem:[#allocation9 + $0x68] sm:$0xff] }
0x1266   : > { %5642 = vmatprep.subr.bf16.mxu0 %v5641_v60  ;;  %v5671_v60 = vpack.c.bf16 %v4047_v13, %v4046_v61 }
0x1269   : > { %5644 = vmatpush1.bf16.msra.mxu0 %v5643_v18  ;;  %v4049_v18 = vld [vmem:[#allocation9 + $0x78] sm:$0xff] }
0x12de   : > { %v3874_v40 = vpop.xlane.xlu0 %3873 }
0x12df   : > { %v3876_v41 = vmul.f32 0.0078125, %v3874_v40  ;;  %v3872_v42 = vpop.xlane.xlu1 %3871  ;;  %v5659_v40 = vpack.c.bf16 %v4041_v35, %v4040_v31 }
0x12e0   : > { %v3875_v38 = vmul.f32 0.0078125, %v3872_v42  ;;  %v4042_v42 = vld [vmem:[#allocation9 + $0x40] sm:$0xff] }
0x12e1   : > { %v6990_v27 = vsub.f32 %v3868_v1, %v3876_v41  ;;  %v4052_v1 = vld [vmem:[#allocation9 + $0x90] sm:$0xff]  ;;  %v5661_v41 = vpack.c.bf16 %v4059_v37, %v4058_v36 }
0x12e2   : > { %v6992_v52 = vsub.f32 %v3867_v22, %v3875_v38  ;;  %v4053_v22 = vld [vmem:[#allocation9 + $0x98] sm:$0xff]  ;;  %v4043_v38 = vld [vmem:[#allocation9 + $0x48] sm:$0xff] }
0x12e3   : > { %v3880_v43 = vmul.f32 %v6990_v27, %v6990_v27  ;;  %v5649_v26 = vpack.c.bf16 %v4053_v22, %v4052_v1  ;;  %v5663_v24 = vpack.c.bf16 %v4043_v38, %v4042_v42 }
0x12e4   : > { %v3879_v44 = vmul.f32 %v6992_v52, %v6992_v52 }
0x12e5   : > { %3883 = vadd.xlane.f32.xlu1 %v3880_v43  ;;  %5650 = vmatprep.subr.bf16.mxu1 %v5649_v26  ;;  %v4060_v43 = vld [vmem:[#allocation9 + $0xd0] sm:$0xff] }
0x12e6   : > { %3881 = vadd.xlane.f32.xlu0 %v3879_v44  ;;  %5652 = vmatpush3.bf16.msra.mxu1 %v5651_v25  ;;  %v4061_v44 = vld [vmem:[#allocation9 + $0xd8] sm:$0xff] }
0x12e7   : > { %5654 = vmatprep.subr.bf16.mxu1 %v5653_v45  ;;  %v5665_v46 = vpack.c.bf16 %v4061_v44, %v4060_v43 }
0x12ea   : > { %5656 = vmatpush3.bf16.msra.mxu1 %v5655_v33 }
0x12eb   : > { %5658 = vmatprep.subr.bf16.mxu1 %v5657_v34  ;;  %v4501_v34 = vld [vmem:[%s7093_s4] ss:$0 sm:$0xff] }
0x12ee   : > { %5660 = vmatpush3.bf16.msra.mxu1 %v5659_v40 }
0x12ef   : > { %5662 = vmatprep.subr.bf16.mxu1 %v5661_v41 }
0x12f2   : > { %5664 = vmatpush3.bf16.msra.mxu1 %v5663_v24 }
0x12f3   : > { %5666 = vmatprep.subr.bf16.mxu1 %v5665_v46 }
0x12f6   : > { %5668 = vmatpush3.bf16.msra.mxu1 %v5667_v54 }
0x12f7   : > { %5670 = vmatprep.subr.bf16.mxu1 %v5669_v7 }
0x12fa   : > { %5672 = vmatpush3.bf16.msra.mxu1 %v5671_v60 }
0x1372   : > { %v3884_v56 = vpop.xlane.xlu1 %3883 }
0x1373   : > { %v3886_v57 = vmul.f32 0.0078125, %v3884_v56  ;;  %v3882_v58 = vpop.xlane.xlu0 %3881 }
0x1374   : > { %v3885_v59 = vmul.f32 0.0078125, %v3882_v58 }
0x1375   : > { %v3888_v63 = vadd.f32 1e-05, %v3886_v57 }
0x1376   : > { %v3887_v0 = vadd.f32 1e-05, %v3885_v59 }
0x1377   : > { %5934 = vrsqrt.f32 %v3888_v63 }
0x1378   : > { %5936 = vrsqrt.f32 %v3887_v0 }
0x1381   : > { %v5935_v2 = vpop.eup %5934 }
0x1382   : > { %v5937_v3 = vpop.eup %5936  ;;  %v3892_v5 = vmul.f32 %v5935_v2, %v6990_v27  ;;  %v4048_v27 = vld [vmem:[#allocation9 + $0x70] sm:$0xff]  ;;  %v4502_v2 = vld [vmem:[#allocation10] ss:$0 sm:$0xff] }
0x1383   : > { %v3891_v49 = vmul.f32 %v5937_v3, %v6992_v52  ;;  %v4065_v52 = vld [vmem:[#allocation9 + $0xf8] sm:$0xff]  ;;  %v5675_v19 = vpack.c.bf16 %v4049_v18, %v4048_v27 }
0x1384   : > { %v3900_v11 = vmul.f32 %v4499_v4, %v3892_v5  ;;  %v5673_v17 = vpack.c.bf16 %v4065_v52, %v4064_v14 }
0x1385   : > { %v3899_v10 = vmul.f32 %v4499_v4, %v3891_v49  ;;  %v4503_v4 = vld [vmem:[#allocation12] ss:$0 sm:$0xff] }
0x1386   : > { %v3908_v12 = vadd.f32 %v4500_v48, %v3900_v11  ;;  %5674 = vmatprep.subr.bf16.mxu1 %v5673_v17 }
0x1387   : > { %v3907_v9 = vadd.f32 %v4500_v48, %v3899_v10  ;;  %5676 = vmatpush3.bf16.msra.mxu1 %v5675_v19 }
0x1389   : > { %4018 = vmatmul.mubr.f32.vlgmr.msra.gmra.mrb[24].mxu0 %v3907_v9 }
0x138a   : > { %4023 = vmatprep.mubr.f32.mxu0 %v6176_v6  ;;  %v3941_v6 = vld [vmem:[%s7092_s2] sm:$0x3] }
0x138b   : > { %v3946_v1 = vrot.slane %v3941_v6, %v3945_v55  ;;  %v3950_v22 = vrot.slane %v3941_v6, %v3949_v62 }
0x138d   : > { %4024 = vmatmul.mubr.f32.gmra.mrb[26].mxu0 %v3908_v12 }
0x145c   : > { %v4019_v23 = vpop.f32.mrb[24].mxu0 }
0x145d   : > { %v4020_v26 = vadd.f32 %v4019_v23, %v3946_v1  ;;  %v4021_v28 = vpop.f32.mrb[25].mxu0 }
0x145e   : > { %v4022_v15 = vadd.f32 %v4021_v28, %v3950_v22 }
0x145f   : > { %v4030_v25 = vmax.f32 %v4020_v26, 0.0 }
0x1460   : > { %v4031_v29 = vmax.f32 %v4022_v15, 0.0  ;;  %v4025_v39 = vpop.f32.mrb[26].mxu0 }
0x1461   : > { %v4026_v45 = vadd.f32 %v4025_v39, %v3946_v1  ;;  %v4027_v51 = vpop.f32.mrb[27].mxu0 }
0x1462   : > { %v4028_v16 = vadd.f32 %v4027_v51, %v3950_v22  ;;  %4137 = vmatprep.mubr.f32.mxu1 %v4031_v29 }
0x1463   : > { %4138 = vmatmul.mubr.f32.vlgmr.msra.gmra.mrb[28].mxu1 %v4030_v25  ;;  %v4032_v32 = vmax.f32 %v4026_v45, 0.0 }
0x1464   : > { %v4033_v30 = vmax.f32 %v4028_v16, 0.0 }
0x1466   : > { %4142 = vmatprep.mubr.f32.mxu1 %v4033_v30 }
0x1467   : > { %4143 = vmatmul.mubr.f32.gmra.mrb[30].mxu1 %v4032_v32 }
0x1536   : > { %v4783_v33 = vpop.f32.mrb[28].mxu1 }
0x1537   : > { %v4784_v31 = vpop.f32.mrb[29].mxu1 }
0x1538   : > { %v4785_v35 = vadd.f32 %v4784_v31, %v4783_v33 }
0x153a   : > { %v4140_v36 = vadd.f32 %v4785_v35, %v4501_v34  ;;  %v4786_v37 = vpop.f32.mrb[30].mxu1 }
0x153b   : > { %v4787_v40 = vpop.f32.mrb[31].mxu1 }
0x153c   : > { %v4788_v41 = vadd.f32 %v4787_v40, %v4786_v37  ;;  %v4148_v42 = vadd.f32 %v4140_v36, %v3907_v9 }
0x153e   : > { %v4145_v38 = vadd.f32 %v4788_v41, %v4501_v34  ;;  %4152 = vadd.xlane.f32.xlu0 %v4148_v42 }
0x1540   : > { %v4149_v43 = vadd.f32 %v4145_v38, %v3908_v12 }
0x1542   : > { %4154 = vadd.xlane.f32.xlu1 %v4149_v43 }
0x15cb   : > { %v4153_v44 = vpop.xlane.xlu0 %4152 }
0x15cc   : > { %v4156_v24 = vmul.f32 0.0078125, %v4153_v44 }
0x15ce   : > { %v4158_v46 = vsub.f32 %v4148_v42, %v4156_v24 }
0x15cf   : > { %v4155_v8 = vpop.xlane.xlu1 %4154 }
0x15d0   : > { %v4157_v47 = vmul.f32 0.0078125, %v4155_v8  ;;  %v4160_v50 = vmul.f32 %v4158_v46, %v4158_v46 }
0x15d2   : > { %v4159_v53 = vsub.f32 %v4149_v43, %v4157_v47  ;;  %4162 = vadd.xlane.f32.xlu0 %v4160_v50 }
0x15d4   : > { %v4161_v54 = vmul.f32 %v4159_v53, %v4159_v53 }
0x15d6   : > { %4164 = vadd.xlane.f32.xlu1 %v4161_v54 }
0x165f   : > { %v4163_v7 = vpop.xlane.xlu0 %4162 }
0x1660   : > { %v4166_v56 = vmul.f32 0.0078125, %v4163_v7 }
0x1662   : > { %v4168_v57 = vadd.f32 1e-05, %v4166_v56 }
0x1663   : > { %v4165_v58 = vpop.xlane.xlu1 %4164 }
0x1664   : > { %5938 = vrsqrt.f32 %v4168_v57  ;;  %v4167_v59 = vmul.f32 0.0078125, %v4165_v58 }
0x1666   : > { %v4169_v63 = vadd.f32 1e-05, %v4167_v59 }
0x1668   : > { %5940 = vrsqrt.f32 %v4169_v63 }
0x166e   : > { %v5939_v0 = vpop.eup %5938 }
0x166f   : > { %v4172_v3 = vmul.f32 %v5939_v0, %v4158_v46 }
0x1671   : > { %v4180_v49 = vmul.f32 %v4502_v2, %v4172_v3 }
0x1672   : > { %v5941_v5 = vpop.eup %5940 }
0x1673   : > { %v4188_v48 = vadd.f32 %v4503_v4, %v4180_v49  ;;  %v4173_v10 = vmul.f32 %v5941_v5, %v4159_v53 }
0x1675   : > { %4190 = vst [vmem:[%s841_s17] sm:$0xff] %v4188_v48  ;;  %v4181_v9 = vmul.f32 %v4502_v2, %v4173_v10 }
0x1677   : > { %v4189_v11 = vadd.f32 %v4503_v4, %v4181_v9 }
0x1679   : > { %4191 = vst [vmem:[%s841_s17 + $0x8] sm:$0xff] %v4189_v11 }
0x167a PF: > { %s7095_s27 = sld [smem:[#allocation17_spill]] }
0x1680   : > { %s36_s3 = sadd.s32 1, %s7095_s27  }
0x1681   : > { %p33_p6 = scmp.ge.s32.totalorder %s36_s3, 4  }
0x1683   :  { %35 = sbr.rel (!%p33_p6) target bundleno = 17 (0x11), region = 184 }
0x168a   :  { %4213 = vsyncpa [#allocation3], 1 }
0x168b   :  { %4215 = vsyncpa [#allocation3 + $0x1], 1 }
0x168c   :  { %4216 = vsyncpa [#allocation5], 1 }
0x168d   :  { %4217 = vsyncpa [#allocation8], 1 }
0x168e   :  { %4218 = vsyncpa [#allocation11], 1 }

</bundles_post_ra>
